<compile_context>
chip_gen: v5e
topology: v5e:2x2
jax: 0.10.0
libtpu: 0.0.40
codegen_flags: <defaults>
</compile_context>

<pallas_src>
import functools

import jax
import jax.numpy as jnp
from jax.experimental import pallas as pl
from jax.experimental.pallas import tpu as pltpu


def _round_up(x, m):
    return (x + m - 1) // m * m


# ----------------------------------------------------------------------------
# Pallas kernel: tiled (im2col-matmul -> per-channel affine -> LeakyReLU)
# ----------------------------------------------------------------------------
def _conv_mm_kernel(a_ref, w_ref, scale_ref, shift_ref, o_ref, acc_ref, *,
                    apply_act, neg_slope):
    # a_ref:     (tm, tk)  im2col patch tile
    # w_ref:     (tk, tn)  flattened conv-weight tile
    # scale_ref: (1, tn)   folded BN scale (ones on padded channels)
    # shift_ref: (1, tn)   folded BN shift + conv bias (zeros on padding)
    # o_ref:     (tm, tn)  output tile
    # acc_ref:   (tm, tn)  f32 accumulator (VMEM scratch, persists over k)
    k = pl.program_id(2)

    @pl.when(k == 0)
    def _():
        acc_ref[...] = jnp.zeros_like(acc_ref)

    acc_ref[...] += jnp.dot(a_ref[...], w_ref[...],
                            preferred_element_type=jnp.float32)

    @pl.when(k == pl.num_programs(2) - 1)
    def _():
        y = acc_ref[...] * scale_ref[...] + shift_ref[...]
        if apply_act:
            y = jnp.where(y >= 0, y, neg_slope * y)
        o_ref[...] = y.astype(o_ref.dtype)


def fused_conv_matmul(a, w, scale, shift, *, apply_act, neg_slope=0.2,
                      mxu_dtype=jnp.float32):
    """Tiled Pallas matmul with fused per-channel affine + LeakyReLU.

    a:     (M, K)  im2col patches
    w:     (K, C)  flattened conv weights
    scale: (C,)    per-output-channel scale
    shift: (C,)    per-output-channel shift
    Returns (M, C) float32.
    """
    M, K = a.shape
    Kw, C = w.shape
    assert K == Kw

    # Sublane alignment of the (possibly sub-32-bit) MXU input dtype.
    itemsize = jnp.dtype(mxu_dtype).itemsize
    sublane = 8 * (4 // itemsize)          # f32 -> 8, bf16 -> 16

    # Tile sizes: lane-dense (multiples of 128) on K / Cout, sublane-aligned on
    # M.  Working set (2x double-buffered A/W/out + f32 acc) stays well under
    # the 16 MiB v5e scoped-VMEM default at 512/512/256.
    tm = min(512, _round_up(M, sublane))
    tk = min(512, _round_up(K, 128))
    tn = min(256, _round_up(C, 128))
    m_pad = _round_up(M, tm)
    k_pad = _round_up(K, tk)
    c_pad = _round_up(C, tn)

    a_p = jnp.pad(a, ((0, m_pad - M), (0, k_pad - K))).astype(mxu_dtype)
    w_p = jnp.pad(w, ((0, k_pad - K), (0, c_pad - C))).astype(mxu_dtype)
    scale_p = jnp.pad(scale.reshape(1, C).astype(jnp.float32),
                      ((0, 0), (0, c_pad - C)), constant_values=1.0)
    shift_p = jnp.pad(shift.reshape(1, C).astype(jnp.float32),
                      ((0, 0), (0, c_pad - C)))

    grid = (m_pad // tm, c_pad // tn, k_pad // tk)
    kernel = functools.partial(_conv_mm_kernel, apply_act=apply_act,
                               neg_slope=neg_slope)

    bytes_accessed = (a_p.size * itemsize + w_p.size * itemsize
                      + m_pad * c_pad * 4)
    out = pl.pallas_call(
        kernel,
        out_shape=jax.ShapeDtypeStruct((m_pad, c_pad), jnp.float32),
        grid_spec=pltpu.PrefetchScalarGridSpec(
            num_scalar_prefetch=0,
            grid=grid,
            in_specs=[
                pl.BlockSpec((tm, tk), lambda i, j, k: (i, k)),
                pl.BlockSpec((tk, tn), lambda i, j, k: (k, j)),
                pl.BlockSpec((1, tn), lambda i, j, k: (0, j)),
                pl.BlockSpec((1, tn), lambda i, j, k: (0, j)),
            ],
            out_specs=pl.BlockSpec((tm, tn), lambda i, j, k: (i, j)),
            scratch_shapes=[pltpu.VMEM((tm, tn), jnp.float32)],
        ),
        compiler_params=pltpu.CompilerParams(
            dimension_semantics=("parallel", "parallel", "arbitrary")),
        cost_estimate=pl.CostEstimate(
            flops=2 * m_pad * k_pad * c_pad,
            transcendentals=0,
            bytes_accessed=bytes_accessed),
    )(a_p, w_p, scale_p, shift_p)
    return out[:M, :C]


# ----------------------------------------------------------------------------
# Glue: channels-last im2col, parameter folding, layer loop
# ----------------------------------------------------------------------------
def im2col_nhwc(x, kh, kw, stride, pad):
    """x: (N, H, W, C) -> A: (N*Ho*Wo, kh*kw*C)."""
    N, H, W, C = x.shape
    xp = jnp.pad(x, ((0, 0), (pad, pad), (pad, pad), (0, 0)))
    Ho = (H + 2 * pad - kh) // stride + 1
    Wo = (W + 2 * pad - kw) // stride + 1
    cols = []
    for i in range(kh):
        for j in range(kw):
            cols.append(xp[:, i:i + stride * Ho:stride,
                           j:j + stride * Wo:stride, :])     # (N, Ho, Wo, C)
    cols = jnp.stack(cols, axis=3)                            # (N,Ho,Wo,kh*kw,C)
    return cols.reshape(N * Ho * Wo, kh * kw * C), Ho, Wo


def conv_layer(x_nhwc, weight, scale, shift, *, stride, pad, apply_act,
               mxu_dtype=jnp.float32):
    """weight: (Cout, Cin, kh, kw) PyTorch layout; x: NHWC -> NHWC."""
    N = x_nhwc.shape[0]
    cout, cin, kh, kw = weight.shape
    a, ho, wo = im2col_nhwc(x_nhwc, kh, kw, stride, pad)
    # Flatten weights to (K = kh*kw*Cin, Cout) matching the patch K ordering.
    w2d = weight.transpose(2, 3, 1, 0).reshape(kh * kw * cin, cout)
    y = fused_conv_matmul(a, w2d, scale, shift, apply_act=apply_act,
                          mxu_dtype=mxu_dtype)
    return y.reshape(N, ho, wo, cout)


def init_params(key, in_channels=1, conv_channels=(64, 128, 256),
                kernel_sizes=(4, 4, 4, 4)):
    dims = [in_channels] + list(conv_channels) + [1]
    params = []
    for i in range(len(dims) - 1):
        key, kw_, kb, kg, kbt, km, kv = jax.random.split(key, 7)
        cin, cout, k = dims[i], dims[i + 1], kernel_sizes[i]
        w = jax.random.normal(kw_, (cout, cin, k, k), jnp.float32) * 0.05
        p = {"weight": w}
        if i == 0:  # only layer 0 has a bias
            p["bias"] = jax.random.normal(kb, (cout,), jnp.float32) * 0.05
        if i != 0 and i != len(dims) - 2:  # BN on middle layers
            p["gamma"] = 1.0 + 0.1 * jax.random.normal(kg, (cout,), jnp.float32)
            p["beta"] = 0.1 * jax.random.normal(kbt, (cout,), jnp.float32)
            p["mean"] = 0.1 * jax.random.normal(km, (cout,), jnp.float32)
            p["var"] = jnp.abs(1.0 + 0.1 * jax.random.normal(kv, (cout,),
                                                             jnp.float32))
        params.append(p)
    return params


def discriminator_forward(x_nchw, params, strides=(2, 2, 2, 1),
                          paddings=(1, 1, 1, 1), eps=1e-5,
                          mxu_dtype=jnp.float32):
    out = jnp.transpose(x_nchw, (0, 2, 3, 1))     # NCHW -> NHWC, once
    n_layers = len(params)
    for i, p in enumerate(params):
        cout = p["weight"].shape[0]
        bias = p.get("bias", jnp.zeros((cout,), jnp.float32))
        if "gamma" in p:  # fold eval-mode BN (applied after conv+bias)
            s = p["gamma"] / jnp.sqrt(p["var"] + eps)
            scale = s
            shift = (bias - p["mean"]) * s + p["beta"]
        else:
            scale = jnp.ones((cout,), jnp.float32)
            shift = bias
        apply_act = (i != n_layers - 1)
        out = conv_layer(out, p["weight"], scale, shift,
                         stride=strides[i], pad=paddings[i],
                         apply_act=apply_act, mxu_dtype=mxu_dtype)
    return jnp.transpose(out, (0, 3, 1, 2))       # NHWC -> NCHW, once


# ----------------------------------------------------------------------------
# Pure-JAX reference (lax.conv) for validation
# ----------------------------------------------------------------------------
def reference_forward(x, params, strides=(2, 2, 2, 1), paddings=(1, 1, 1, 1),
                      eps=1e-5):
    out = x
    n_layers = len(params)
    for i, p in enumerate(params):
        s, pad = strides[i], paddings[i]
        out = jax.lax.conv_general_dilated(
            out, p["weight"], window_strides=(s, s),
            padding=[(pad, pad), (pad, pad)],
            dimension_numbers=("NCHW", "OIHW", "NCHW"))
        if "bias" in p:
            out = out + p["bias"][None, :, None, None]
        if "gamma" in p:
            mean = p["mean"][None, :, None, None]
            var = p["var"][None, :, None, None]
            out = (out - mean) / jnp.sqrt(var + eps)
            out = out * p["gamma"][None, :, None, None] + \
                p["beta"][None, :, None, None]
        if i != n_layers - 1:
            out = jnp.where(out >= 0, out, 0.2 * out)
    return out


if __name__ == "__main__":
    key = jax.random.PRNGKey(0)
    kx, kp = jax.random.split(key)
    x = jax.random.normal(kx, (2, 1, 32, 32), jnp.float32)   # N, C, H, W
    params = init_params(kp)

    fwd = jax.jit(discriminator_forward)
    y = jax.block_until_ready(fwd(x, params))

    y_ref = reference_forward(x, params)
    assert y.shape == y_ref.shape == (2, 1, 3, 3), y.shape
    max_err = jnp.max(jnp.abs(y - y_ref))
    assert jnp.allclose(y, y_ref, atol=1e-3, rtol=1e-3), \
        f"max abs err {max_err}"

    # bf16-MXU-input path (v6e/v7x-friendly): run once to confirm it executes.
    y_bf16 = jax.block_until_ready(
        discriminator_forward(x, params, mxu_dtype=jnp.bfloat16))
    assert y_bf16.shape == y.shape
    assert bool(jnp.all(jnp.isfinite(y_bf16)))

    print("KERNEL_OK")
</pallas_src>

<mosaic_0001>
module attributes {stable_mosaic.version = 11 : i64} {
  func.func @_conv_mm_kernel(%arg0: i32, %arg1: i32, %arg2: i32, %arg3: memref<512x128xf32, #tpu.memory_space<vmem>>, %arg4: memref<128x128xf32, #tpu.memory_space<vmem>>, %arg5: memref<1x128xf32, #tpu.memory_space<vmem>>, %arg6: memref<1x128xf32, #tpu.memory_space<vmem>>, %arg7: memref<512x128xf32, #tpu.memory_space<vmem>>, %arg8: memref<512x128xf32, #tpu.memory_space<vmem>>) attributes {dimension_semantics = [#tpu.dimension_semantics<parallel>, #tpu.dimension_semantics<parallel>, #tpu.dimension_semantics<arbitrary>], iteration_bounds = array<i64: 1, 1, 1>, scalar_prefetch = 0 : i64, scratch_operands = 1 : i64, tpu.core_type = #tpu.core_type<tc>, window_params = [{transform_indices = @transform_0, window_bounds = array<i64: 512, 128>}, {transform_indices = @transform_1, window_bounds = array<i64: 128, 128>}, {transform_indices = @transform_2, window_bounds = array<i64: 1, 128>}, {transform_indices = @transform_3, window_bounds = array<i64: 1, 128>}, {transform_indices = @transform_4, window_bounds = array<i64: 512, 128>}]} {
    %c0_i32 = arith.constant 0 : i32
    %0 = arith.cmpi eq, %arg2, %c0_i32 : i32
    %1 = arith.extui %0 : i1 to i32
    %c0_i32_0 = arith.constant 0 : i32
    %2 = arith.cmpi ne, %1, %c0_i32_0 : i32
    scf.if %2 {
      %cst_10 = arith.constant 0.000000e+00 : f32
      %12 = vector.broadcast %cst_10 : f32 to vector<512x128xf32>
      %c0_11 = arith.constant 0 : index
      %c0_12 = arith.constant 0 : index
      %13 = vector.load %arg8[%c0_11, %c0_12] : memref<512x128xf32, #tpu.memory_space<vmem>>, vector<512x128xf32>
      tpu.vector_store %arg8[%c0_11, %c0_12], %12 {strides = array<i32>} : memref<512x128xf32, #tpu.memory_space<vmem>>, vector<512x128xf32>,
    } else {
    }
    %c0 = arith.constant 0 : index
    %c0_1 = arith.constant 0 : index
    %3 = vector.load %arg8[%c0, %c0_1] : memref<512x128xf32, #tpu.memory_space<vmem>>, vector<512x128xf32>
    %c0_2 = arith.constant 0 : index
    %c0_3 = arith.constant 0 : index
    %4 = vector.load %arg3[%c0_2, %c0_3] : memref<512x128xf32, #tpu.memory_space<vmem>>, vector<512x128xf32>
    %c0_4 = arith.constant 0 : index
    %c0_5 = arith.constant 0 : index
    %5 = vector.load %arg4[%c0_4, %c0_5] : memref<128x128xf32, #tpu.memory_space<vmem>>, vector<128x128xf32>
    %cst = arith.constant dense<0.000000e+00> : vector<512x128xf32>
    %6 = tpu.matmul %4, %5, %cst {dimension_numbers = #tpu.dot_dimension_numbers<[1], [0], [0], [1], [0, 0, 1, 1], [], []>} : vector<512x128xf32>, vector<128x128xf32>, vector<512x128xf32> -> vector<512x128xf32>
    %7 = arith.addf %3, %6 : vector<512x128xf32>
    %c0_6 = arith.constant 0 : index
    %c0_7 = arith.constant 0 : index
    %8 = vector.load %arg8[%c0_6, %c0_7] : memref<512x128xf32, #tpu.memory_space<vmem>>, vector<512x128xf32>
    tpu.vector_store %arg8[%c0_6, %c0_7], %7 {strides = array<i32>} : memref<512x128xf32, #tpu.memory_space<vmem>>, vector<512x128xf32>,
    %c0_i32_8 = arith.constant 0 : i32
    %9 = arith.cmpi eq, %arg2, %c0_i32_8 : i32
    %10 = arith.extui %9 : i1 to i32
    %c0_i32_9 = arith.constant 0 : i32
    %11 = arith.cmpi ne, %10, %c0_i32_9 : i32
    scf.if %11 {
      %c0_10 = arith.constant 0 : index
      %c0_11 = arith.constant 0 : index
      %12 = vector.load %arg8[%c0_10, %c0_11] : memref<512x128xf32, #tpu.memory_space<vmem>>, vector<512x128xf32>
      %c0_12 = arith.constant 0 : index
      %c0_13 = arith.constant 0 : index
      %13 = vector.load %arg5[%c0_12, %c0_13] : memref<1x128xf32, #tpu.memory_space<vmem>>, vector<1x128xf32>
      %14 = vector.broadcast %13 : vector<1x128xf32> to vector<512x128xf32>
      %15 = arith.mulf %12, %14 : vector<512x128xf32>
      %c0_14 = arith.constant 0 : index
      %c0_15 = arith.constant 0 : index
      %16 = vector.load %arg6[%c0_14, %c0_15] : memref<1x128xf32, #tpu.memory_space<vmem>>, vector<1x128xf32>
      %17 = vector.broadcast %16 : vector<1x128xf32> to vector<512x128xf32>
      %18 = arith.addf %15, %17 : vector<512x128xf32>
      %cst_16 = arith.constant 0.000000e+00 : f32
      %19 = vector.broadcast %cst_16 : f32 to vector<512x128xf32>
      %20 = arith.cmpf oge, %18, %19 : vector<512x128xf32>
      %cst_17 = arith.constant 2.000000e-01 : f32
      %21 = vector.broadcast %cst_17 : f32 to vector<512x128xf32>
      %22 = arith.mulf %21, %18 : vector<512x128xf32>
      %23 = arith.select %20, %18, %22 : vector<512x128xi1>, vector<512x128xf32>
      %c0_18 = arith.constant 0 : index
      %c0_19 = arith.constant 0 : index
      %24 = vector.load %arg7[%c0_18, %c0_19] : memref<512x128xf32, #tpu.memory_space<vmem>>, vector<512x128xf32>
      tpu.vector_store %arg7[%c0_18, %c0_19], %23 {strides = array<i32>} : memref<512x128xf32, #tpu.memory_space<vmem>>, vector<512x128xf32>,
    } else {
    }
    return
  }
  func.func @transform_0(%arg0: i32, %arg1: i32, %arg2: i32) -> (i32, i32) {
    %c0_i32 = arith.constant 0 : i32
    return %arg0, %arg2 : i32, i32
  }
  func.func @transform_1(%arg0: i32, %arg1: i32, %arg2: i32) -> (i32, i32) {
    %c0_i32 = arith.constant 0 : i32
    return %arg2, %arg1 : i32, i32
  }
  func.func @transform_2(%arg0: i32, %arg1: i32, %arg2: i32) -> (i32, i32) {
    %c0_i32 = arith.constant 0 : i32
    %c0_i32_0 = arith.constant 0 : i32
    return %c0_i32, %arg1 : i32, i32
  }
  func.func @transform_3(%arg0: i32, %arg1: i32, %arg2: i32) -> (i32, i32) {
    %c0_i32 = arith.constant 0 : i32
    %c0_i32_0 = arith.constant 0 : i32
    return %c0_i32, %arg1 : i32, i32
  }
  func.func @transform_4(%arg0: i32, %arg1: i32, %arg2: i32) -> (i32, i32) {
    %c0_i32 = arith.constant 0 : i32
    return %arg0, %arg1 : i32, i32
  }
}

module attributes {stable_mosaic.version = 11 : i64} {
  func.func @_conv_mm_kernel(%arg0: i32, %arg1: i32, %arg2: i32, %arg3: memref<128x512xf32, #tpu.memory_space<vmem>>, %arg4: memref<512x128xf32, #tpu.memory_space<vmem>>, %arg5: memref<1x128xf32, #tpu.memory_space<vmem>>, %arg6: memref<1x128xf32, #tpu.memory_space<vmem>>, %arg7: memref<128x128xf32, #tpu.memory_space<vmem>>, %arg8: memref<128x128xf32, #tpu.memory_space<vmem>>) attributes {dimension_semantics = [#tpu.dimension_semantics<parallel>, #tpu.dimension_semantics<parallel>, #tpu.dimension_semantics<arbitrary>], iteration_bounds = array<i64: 1, 1, 2>, scalar_prefetch = 0 : i64, scratch_operands = 1 : i64, tpu.core_type = #tpu.core_type<tc>, window_params = [{transform_indices = @transform_0, window_bounds = array<i64: 128, 512>}, {transform_indices = @transform_1, window_bounds = array<i64: 512, 128>}, {transform_indices = @transform_2, window_bounds = array<i64: 1, 128>}, {transform_indices = @transform_3, window_bounds = array<i64: 1, 128>}, {transform_indices = @transform_4, window_bounds = array<i64: 128, 128>}]} {
    %c0_i32 = arith.constant 0 : i32
    %0 = arith.cmpi eq, %arg2, %c0_i32 : i32
    %1 = arith.extui %0 : i1 to i32
    %c0_i32_0 = arith.constant 0 : i32
    %2 = arith.cmpi ne, %1, %c0_i32_0 : i32
    scf.if %2 {
      %cst_9 = arith.constant 0.000000e+00 : f32
      %12 = vector.broadcast %cst_9 : f32 to vector<128x128xf32>
      %c0_10 = arith.constant 0 : index
      %c0_11 = arith.constant 0 : index
      %13 = vector.load %arg8[%c0_10, %c0_11] : memref<128x128xf32, #tpu.memory_space<vmem>>, vector<128x128xf32>
      tpu.vector_store %arg8[%c0_10, %c0_11], %12 {strides = array<i32>} : memref<128x128xf32, #tpu.memory_space<vmem>>, vector<128x128xf32>,
    } else {
    }
    %c0 = arith.constant 0 : index
    %c0_1 = arith.constant 0 : index
    %3 = vector.load %arg8[%c0, %c0_1] : memref<128x128xf32, #tpu.memory_space<vmem>>, vector<128x128xf32>
    %c0_2 = arith.constant 0 : index
    %c0_3 = arith.constant 0 : index
    %4 = vector.load %arg3[%c0_2, %c0_3] : memref<128x512xf32, #tpu.memory_space<vmem>>, vector<128x512xf32>
    %c0_4 = arith.constant 0 : index
    %c0_5 = arith.constant 0 : index
    %5 = vector.load %arg4[%c0_4, %c0_5] : memref<512x128xf32, #tpu.memory_space<vmem>>, vector<512x128xf32>
    %cst = arith.constant dense<0.000000e+00> : vector<128x128xf32>
    %6 = tpu.matmul %4, %5, %cst {dimension_numbers = #tpu.dot_dimension_numbers<[1], [0], [0], [1], [0, 0, 1, 1], [], []>} : vector<128x512xf32>, vector<512x128xf32>, vector<128x128xf32> -> vector<128x128xf32>
    %7 = arith.addf %3, %6 : vector<128x128xf32>
    %c0_6 = arith.constant 0 : index
    %c0_7 = arith.constant 0 : index
    %8 = vector.load %arg8[%c0_6, %c0_7] : memref<128x128xf32, #tpu.memory_space<vmem>>, vector<128x128xf32>
    tpu.vector_store %arg8[%c0_6, %c0_7], %7 {strides = array<i32>} : memref<128x128xf32, #tpu.memory_space<vmem>>, vector<128x128xf32>,
    %c1_i32 = arith.constant 1 : i32
    %9 = arith.cmpi eq, %arg2, %c1_i32 : i32
    %10 = arith.extui %9 : i1 to i32
    %c0_i32_8 = arith.constant 0 : i32
    %11 = arith.cmpi ne, %10, %c0_i32_8 : i32
    scf.if %11 {
      %c0_9 = arith.constant 0 : index
      %c0_10 = arith.constant 0 : index
      %12 = vector.load %arg8[%c0_9, %c0_10] : memref<128x128xf32, #tpu.memory_space<vmem>>, vector<128x128xf32>
      %c0_11 = arith.constant 0 : index
      %c0_12 = arith.constant 0 : index
      %13 = vector.load %arg5[%c0_11, %c0_12] : memref<1x128xf32, #tpu.memory_space<vmem>>, vector<1x128xf32>
      %14 = vector.broadcast %13 : vector<1x128xf32> to vector<128x128xf32>
      %15 = arith.mulf %12, %14 : vector<128x128xf32>
      %c0_13 = arith.constant 0 : index
      %c0_14 = arith.constant 0 : index
      %16 = vector.load %arg6[%c0_13, %c0_14] : memref<1x128xf32, #tpu.memory_space<vmem>>, vector<1x128xf32>
      %17 = vector.broadcast %16 : vector<1x128xf32> to vector<128x128xf32>
      %18 = arith.addf %15, %17 : vector<128x128xf32>
      %cst_15 = arith.constant 0.000000e+00 : f32
      %19 = vector.broadcast %cst_15 : f32 to vector<128x128xf32>
      %20 = arith.cmpf oge, %18, %19 : vector<128x128xf32>
      %cst_16 = arith.constant 2.000000e-01 : f32
      %21 = vector.broadcast %cst_16 : f32 to vector<128x128xf32>
      %22 = arith.mulf %21, %18 : vector<128x128xf32>
      %23 = arith.select %20, %18, %22 : vector<128x128xi1>, vector<128x128xf32>
      %c0_17 = arith.constant 0 : index
      %c0_18 = arith.constant 0 : index
      %24 = vector.load %arg7[%c0_17, %c0_18] : memref<128x128xf32, #tpu.memory_space<vmem>>, vector<128x128xf32>
      tpu.vector_store %arg7[%c0_17, %c0_18], %23 {strides = array<i32>} : memref<128x128xf32, #tpu.memory_space<vmem>>, vector<128x128xf32>,
    } else {
    }
    return
  }
  func.func @transform_0(%arg0: i32, %arg1: i32, %arg2: i32) -> (i32, i32) {
    %c0_i32 = arith.constant 0 : i32
    return %arg0, %arg2 : i32, i32
  }
  func.func @transform_1(%arg0: i32, %arg1: i32, %arg2: i32) -> (i32, i32) {
    %c0_i32 = arith.constant 0 : i32
    return %arg2, %arg1 : i32, i32
  }
  func.func @transform_2(%arg0: i32, %arg1: i32, %arg2: i32) -> (i32, i32) {
    %c0_i32 = arith.constant 0 : i32
    %c0_i32_0 = arith.constant 0 : i32
    return %c0_i32, %arg1 : i32, i32
  }
  func.func @transform_3(%arg0: i32, %arg1: i32, %arg2: i32) -> (i32, i32) {
    %c0_i32 = arith.constant 0 : i32
    %c0_i32_0 = arith.constant 0 : i32
    return %c0_i32, %arg1 : i32, i32
  }
  func.func @transform_4(%arg0: i32, %arg1: i32, %arg2: i32) -> (i32, i32) {
    %c0_i32 = arith.constant 0 : i32
    return %arg0, %arg1 : i32, i32
  }
}

module attributes {stable_mosaic.version = 11 : i64} {
  func.func @_conv_mm_kernel(%arg0: i32, %arg1: i32, %arg2: i32, %arg3: memref<32x512xf32, #tpu.memory_space<vmem>>, %arg4: memref<512x256xf32, #tpu.memory_space<vmem>>, %arg5: memref<1x256xf32, #tpu.memory_space<vmem>>, %arg6: memref<1x256xf32, #tpu.memory_space<vmem>>, %arg7: memref<32x256xf32, #tpu.memory_space<vmem>>, %arg8: memref<32x256xf32, #tpu.memory_space<vmem>>) attributes {dimension_semantics = [#tpu.dimension_semantics<parallel>, #tpu.dimension_semantics<parallel>, #tpu.dimension_semantics<arbitrary>], iteration_bounds = array<i64: 1, 1, 4>, scalar_prefetch = 0 : i64, scratch_operands = 1 : i64, tpu.core_type = #tpu.core_type<tc>, window_params = [{transform_indices = @transform_0, window_bounds = array<i64: 32, 512>}, {transform_indices = @transform_1, window_bounds = array<i64: 512, 256>}, {transform_indices = @transform_2, window_bounds = array<i64: 1, 256>}, {transform_indices = @transform_3, window_bounds = array<i64: 1, 256>}, {transform_indices = @transform_4, window_bounds = array<i64: 32, 256>}]} {
    %c0_i32 = arith.constant 0 : i32
    %0 = arith.cmpi eq, %arg2, %c0_i32 : i32
    %1 = arith.extui %0 : i1 to i32
    %c0_i32_0 = arith.constant 0 : i32
    %2 = arith.cmpi ne, %1, %c0_i32_0 : i32
    scf.if %2 {
      %cst_9 = arith.constant 0.000000e+00 : f32
      %12 = vector.broadcast %cst_9 : f32 to vector<32x256xf32>
      %c0_10 = arith.constant 0 : index
      %c0_11 = arith.constant 0 : index
      %13 = vector.load %arg8[%c0_10, %c0_11] : memref<32x256xf32, #tpu.memory_space<vmem>>, vector<32x256xf32>
      tpu.vector_store %arg8[%c0_10, %c0_11], %12 {strides = array<i32>} : memref<32x256xf32, #tpu.memory_space<vmem>>, vector<32x256xf32>,
    } else {
    }
    %c0 = arith.constant 0 : index
    %c0_1 = arith.constant 0 : index
    %3 = vector.load %arg8[%c0, %c0_1] : memref<32x256xf32, #tpu.memory_space<vmem>>, vector<32x256xf32>
    %c0_2 = arith.constant 0 : index
    %c0_3 = arith.constant 0 : index
    %4 = vector.load %arg3[%c0_2, %c0_3] : memref<32x512xf32, #tpu.memory_space<vmem>>, vector<32x512xf32>
    %c0_4 = arith.constant 0 : index
    %c0_5 = arith.constant 0 : index
    %5 = vector.load %arg4[%c0_4, %c0_5] : memref<512x256xf32, #tpu.memory_space<vmem>>, vector<512x256xf32>
    %cst = arith.constant dense<0.000000e+00> : vector<32x256xf32>
    %6 = tpu.matmul %4, %5, %cst {dimension_numbers = #tpu.dot_dimension_numbers<[1], [0], [0], [1], [0, 0, 1, 1], [], []>} : vector<32x512xf32>, vector<512x256xf32>, vector<32x256xf32> -> vector<32x256xf32>
    %7 = arith.addf %3, %6 : vector<32x256xf32>
    %c0_6 = arith.constant 0 : index
    %c0_7 = arith.constant 0 : index
    %8 = vector.load %arg8[%c0_6, %c0_7] : memref<32x256xf32, #tpu.memory_space<vmem>>, vector<32x256xf32>
    tpu.vector_store %arg8[%c0_6, %c0_7], %7 {strides = array<i32>} : memref<32x256xf32, #tpu.memory_space<vmem>>, vector<32x256xf32>,
    %c3_i32 = arith.constant 3 : i32
    %9 = arith.cmpi eq, %arg2, %c3_i32 : i32
    %10 = arith.extui %9 : i1 to i32
    %c0_i32_8 = arith.constant 0 : i32
    %11 = arith.cmpi ne, %10, %c0_i32_8 : i32
    scf.if %11 {
      %c0_9 = arith.constant 0 : index
      %c0_10 = arith.constant 0 : index
      %12 = vector.load %arg8[%c0_9, %c0_10] : memref<32x256xf32, #tpu.memory_space<vmem>>, vector<32x256xf32>
      %c0_11 = arith.constant 0 : index
      %c0_12 = arith.constant 0 : index
      %13 = vector.load %arg5[%c0_11, %c0_12] : memref<1x256xf32, #tpu.memory_space<vmem>>, vector<1x256xf32>
      %14 = vector.broadcast %13 : vector<1x256xf32> to vector<32x256xf32>
      %15 = arith.mulf %12, %14 : vector<32x256xf32>
      %c0_13 = arith.constant 0 : index
      %c0_14 = arith.constant 0 : index
      %16 = vector.load %arg6[%c0_13, %c0_14] : memref<1x256xf32, #tpu.memory_space<vmem>>, vector<1x256xf32>
      %17 = vector.broadcast %16 : vector<1x256xf32> to vector<32x256xf32>
      %18 = arith.addf %15, %17 : vector<32x256xf32>
      %cst_15 = arith.constant 0.000000e+00 : f32
      %19 = vector.broadcast %cst_15 : f32 to vector<32x256xf32>
      %20 = arith.cmpf oge, %18, %19 : vector<32x256xf32>
      %cst_16 = arith.constant 2.000000e-01 : f32
      %21 = vector.broadcast %cst_16 : f32 to vector<32x256xf32>
      %22 = arith.mulf %21, %18 : vector<32x256xf32>
      %23 = arith.select %20, %18, %22 : vector<32x256xi1>, vector<32x256xf32>
      %c0_17 = arith.constant 0 : index
      %c0_18 = arith.constant 0 : index
      %24 = vector.load %arg7[%c0_17, %c0_18] : memref<32x256xf32, #tpu.memory_space<vmem>>, vector<32x256xf32>
      tpu.vector_store %arg7[%c0_17, %c0_18], %23 {strides = array<i32>} : memref<32x256xf32, #tpu.memory_space<vmem>>, vector<32x256xf32>,
    } else {
    }
    return
  }
  func.func @transform_0(%arg0: i32, %arg1: i32, %arg2: i32) -> (i32, i32) {
    %c0_i32 = arith.constant 0 : i32
    return %arg0, %arg2 : i32, i32
  }
  func.func @transform_1(%arg0: i32, %arg1: i32, %arg2: i32) -> (i32, i32) {
    %c0_i32 = arith.constant 0 : i32
    return %arg2, %arg1 : i32, i32
  }
  func.func @transform_2(%arg0: i32, %arg1: i32, %arg2: i32) -> (i32, i32) {
    %c0_i32 = arith.constant 0 : i32
    %c0_i32_0 = arith.constant 0 : i32
    return %c0_i32, %arg1 : i32, i32
  }
  func.func @transform_3(%arg0: i32, %arg1: i32, %arg2: i32) -> (i32, i32) {
    %c0_i32 = arith.constant 0 : i32
    %c0_i32_0 = arith.constant 0 : i32
    return %c0_i32, %arg1 : i32, i32
  }
  func.func @transform_4(%arg0: i32, %arg1: i32, %arg2: i32) -> (i32, i32) {
    %c0_i32 = arith.constant 0 : i32
    return %arg0, %arg1 : i32, i32
  }
}

module attributes {stable_mosaic.version = 11 : i64} {
  func.func @_conv_mm_kernel(%arg0: i32, %arg1: i32, %arg2: i32, %arg3: memref<24x512xf32, #tpu.memory_space<vmem>>, %arg4: memref<512x128xf32, #tpu.memory_space<vmem>>, %arg5: memref<1x128xf32, #tpu.memory_space<vmem>>, %arg6: memref<1x128xf32, #tpu.memory_space<vmem>>, %arg7: memref<24x128xf32, #tpu.memory_space<vmem>>, %arg8: memref<24x128xf32, #tpu.memory_space<vmem>>) attributes {dimension_semantics = [#tpu.dimension_semantics<parallel>, #tpu.dimension_semantics<parallel>, #tpu.dimension_semantics<arbitrary>], iteration_bounds = array<i64: 1, 1, 8>, scalar_prefetch = 0 : i64, scratch_operands = 1 : i64, tpu.core_type = #tpu.core_type<tc>, window_params = [{transform_indices = @transform_0, window_bounds = array<i64: 24, 512>}, {transform_indices = @transform_1, window_bounds = array<i64: 512, 128>}, {transform_indices = @transform_2, window_bounds = array<i64: 1, 128>}, {transform_indices = @transform_3, window_bounds = array<i64: 1, 128>}, {transform_indices = @transform_4, window_bounds = array<i64: 24, 128>}]} {
    %c0_i32 = arith.constant 0 : i32
    %0 = arith.cmpi eq, %arg2, %c0_i32 : i32
    %1 = arith.extui %0 : i1 to i32
    %c0_i32_0 = arith.constant 0 : i32
    %2 = arith.cmpi ne, %1, %c0_i32_0 : i32
    scf.if %2 {
      %cst_9 = arith.constant 0.000000e+00 : f32
      %12 = vector.broadcast %cst_9 : f32 to vector<24x128xf32>
      %c0_10 = arith.constant 0 : index
      %c0_11 = arith.constant 0 : index
      %13 = vector.load %arg8[%c0_10, %c0_11] : memref<24x128xf32, #tpu.memory_space<vmem>>, vector<24x128xf32>
      tpu.vector_store %arg8[%c0_10, %c0_11], %12 {strides = array<i32>} : memref<24x128xf32, #tpu.memory_space<vmem>>, vector<24x128xf32>,
    } else {
    }
    %c0 = arith.constant 0 : index
    %c0_1 = arith.constant 0 : index
    %3 = vector.load %arg8[%c0, %c0_1] : memref<24x128xf32, #tpu.memory_space<vmem>>, vector<24x128xf32>
    %c0_2 = arith.constant 0 : index
    %c0_3 = arith.constant 0 : index
    %4 = vector.load %arg3[%c0_2, %c0_3] : memref<24x512xf32, #tpu.memory_space<vmem>>, vector<24x512xf32>
    %c0_4 = arith.constant 0 : index
    %c0_5 = arith.constant 0 : index
    %5 = vector.load %arg4[%c0_4, %c0_5] : memref<512x128xf32, #tpu.memory_space<vmem>>, vector<512x128xf32>
    %cst = arith.constant dense<0.000000e+00> : vector<24x128xf32>
    %6 = tpu.matmul %4, %5, %cst {dimension_numbers = #tpu.dot_dimension_numbers<[1], [0], [0], [1], [0, 0, 1, 1], [], []>} : vector<24x512xf32>, vector<512x128xf32>, vector<24x128xf32> -> vector<24x128xf32>
    %7 = arith.addf %3, %6 : vector<24x128xf32>
    %c0_6 = arith.constant 0 : index
    %c0_7 = arith.constant 0 : index
    %8 = vector.load %arg8[%c0_6, %c0_7] : memref<24x128xf32, #tpu.memory_space<vmem>>, vector<24x128xf32>
    tpu.vector_store %arg8[%c0_6, %c0_7], %7 {strides = array<i32>} : memref<24x128xf32, #tpu.memory_space<vmem>>, vector<24x128xf32>,
    %c7_i32 = arith.constant 7 : i32
    %9 = arith.cmpi eq, %arg2, %c7_i32 : i32
    %10 = arith.extui %9 : i1 to i32
    %c0_i32_8 = arith.constant 0 : i32
    %11 = arith.cmpi ne, %10, %c0_i32_8 : i32
    scf.if %11 {
      %c0_9 = arith.constant 0 : index
      %c0_10 = arith.constant 0 : index
      %12 = vector.load %arg8[%c0_9, %c0_10] : memref<24x128xf32, #tpu.memory_space<vmem>>, vector<24x128xf32>
      %c0_11 = arith.constant 0 : index
      %c0_12 = arith.constant 0 : index
      %13 = vector.load %arg5[%c0_11, %c0_12] : memref<1x128xf32, #tpu.memory_space<vmem>>, vector<1x128xf32>
      %14 = vector.broadcast %13 : vector<1x128xf32> to vector<24x128xf32>
      %15 = arith.mulf %12, %14 : vector<24x128xf32>
      %c0_13 = arith.constant 0 : index
      %c0_14 = arith.constant 0 : index
      %16 = vector.load %arg6[%c0_13, %c0_14] : memref<1x128xf32, #tpu.memory_space<vmem>>, vector<1x128xf32>
      %17 = vector.broadcast %16 : vector<1x128xf32> to vector<24x128xf32>
      %18 = arith.addf %15, %17 : vector<24x128xf32>
      %c0_15 = arith.constant 0 : index
      %c0_16 = arith.constant 0 : index
      %19 = vector.load %arg7[%c0_15, %c0_16] : memref<24x128xf32, #tpu.memory_space<vmem>>, vector<24x128xf32>
      tpu.vector_store %arg7[%c0_15, %c0_16], %18 {strides = array<i32>} : memref<24x128xf32, #tpu.memory_space<vmem>>, vector<24x128xf32>,
    } else {
    }
    return
  }
  func.func @transform_0(%arg0: i32, %arg1: i32, %arg2: i32) -> (i32, i32) {
    %c0_i32 = arith.constant 0 : i32
    return %arg0, %arg2 : i32, i32
  }
  func.func @transform_1(%arg0: i32, %arg1: i32, %arg2: i32) -> (i32, i32) {
    %c0_i32 = arith.constant 0 : i32
    return %arg2, %arg1 : i32, i32
  }
  func.func @transform_2(%arg0: i32, %arg1: i32, %arg2: i32) -> (i32, i32) {
    %c0_i32 = arith.constant 0 : i32
    %c0_i32_0 = arith.constant 0 : i32
    return %c0_i32, %arg1 : i32, i32
  }
  func.func @transform_3(%arg0: i32, %arg1: i32, %arg2: i32) -> (i32, i32) {
    %c0_i32 = arith.constant 0 : i32
    %c0_i32_0 = arith.constant 0 : i32
    return %c0_i32, %arg1 : i32, i32
  }
  func.func @transform_4(%arg0: i32, %arg1: i32, %arg2: i32) -> (i32, i32) {
    %c0_i32 = arith.constant 0 : i32
    return %arg0, %arg1 : i32, i32
  }
}

</mosaic_0001>

<bundles_post_ra>
// kernel: discriminator_forward.4
= control target key start
LH: loop header
LB: loop body
LE: loop exit
PB: predicated region body
PF: predicated region fallthrough
CT: control target
= control target key end

     0   :  { %s1674_s1 = inlined_call_operand.vmem [shape: f32[128,128], index: 1, kind: input, shape index: {}]   ;;  %s1675_s0 = inlined_call_operand.vmem [shape: f32[512,128], index: 0, kind: input, shape index: {}]   ;;  %s1676_s2 = inlined_call_operand.vmem [shape: f32[1,128], index: 2, kind: input, shape index: {}]   ;;  %s1677_s3 = inlined_call_operand.vmem [shape: f32[1,128], index: 3, kind: input, shape index: {}]   ;;  %s1678_s4 = inlined_call_operand.vmem [shape: f32[512,128], index: 4, kind: output, shape index: {}]  }
   0x1   :  { %v228_v0 = vld [vmem:[%s1674_s1 + $0x78] sm:$0xff]  ;;  %v227_v1 = vld [vmem:[%s1674_s1 + $0x70] sm:$0xff]  ;;  %v226_v2 = vld [vmem:[%s1674_s1 + $0x68] sm:$0xff] }
   0x2   :  { %1030 = vmatpush.msra.mxu2 %v228_v0  ;;  %1031 = vmatpush.msra.mxu3 %v228_v0  ;;  %v225_v3 = vld [vmem:[%s1674_s1 + $0x60] sm:$0xff]  ;;  %v224_v4 = vld [vmem:[%s1674_s1 + $0x58] sm:$0xff]  ;;  %v223_v5 = vld [vmem:[%s1674_s1 + $0x50] sm:$0xff] }
   0x3   :  { %229 = vmatpush.msra.mxu0 %v228_v0  ;;  %1029 = vmatpush.msra.mxu1 %v228_v0  ;;  %v222_v6 = vld [vmem:[%s1674_s1 + $0x48] sm:$0xff]  ;;  %v221_v7 = vld [vmem:[%s1674_s1 + $0x40] sm:$0xff]  ;;  %v220_v8 = vld [vmem:[%s1674_s1 + $0x38] sm:$0xff] }
   0x4   :  { %1033 = vmatpush.msra.mxu2 %v227_v1  ;;  %1034 = vmatpush.msra.mxu3 %v227_v1  ;;  %v219_v9 = vld [vmem:[%s1674_s1 + $0x30] sm:$0xff]  ;;  %v218_v10 = vld [vmem:[%s1674_s1 + $0x28] sm:$0xff]  ;;  %v217_v11 = vld [vmem:[%s1674_s1 + $0x20] sm:$0xff] }
   0x5   :  { %230 = vmatpush.msra.mxu0 %v227_v1  ;;  %1032 = vmatpush.msra.mxu1 %v227_v1  ;;  %v216_v12 = vld [vmem:[%s1674_s1 + $0x18] sm:$0xff]  ;;  %v215_v13 = vld [vmem:[%s1674_s1 + $0x10] sm:$0xff]  ;;  %v214_v14 = vld [vmem:[%s1674_s1 + $0x8] sm:$0xff] }
   0x6   :  { %1036 = vmatpush.msra.mxu2 %v226_v2  ;;  %1037 = vmatpush.msra.mxu3 %v226_v2  ;;  %v213_v15 = vld [vmem:[%s1674_s1] sm:$0xff]  ;;  %v182_v20 = vld [vmem:[%s1675_s0 + $0x108] sm:$0xff]  ;;  %v183_v24 = vld [vmem:[%s1675_s0 + $0x110] sm:$0xff] }
   0x7   :  { %231 = vmatpush.msra.mxu0 %v226_v2  ;;  %1035 = vmatpush.msra.mxu1 %v226_v2  ;;  %v181_v16 = vld [vmem:[%s1675_s0 + $0x100] sm:$0xff]  ;;  %v198_v21 = vld [vmem:[%s1675_s0 + $0x188] sm:$0xff]  ;;  %v199_v25 = vld [vmem:[%s1675_s0 + $0x190] sm:$0xff] }
   0x8   :  { %1039 = vmatpush.msra.mxu2 %v225_v3  ;;  %1040 = vmatpush.msra.mxu3 %v225_v3  ;;  %v197_v17 = vld [vmem:[%s1675_s0 + $0x180] sm:$0xff]  ;;  %v150_v22 = vld [vmem:[%s1675_s0 + $0x8] sm:$0xff]  ;;  %v151_v26 = vld [vmem:[%s1675_s0 + $0x10] sm:$0xff] }
   0x9   :  { %232 = vmatpush.msra.mxu0 %v225_v3  ;;  %1038 = vmatpush.msra.mxu1 %v225_v3  ;;  %v149_v18 = vld [vmem:[%s1675_s0] sm:$0xff]  ;;  %v166_v23 = vld [vmem:[%s1675_s0 + $0x88] sm:$0xff]  ;;  %v167_v27 = vld [vmem:[%s1675_s0 + $0x90] sm:$0xff] }
   0xa   :  { %1042 = vmatpush.msra.mxu2 %v224_v4  ;;  %1043 = vmatpush.msra.mxu3 %v224_v4  ;;  %v165_v19 = vld [vmem:[%s1675_s0 + $0x80] sm:$0xff]  ;;  %v184_v28 = vld [vmem:[%s1675_s0 + $0x118] sm:$0xff]  ;;  %v186_v36 = vld [vmem:[%s1675_s0 + $0x128] sm:$0xff] }
   0xb   :  { %233 = vmatpush.msra.mxu0 %v224_v4  ;;  %1041 = vmatpush.msra.mxu1 %v224_v4  ;;  %v200_v29 = vld [vmem:[%s1675_s0 + $0x198] sm:$0xff]  ;;  %v185_v32 = vld [vmem:[%s1675_s0 + $0x120] sm:$0xff]  ;;  %v202_v37 = vld [vmem:[%s1675_s0 + $0x1a8] sm:$0xff] }
   0xc   :  { %1045 = vmatpush.msra.mxu2 %v223_v5  ;;  %1046 = vmatpush.msra.mxu3 %v223_v5  ;;  %v152_v30 = vld [vmem:[%s1675_s0 + $0x18] sm:$0xff]  ;;  %v201_v33 = vld [vmem:[%s1675_s0 + $0x1a0] sm:$0xff]  ;;  %v154_v38 = vld [vmem:[%s1675_s0 + $0x28] sm:$0xff] }
   0xd   :  { %234 = vmatpush.msra.mxu0 %v223_v5  ;;  %1044 = vmatpush.msra.mxu1 %v223_v5  ;;  %v168_v31 = vld [vmem:[%s1675_s0 + $0x98] sm:$0xff]  ;;  %v153_v34 = vld [vmem:[%s1675_s0 + $0x20] sm:$0xff]  ;;  %v170_v39 = vld [vmem:[%s1675_s0 + $0xa8] sm:$0xff] }
   0xe   :  { %1048 = vmatpush.msra.mxu2 %v222_v6  ;;  %1049 = vmatpush.msra.mxu3 %v222_v6  ;;  %v169_v35 = vld [vmem:[%s1675_s0 + $0xa0] sm:$0xff]  ;;  %v187_v40 = vld [vmem:[%s1675_s0 + $0x130] sm:$0xff]  ;;  %v188_v44 = vld [vmem:[%s1675_s0 + $0x138] sm:$0xff] }
   0xf   :  { %235 = vmatpush.msra.mxu0 %v222_v6  ;;  %1047 = vmatpush.msra.mxu1 %v222_v6  ;;  %v203_v41 = vld [vmem:[%s1675_s0 + $0x1b0] sm:$0xff]  ;;  %v204_v45 = vld [vmem:[%s1675_s0 + $0x1b8] sm:$0xff]  ;;  %v189_v48 = vld [vmem:[%s1675_s0 + $0x140] sm:$0xff] }
  0x10   :  { %1051 = vmatpush.msra.mxu2 %v221_v7  ;;  %1052 = vmatpush.msra.mxu3 %v221_v7  ;;  %v155_v42 = vld [vmem:[%s1675_s0 + $0x30] sm:$0xff]  ;;  %v156_v46 = vld [vmem:[%s1675_s0 + $0x38] sm:$0xff]  ;;  %v205_v49 = vld [vmem:[%s1675_s0 + $0x1c0] sm:$0xff] }
  0x11   :  { %236 = vmatpush.msra.mxu0 %v221_v7  ;;  %1050 = vmatpush.msra.mxu1 %v221_v7  ;;  %v171_v43 = vld [vmem:[%s1675_s0 + $0xb0] sm:$0xff]  ;;  %v172_v47 = vld [vmem:[%s1675_s0 + $0xb8] sm:$0xff]  ;;  %v157_v50 = vld [vmem:[%s1675_s0 + $0x40] sm:$0xff] }
  0x12   :  { %1054 = vmatpush.msra.mxu2 %v220_v8  ;;  %1055 = vmatpush.msra.mxu3 %v220_v8  ;;  %v173_v51 = vld [vmem:[%s1675_s0 + $0xc0] sm:$0xff]  ;;  %v190_v52 = vld [vmem:[%s1675_s0 + $0x148] sm:$0xff]  ;;  %v191_v56 = vld [vmem:[%s1675_s0 + $0x150] sm:$0xff] }
  0x13   :  { %237 = vmatpush.msra.mxu0 %v220_v8  ;;  %1053 = vmatpush.msra.mxu1 %v220_v8  ;;  %v206_v53 = vld [vmem:[%s1675_s0 + $0x1c8] sm:$0xff]  ;;  %v207_v57 = vld [vmem:[%s1675_s0 + $0x1d0] sm:$0xff]  ;;  %v192_v60 = vld [vmem:[%s1675_s0 + $0x158] sm:$0xff] }
  0x14   :  { %1057 = vmatpush.msra.mxu2 %v219_v9  ;;  %1058 = vmatpush.msra.mxu3 %v219_v9  ;;  %v158_v54 = vld [vmem:[%s1675_s0 + $0x48] sm:$0xff]  ;;  %v159_v58 = vld [vmem:[%s1675_s0 + $0x50] sm:$0xff]  ;;  %v208_v61 = vld [vmem:[%s1675_s0 + $0x1d8] sm:$0xff] }
  0x15   :  { %238 = vmatpush.msra.mxu0 %v219_v9  ;;  %1056 = vmatpush.msra.mxu1 %v219_v9  ;;  %v174_v55 = vld [vmem:[%s1675_s0 + $0xc8] sm:$0xff]  ;;  %v175_v59 = vld [vmem:[%s1675_s0 + $0xd0] sm:$0xff]  ;;  %v160_v62 = vld [vmem:[%s1675_s0 + $0x58] sm:$0xff] }
  0x16   :  { %1060 = vmatpush.msra.mxu2 %v218_v10  ;;  %1061 = vmatpush.msra.mxu3 %v218_v10  ;;  %v176_v63 = vld [vmem:[%s1675_s0 + $0xd8] sm:$0xff]  ;;  %v193_v0 = vld [vmem:[%s1675_s0 + $0x160] sm:$0xff]  ;;  %v194_v4 = vld [vmem:[%s1675_s0 + $0x168] sm:$0xff] }
  0x17   :  { %239 = vmatpush.msra.mxu0 %v218_v10  ;;  %1059 = vmatpush.msra.mxu1 %v218_v10  ;;  %v209_v1 = vld [vmem:[%s1675_s0 + $0x1e0] sm:$0xff]  ;;  %v210_v5 = vld [vmem:[%s1675_s0 + $0x1e8] sm:$0xff]  ;;  %v195_v8 = vld [vmem:[%s1675_s0 + $0x170] sm:$0xff] }
  0x18   :  { %1063 = vmatpush.msra.mxu2 %v217_v11  ;;  %1064 = vmatpush.msra.mxu3 %v217_v11  ;;  %v161_v2 = vld [vmem:[%s1675_s0 + $0x60] sm:$0xff]  ;;  %v162_v6 = vld [vmem:[%s1675_s0 + $0x68] sm:$0xff]  ;;  %v211_v9 = vld [vmem:[%s1675_s0 + $0x1f0] sm:$0xff] }
  0x19   :  { %240 = vmatpush.msra.mxu0 %v217_v11  ;;  %1062 = vmatpush.msra.mxu1 %v217_v11  ;;  %v177_v3 = vld [vmem:[%s1675_s0 + $0xe0] sm:$0xff]  ;;  %v178_v7 = vld [vmem:[%s1675_s0 + $0xe8] sm:$0xff]  ;;  %v163_v10 = vld [vmem:[%s1675_s0 + $0x70] sm:$0xff] }
  0x1a   :  { %1066 = vmatpush.msra.mxu2 %v216_v12  ;;  %1067 = vmatpush.msra.mxu3 %v216_v12  ;;  %v179_v11 = vld [vmem:[%s1675_s0 + $0xf0] sm:$0xff] }
  0x1b   :  { %241 = vmatpush.msra.mxu0 %v216_v12  ;;  %1065 = vmatpush.msra.mxu1 %v216_v12  ;;  %v196_v12 = vld [vmem:[%s1675_s0 + $0x178] sm:$0xff] }
  0x1c   :  { %1069 = vmatpush.msra.mxu2 %v215_v13  ;;  %1070 = vmatpush.msra.mxu3 %v215_v13 }
  0x1d   :  { %242 = vmatpush.msra.mxu0 %v215_v13  ;;  %1068 = vmatpush.msra.mxu1 %v215_v13  ;;  %v212_v13 = vld [vmem:[%s1675_s0 + $0x1f8] sm:$0xff] }
  0x1e   :  { %1072 = vmatpush.msra.mxu2 %v214_v14  ;;  %1073 = vmatpush.msra.mxu3 %v214_v14 }
  0x1f   :  { %243 = vmatpush.msra.mxu0 %v214_v14  ;;  %1071 = vmatpush.msra.mxu1 %v214_v14  ;;  %v164_v14 = vld [vmem:[%s1675_s0 + $0x78] sm:$0xff] }
  0x20   :  { %1075 = vmatpush.msra.mxu2 %v213_v15  ;;  %1076 = vmatpush.msra.mxu3 %v213_v15 }
  0x21   :  { %341 = vmatmul.f32.vlgmr.msra.gmra.mxu2 %v181_v16  ;;  %389 = vmatmul.f32.vlgmr.msra.gmra.mxu3 %v197_v17  ;;  %v1347_v16 = vld [vmem:[%s1676_s2] ss:$0 sm:$0xff] }
  0x22   :  { %244 = vmatpush.msra.mxu0 %v213_v15  ;;  %1074 = vmatpush.msra.mxu1 %v213_v15  ;;  %v180_v15 = vld [vmem:[%s1675_s0 + $0xf8] sm:$0xff]  ;;  %v1352_v17 = vld [vmem:[%s1677_s3] ss:$0 sm:$0xff] }
  0x23   :  { %245 = vmatmul.f32.vlgmr.msra.gmra.mxu0 %v149_v18  ;;  %293 = vmatmul.f32.vlgmr.msra.gmra.mxu1 %v165_v19 }
  0x29   :  { %344 = vmatmul.f32.gmra.mxu2 %v182_v20  ;;  %392 = vmatmul.f32.gmra.mxu3 %v198_v21 }
  0x2b   :  { %248 = vmatmul.f32.gmra.mxu0 %v150_v22  ;;  %296 = vmatmul.f32.gmra.mxu1 %v166_v23 }
  0x31   :  { %347 = vmatmul.f32.gmra.mxu2 %v183_v24  ;;  %395 = vmatmul.f32.gmra.mxu3 %v199_v25 }
  0x33   :  { %251 = vmatmul.f32.gmra.mxu0 %v151_v26  ;;  %299 = vmatmul.f32.gmra.mxu1 %v167_v27 }
  0x39   :  { %350 = vmatmul.f32.gmra.mxu2 %v184_v28  ;;  %398 = vmatmul.f32.gmra.mxu3 %v200_v29 }
  0x3b   :  { %254 = vmatmul.f32.gmra.mxu0 %v152_v30  ;;  %302 = vmatmul.f32.gmra.mxu1 %v168_v31 }
  0x41   :  { %353 = vmatmul.f32.gmra.mxu2 %v185_v32  ;;  %401 = vmatmul.f32.gmra.mxu3 %v201_v33 }
  0x43   :  { %257 = vmatmul.f32.gmra.mxu0 %v153_v34  ;;  %305 = vmatmul.f32.gmra.mxu1 %v169_v35 }
  0x49   :  { %356 = vmatmul.f32.gmra.mxu2 %v186_v36  ;;  %404 = vmatmul.f32.gmra.mxu3 %v202_v37 }
  0x4b   :  { %260 = vmatmul.f32.gmra.mxu0 %v154_v38  ;;  %308 = vmatmul.f32.gmra.mxu1 %v170_v39 }
  0x51   :  { %359 = vmatmul.f32.gmra.mxu2 %v187_v40  ;;  %407 = vmatmul.f32.gmra.mxu3 %v203_v41 }
  0x53   :  { %263 = vmatmul.f32.gmra.mxu0 %v155_v42  ;;  %311 = vmatmul.f32.gmra.mxu1 %v171_v43 }
  0x59   :  { %362 = vmatmul.f32.gmra.mxu2 %v188_v44  ;;  %410 = vmatmul.f32.gmra.mxu3 %v204_v45 }
  0x5b   :  { %266 = vmatmul.f32.gmra.mxu0 %v156_v46  ;;  %314 = vmatmul.f32.gmra.mxu1 %v172_v47 }
  0x61   :  { %365 = vmatmul.f32.gmra.mxu2 %v189_v48  ;;  %413 = vmatmul.f32.gmra.mxu3 %v205_v49 }
  0x63   :  { %269 = vmatmul.f32.gmra.mxu0 %v157_v50  ;;  %317 = vmatmul.f32.gmra.mxu1 %v173_v51 }
  0x69   :  { %368 = vmatmul.f32.gmra.mxu2 %v190_v52  ;;  %416 = vmatmul.f32.gmra.mxu3 %v206_v53 }
  0x6b   :  { %272 = vmatmul.f32.gmra.mxu0 %v158_v54  ;;  %320 = vmatmul.f32.gmra.mxu1 %v174_v55 }
  0x71   :  { %371 = vmatmul.f32.gmra.mxu2 %v191_v56  ;;  %419 = vmatmul.f32.gmra.mxu3 %v207_v57 }
  0x73   :  { %275 = vmatmul.f32.gmra.mxu0 %v159_v58  ;;  %323 = vmatmul.f32.gmra.mxu1 %v175_v59 }
  0x79   :  { %374 = vmatmul.f32.gmra.mxu2 %v192_v60  ;;  %422 = vmatmul.f32.gmra.mxu3 %v208_v61 }
  0x7b   :  { %278 = vmatmul.f32.gmra.mxu0 %v160_v62  ;;  %326 = vmatmul.f32.gmra.mxu1 %v176_v63 }
  0x81   :  { %377 = vmatmul.f32.gmra.mxu2 %v193_v0  ;;  %425 = vmatmul.f32.gmra.mxu3 %v209_v1 }
  0x83   :  { %281 = vmatmul.f32.gmra.mxu0 %v161_v2  ;;  %329 = vmatmul.f32.gmra.mxu1 %v177_v3 }
  0x89   :  { %380 = vmatmul.f32.gmra.mxu2 %v194_v4  ;;  %428 = vmatmul.f32.gmra.mxu3 %v210_v5 }
  0x8b   :  { %284 = vmatmul.f32.gmra.mxu0 %v162_v6  ;;  %332 = vmatmul.f32.gmra.mxu1 %v178_v7 }
  0x91   :  { %383 = vmatmul.f32.gmra.mxu2 %v195_v8  ;;  %431 = vmatmul.f32.gmra.mxu3 %v211_v9 }
  0x93   :  { %287 = vmatmul.f32.gmra.mxu0 %v163_v10  ;;  %335 = vmatmul.f32.gmra.mxu1 %v179_v11 }
  0x99   :  { %386 = vmatmul.f32.gmra.mxu2 %v196_v12  ;;  %434 = vmatmul.f32.gmra.mxu3 %v212_v13 }
  0x9b   :  { %290 = vmatmul.f32.gmra.mxu0 %v164_v14  ;;  %338 = vmatmul.f32.gmra.mxu1 %v180_v15 }
  0xa0   :  { %v246_v18 = vpop.f32.mrf.mxu0  ;;  %v294_v19 = vpop.f32.mrf.mxu1 }
  0xa1   :  { %v637_v20 = vmul.f32 %v1347_v16, %v246_v18  ;;  %v653_v21 = vmul.f32 %v1347_v16, %v294_v19 }
  0xa3   :  { %v705_v22 = vadd.f32 %v1352_v17, %v637_v20  ;;  %v721_v23 = vadd.f32 %v1352_v17, %v653_v21 }
  0xa4   :  { %v342_v24 = vpop.f32.mrf.mxu2  ;;  %v390_v25 = vpop.f32.mrf.mxu3 }
  0xa5   :  { %vm769_vm0 = vcmp.ge.f32.partialorder %v705_v22, 0.0  ;;  %v833_v26 = vmul.f32 0.2, %v705_v22  ;;  %vm785_vm1 = vcmp.ge.f32.partialorder %v721_v23, 0.0  ;;  %v849_v27 = vmul.f32 0.2, %v721_v23 }
  0xa6   :  { %v669_v28 = vmul.f32 %v1347_v16, %v342_v24  ;;  %v685_v29 = vmul.f32 %v1347_v16, %v390_v25 }
  0xa7   :  { %v897_v30 = vsel %vm769_vm0, %v705_v22, %v833_v26  ;;  %v913_v31 = vsel %vm785_vm1, %v721_v23, %v849_v27 }
  0xa8   :  { %961 = vst [vmem:[%s1678_s4] sm:$0xff] %v897_v30  ;;  %v737_v32 = vadd.f32 %v1352_v17, %v669_v28  ;;  %v753_v33 = vadd.f32 %v1352_v17, %v685_v29  ;;  %v249_v34 = vpop.f32.mrf.mxu0  ;;  %v297_v35 = vpop.f32.mrf.mxu1 }
  0xa9   :  { %977 = vst [vmem:[%s1678_s4 + $0x80] sm:$0xff] %v913_v31  ;;  %v638_v36 = vmul.f32 %v1347_v16, %v249_v34  ;;  %v654_v37 = vmul.f32 %v1347_v16, %v297_v35 }
  0xaa   :  { %vm801_vm2 = vcmp.ge.f32.partialorder %v737_v32, 0.0  ;;  %v865_v38 = vmul.f32 0.2, %v737_v32  ;;  %vm817_vm3 = vcmp.ge.f32.partialorder %v753_v33, 0.0  ;;  %v881_v39 = vmul.f32 0.2, %v753_v33 }
  0xab   :  { %v706_v40 = vadd.f32 %v1352_v17, %v638_v36  ;;  %v722_v41 = vadd.f32 %v1352_v17, %v654_v37 }
  0xac   :  { %v929_v42 = vsel %vm801_vm2, %v737_v32, %v865_v38  ;;  %v945_v43 = vsel %vm817_vm3, %v753_v33, %v881_v39  ;;  %v345_v44 = vpop.f32.mrf.mxu2  ;;  %v393_v45 = vpop.f32.mrf.mxu3 }
  0xad   :  { %993 = vst [vmem:[%s1678_s4 + $0x100] sm:$0xff] %v929_v42  ;;  %vm770_vm4 = vcmp.ge.f32.partialorder %v706_v40, 0.0  ;;  %v834_v46 = vmul.f32 0.2, %v706_v40  ;;  %vm786_vm5 = vcmp.ge.f32.partialorder %v722_v41, 0.0  ;;  %v670_v47 = vmul.f32 %v1347_v16, %v345_v44 }
  0xae   :  { %1009 = vst [vmem:[%s1678_s4 + $0x180] sm:$0xff] %v945_v43  ;;  %v850_v48 = vmul.f32 0.2, %v722_v41  ;;  %v686_v49 = vmul.f32 %v1347_v16, %v393_v45 }
  0xaf   :  { %v898_v50 = vsel %vm770_vm4, %v706_v40, %v834_v46  ;;  %v738_v51 = vadd.f32 %v1352_v17, %v670_v47 }
  0xb0   :  { %962 = vst [vmem:[%s1678_s4 + $0x8] sm:$0xff] %v898_v50  ;;  %v914_v52 = vsel %vm786_vm5, %v722_v41, %v850_v48  ;;  %v754_v53 = vadd.f32 %v1352_v17, %v686_v49  ;;  %v252_v54 = vpop.f32.mrf.mxu0  ;;  %v300_v55 = vpop.f32.mrf.mxu1 }
  0xb1   :  { %978 = vst [vmem:[%s1678_s4 + $0x88] sm:$0xff] %v914_v52  ;;  %vm802_vm6 = vcmp.ge.f32.partialorder %v738_v51, 0.0  ;;  %v866_v56 = vmul.f32 0.2, %v738_v51  ;;  %v639_v57 = vmul.f32 %v1347_v16, %v252_v54  ;;  %v655_v58 = vmul.f32 %v1347_v16, %v300_v55 }
  0xb2   :  { %vm818_vm7 = vcmp.ge.f32.partialorder %v754_v53, 0.0  ;;  %v882_v59 = vmul.f32 0.2, %v754_v53 }
  0xb3   :  { %v930_v60 = vsel %vm802_vm6, %v738_v51, %v866_v56  ;;  %v707_v61 = vadd.f32 %v1352_v17, %v639_v57  ;;  %v723_v62 = vadd.f32 %v1352_v17, %v655_v58 }
  0xb4   :  { %994 = vst [vmem:[%s1678_s4 + $0x108] sm:$0xff] %v930_v60  ;;  %v946_v63 = vsel %vm818_vm7, %v754_v53, %v882_v59  ;;  %v348_v0 = vpop.f32.mrf.mxu2  ;;  %v396_v1 = vpop.f32.mrf.mxu3 }
  0xb5   :  { %1010 = vst [vmem:[%s1678_s4 + $0x188] sm:$0xff] %v946_v63  ;;  %vm771_vm8 = vcmp.ge.f32.partialorder %v707_v61, 0.0  ;;  %v835_v2 = vmul.f32 0.2, %v707_v61  ;;  %vm787_vm9 = vcmp.ge.f32.partialorder %v723_v62, 0.0  ;;  %v671_v3 = vmul.f32 %v1347_v16, %v348_v0 }
  0xb6   :  { %v851_v4 = vmul.f32 0.2, %v723_v62  ;;  %v687_v5 = vmul.f32 %v1347_v16, %v396_v1 }
  0xb7   :  { %v899_v6 = vsel %vm771_vm8, %v707_v61, %v835_v2  ;;  %v739_v7 = vadd.f32 %v1352_v17, %v671_v3 }
  0xb8   :  { %963 = vst [vmem:[%s1678_s4 + $0x10] sm:$0xff] %v899_v6  ;;  %v915_v8 = vsel %vm787_vm9, %v723_v62, %v851_v4  ;;  %v755_v9 = vadd.f32 %v1352_v17, %v687_v5  ;;  %v255_v10 = vpop.f32.mrf.mxu0  ;;  %v303_v11 = vpop.f32.mrf.mxu1 }
  0xb9   :  { %979 = vst [vmem:[%s1678_s4 + $0x90] sm:$0xff] %v915_v8  ;;  %vm803_vm10 = vcmp.ge.f32.partialorder %v739_v7, 0.0  ;;  %v867_v12 = vmul.f32 0.2, %v739_v7  ;;  %v640_v13 = vmul.f32 %v1347_v16, %v255_v10  ;;  %v656_v14 = vmul.f32 %v1347_v16, %v303_v11 }
  0xba   :  { %vm819_vm11 = vcmp.ge.f32.partialorder %v755_v9, 0.0  ;;  %v883_v15 = vmul.f32 0.2, %v755_v9 }
  0xbb   :  { %v931_v18 = vsel %vm803_vm10, %v739_v7, %v867_v12  ;;  %v708_v19 = vadd.f32 %v1352_v17, %v640_v13  ;;  %v724_v20 = vadd.f32 %v1352_v17, %v656_v14 }
  0xbc   :  { %995 = vst [vmem:[%s1678_s4 + $0x110] sm:$0xff] %v931_v18  ;;  %v947_v21 = vsel %vm819_vm11, %v755_v9, %v883_v15  ;;  %v351_v22 = vpop.f32.mrf.mxu2  ;;  %v399_v23 = vpop.f32.mrf.mxu3 }
  0xbd   :  { %1011 = vst [vmem:[%s1678_s4 + $0x190] sm:$0xff] %v947_v21  ;;  %vm772_vm12 = vcmp.ge.f32.partialorder %v708_v19, 0.0  ;;  %v836_v24 = vmul.f32 0.2, %v708_v19  ;;  %vm788_vm13 = vcmp.ge.f32.partialorder %v724_v20, 0.0  ;;  %v672_v25 = vmul.f32 %v1347_v16, %v351_v22 }
  0xbe   :  { %v852_v26 = vmul.f32 0.2, %v724_v20  ;;  %v688_v27 = vmul.f32 %v1347_v16, %v399_v23 }
  0xbf   :  { %v900_v28 = vsel %vm772_vm12, %v708_v19, %v836_v24  ;;  %v740_v29 = vadd.f32 %v1352_v17, %v672_v25 }
  0xc0   :  { %964 = vst [vmem:[%s1678_s4 + $0x18] sm:$0xff] %v900_v28  ;;  %v916_v30 = vsel %vm788_vm13, %v724_v20, %v852_v26  ;;  %v756_v31 = vadd.f32 %v1352_v17, %v688_v27  ;;  %v258_v32 = vpop.f32.mrf.mxu0  ;;  %v306_v33 = vpop.f32.mrf.mxu1 }
  0xc1   :  { %980 = vst [vmem:[%s1678_s4 + $0x98] sm:$0xff] %v916_v30  ;;  %vm804_vm14 = vcmp.ge.f32.partialorder %v740_v29, 0.0  ;;  %v868_v34 = vmul.f32 0.2, %v740_v29  ;;  %v641_v35 = vmul.f32 %v1347_v16, %v258_v32  ;;  %v657_v36 = vmul.f32 %v1347_v16, %v306_v33 }
  0xc2   :  { %vm820_vm15 = vcmp.ge.f32.partialorder %v756_v31, 0.0  ;;  %v884_v37 = vmul.f32 0.2, %v756_v31 }
  0xc3   :  { %v932_v38 = vsel %vm804_vm14, %v740_v29, %v868_v34  ;;  %v709_v39 = vadd.f32 %v1352_v17, %v641_v35  ;;  %v725_v40 = vadd.f32 %v1352_v17, %v657_v36 }
  0xc4   :  { %996 = vst [vmem:[%s1678_s4 + $0x118] sm:$0xff] %v932_v38  ;;  %v948_v41 = vsel %vm820_vm15, %v756_v31, %v884_v37  ;;  %v354_v42 = vpop.f32.mrf.mxu2  ;;  %v402_v43 = vpop.f32.mrf.mxu3 }
  0xc5   :  { %1012 = vst [vmem:[%s1678_s4 + $0x198] sm:$0xff] %v948_v41  ;;  %vm773_vm0 = vcmp.ge.f32.partialorder %v709_v39, 0.0  ;;  %v837_v44 = vmul.f32 0.2, %v709_v39  ;;  %vm789_vm1 = vcmp.ge.f32.partialorder %v725_v40, 0.0  ;;  %v673_v45 = vmul.f32 %v1347_v16, %v354_v42 }
  0xc6   :  { %v853_v46 = vmul.f32 0.2, %v725_v40  ;;  %v689_v47 = vmul.f32 %v1347_v16, %v402_v43 }
  0xc7   :  { %v901_v48 = vsel %vm773_vm0, %v709_v39, %v837_v44  ;;  %v741_v49 = vadd.f32 %v1352_v17, %v673_v45 }
  0xc8   :  { %965 = vst [vmem:[%s1678_s4 + $0x20] sm:$0xff] %v901_v48  ;;  %v917_v50 = vsel %vm789_vm1, %v725_v40, %v853_v46  ;;  %v757_v51 = vadd.f32 %v1352_v17, %v689_v47  ;;  %v261_v52 = vpop.f32.mrf.mxu0  ;;  %v309_v53 = vpop.f32.mrf.mxu1 }
  0xc9   :  { %981 = vst [vmem:[%s1678_s4 + $0xa0] sm:$0xff] %v917_v50  ;;  %vm805_vm2 = vcmp.ge.f32.partialorder %v741_v49, 0.0  ;;  %v869_v54 = vmul.f32 0.2, %v741_v49  ;;  %v642_v55 = vmul.f32 %v1347_v16, %v261_v52  ;;  %v658_v56 = vmul.f32 %v1347_v16, %v309_v53 }
  0xca   :  { %vm821_vm3 = vcmp.ge.f32.partialorder %v757_v51, 0.0  ;;  %v885_v57 = vmul.f32 0.2, %v757_v51 }
  0xcb   :  { %v933_v58 = vsel %vm805_vm2, %v741_v49, %v869_v54  ;;  %v710_v59 = vadd.f32 %v1352_v17, %v642_v55  ;;  %v726_v60 = vadd.f32 %v1352_v17, %v658_v56 }
  0xcc   :  { %997 = vst [vmem:[%s1678_s4 + $0x120] sm:$0xff] %v933_v58  ;;  %v949_v61 = vsel %vm821_vm3, %v757_v51, %v885_v57  ;;  %v357_v62 = vpop.f32.mrf.mxu2  ;;  %v405_v63 = vpop.f32.mrf.mxu3 }
  0xcd   :  { %1013 = vst [vmem:[%s1678_s4 + $0x1a0] sm:$0xff] %v949_v61  ;;  %vm774_vm4 = vcmp.ge.f32.partialorder %v710_v59, 0.0  ;;  %v838_v0 = vmul.f32 0.2, %v710_v59  ;;  %vm790_vm5 = vcmp.ge.f32.partialorder %v726_v60, 0.0  ;;  %v674_v1 = vmul.f32 %v1347_v16, %v357_v62 }
  0xce   :  { %v854_v2 = vmul.f32 0.2, %v726_v60  ;;  %v690_v3 = vmul.f32 %v1347_v16, %v405_v63 }
  0xcf   :  { %v902_v4 = vsel %vm774_vm4, %v710_v59, %v838_v0  ;;  %v742_v5 = vadd.f32 %v1352_v17, %v674_v1 }
  0xd0   :  { %966 = vst [vmem:[%s1678_s4 + $0x28] sm:$0xff] %v902_v4  ;;  %v918_v6 = vsel %vm790_vm5, %v726_v60, %v854_v2  ;;  %v758_v7 = vadd.f32 %v1352_v17, %v690_v3  ;;  %v264_v8 = vpop.f32.mrf.mxu0  ;;  %v312_v9 = vpop.f32.mrf.mxu1 }
  0xd1   :  { %982 = vst [vmem:[%s1678_s4 + $0xa8] sm:$0xff] %v918_v6  ;;  %vm806_vm6 = vcmp.ge.f32.partialorder %v742_v5, 0.0  ;;  %v870_v10 = vmul.f32 0.2, %v742_v5  ;;  %v643_v11 = vmul.f32 %v1347_v16, %v264_v8  ;;  %v659_v12 = vmul.f32 %v1347_v16, %v312_v9 }
  0xd2   :  { %vm822_vm7 = vcmp.ge.f32.partialorder %v758_v7, 0.0  ;;  %v886_v13 = vmul.f32 0.2, %v758_v7 }
  0xd3   :  { %v934_v14 = vsel %vm806_vm6, %v742_v5, %v870_v10  ;;  %v711_v15 = vadd.f32 %v1352_v17, %v643_v11  ;;  %v727_v18 = vadd.f32 %v1352_v17, %v659_v12 }
  0xd4   :  { %998 = vst [vmem:[%s1678_s4 + $0x128] sm:$0xff] %v934_v14  ;;  %v950_v19 = vsel %vm822_vm7, %v758_v7, %v886_v13  ;;  %v360_v20 = vpop.f32.mrf.mxu2  ;;  %v408_v21 = vpop.f32.mrf.mxu3 }
  0xd5   :  { %1014 = vst [vmem:[%s1678_s4 + $0x1a8] sm:$0xff] %v950_v19  ;;  %vm775_vm8 = vcmp.ge.f32.partialorder %v711_v15, 0.0  ;;  %v839_v22 = vmul.f32 0.2, %v711_v15  ;;  %vm791_vm9 = vcmp.ge.f32.partialorder %v727_v18, 0.0  ;;  %v675_v23 = vmul.f32 %v1347_v16, %v360_v20 }
  0xd6   :  { %v855_v24 = vmul.f32 0.2, %v727_v18  ;;  %v691_v25 = vmul.f32 %v1347_v16, %v408_v21 }
  0xd7   :  { %v903_v26 = vsel %vm775_vm8, %v711_v15, %v839_v22  ;;  %v743_v27 = vadd.f32 %v1352_v17, %v675_v23 }
  0xd8   :  { %967 = vst [vmem:[%s1678_s4 + $0x30] sm:$0xff] %v903_v26  ;;  %v919_v28 = vsel %vm791_vm9, %v727_v18, %v855_v24  ;;  %v759_v29 = vadd.f32 %v1352_v17, %v691_v25  ;;  %v267_v30 = vpop.f32.mrf.mxu0  ;;  %v315_v31 = vpop.f32.mrf.mxu1 }
  0xd9   :  { %983 = vst [vmem:[%s1678_s4 + $0xb0] sm:$0xff] %v919_v28  ;;  %vm807_vm10 = vcmp.ge.f32.partialorder %v743_v27, 0.0  ;;  %v871_v32 = vmul.f32 0.2, %v743_v27  ;;  %v644_v33 = vmul.f32 %v1347_v16, %v267_v30  ;;  %v660_v34 = vmul.f32 %v1347_v16, %v315_v31 }
  0xda   :  { %vm823_vm11 = vcmp.ge.f32.partialorder %v759_v29, 0.0  ;;  %v887_v35 = vmul.f32 0.2, %v759_v29 }
  0xdb   :  { %v935_v36 = vsel %vm807_vm10, %v743_v27, %v871_v32  ;;  %v712_v37 = vadd.f32 %v1352_v17, %v644_v33  ;;  %v728_v38 = vadd.f32 %v1352_v17, %v660_v34 }
  0xdc   :  { %999 = vst [vmem:[%s1678_s4 + $0x130] sm:$0xff] %v935_v36  ;;  %v951_v39 = vsel %vm823_vm11, %v759_v29, %v887_v35  ;;  %v363_v40 = vpop.f32.mrf.mxu2  ;;  %v411_v41 = vpop.f32.mrf.mxu3 }
  0xdd   :  { %1015 = vst [vmem:[%s1678_s4 + $0x1b0] sm:$0xff] %v951_v39  ;;  %vm776_vm12 = vcmp.ge.f32.partialorder %v712_v37, 0.0  ;;  %v840_v42 = vmul.f32 0.2, %v712_v37  ;;  %vm792_vm13 = vcmp.ge.f32.partialorder %v728_v38, 0.0  ;;  %v676_v43 = vmul.f32 %v1347_v16, %v363_v40 }
  0xde   :  { %v856_v44 = vmul.f32 0.2, %v728_v38  ;;  %v692_v45 = vmul.f32 %v1347_v16, %v411_v41 }
  0xdf   :  { %v904_v46 = vsel %vm776_vm12, %v712_v37, %v840_v42  ;;  %v744_v47 = vadd.f32 %v1352_v17, %v676_v43 }
  0xe0   :  { %968 = vst [vmem:[%s1678_s4 + $0x38] sm:$0xff] %v904_v46  ;;  %v920_v48 = vsel %vm792_vm13, %v728_v38, %v856_v44  ;;  %v760_v49 = vadd.f32 %v1352_v17, %v692_v45  ;;  %v270_v50 = vpop.f32.mrf.mxu0  ;;  %v318_v51 = vpop.f32.mrf.mxu1 }
  0xe1   :  { %984 = vst [vmem:[%s1678_s4 + $0xb8] sm:$0xff] %v920_v48  ;;  %vm808_vm14 = vcmp.ge.f32.partialorder %v744_v47, 0.0  ;;  %v872_v52 = vmul.f32 0.2, %v744_v47  ;;  %v645_v53 = vmul.f32 %v1347_v16, %v270_v50  ;;  %v661_v54 = vmul.f32 %v1347_v16, %v318_v51 }
  0xe2   :  { %vm824_vm15 = vcmp.ge.f32.partialorder %v760_v49, 0.0  ;;  %v888_v55 = vmul.f32 0.2, %v760_v49 }
  0xe3   :  { %v936_v56 = vsel %vm808_vm14, %v744_v47, %v872_v52  ;;  %v713_v57 = vadd.f32 %v1352_v17, %v645_v53  ;;  %v729_v58 = vadd.f32 %v1352_v17, %v661_v54 }
  0xe4   :  { %1000 = vst [vmem:[%s1678_s4 + $0x138] sm:$0xff] %v936_v56  ;;  %v952_v59 = vsel %vm824_vm15, %v760_v49, %v888_v55  ;;  %v366_v60 = vpop.f32.mrf.mxu2  ;;  %v414_v61 = vpop.f32.mrf.mxu3 }
  0xe5   :  { %1016 = vst [vmem:[%s1678_s4 + $0x1b8] sm:$0xff] %v952_v59  ;;  %vm777_vm0 = vcmp.ge.f32.partialorder %v713_v57, 0.0  ;;  %v841_v62 = vmul.f32 0.2, %v713_v57  ;;  %vm793_vm1 = vcmp.ge.f32.partialorder %v729_v58, 0.0  ;;  %v677_v63 = vmul.f32 %v1347_v16, %v366_v60 }
  0xe6   :  { %v857_v0 = vmul.f32 0.2, %v729_v58  ;;  %v693_v1 = vmul.f32 %v1347_v16, %v414_v61 }
  0xe7   :  { %v905_v2 = vsel %vm777_vm0, %v713_v57, %v841_v62  ;;  %v745_v3 = vadd.f32 %v1352_v17, %v677_v63 }
  0xe8   :  { %969 = vst [vmem:[%s1678_s4 + $0x40] sm:$0xff] %v905_v2  ;;  %v921_v4 = vsel %vm793_vm1, %v729_v58, %v857_v0  ;;  %v761_v5 = vadd.f32 %v1352_v17, %v693_v1  ;;  %v273_v6 = vpop.f32.mrf.mxu0  ;;  %v321_v7 = vpop.f32.mrf.mxu1 }
  0xe9   :  { %985 = vst [vmem:[%s1678_s4 + $0xc0] sm:$0xff] %v921_v4  ;;  %vm809_vm2 = vcmp.ge.f32.partialorder %v745_v3, 0.0  ;;  %v873_v8 = vmul.f32 0.2, %v745_v3  ;;  %v646_v9 = vmul.f32 %v1347_v16, %v273_v6  ;;  %v662_v10 = vmul.f32 %v1347_v16, %v321_v7 }
  0xea   :  { %vm825_vm3 = vcmp.ge.f32.partialorder %v761_v5, 0.0  ;;  %v889_v11 = vmul.f32 0.2, %v761_v5 }
  0xeb   :  { %v937_v12 = vsel %vm809_vm2, %v745_v3, %v873_v8  ;;  %v714_v13 = vadd.f32 %v1352_v17, %v646_v9  ;;  %v730_v14 = vadd.f32 %v1352_v17, %v662_v10 }
  0xec   :  { %1001 = vst [vmem:[%s1678_s4 + $0x140] sm:$0xff] %v937_v12  ;;  %v953_v15 = vsel %vm825_vm3, %v761_v5, %v889_v11  ;;  %v369_v18 = vpop.f32.mrf.mxu2  ;;  %v417_v19 = vpop.f32.mrf.mxu3 }
  0xed   :  { %1017 = vst [vmem:[%s1678_s4 + $0x1c0] sm:$0xff] %v953_v15  ;;  %vm778_vm4 = vcmp.ge.f32.partialorder %v714_v13, 0.0  ;;  %v842_v20 = vmul.f32 0.2, %v714_v13  ;;  %vm794_vm5 = vcmp.ge.f32.partialorder %v730_v14, 0.0  ;;  %v678_v21 = vmul.f32 %v1347_v16, %v369_v18 }
  0xee   :  { %v858_v22 = vmul.f32 0.2, %v730_v14  ;;  %v694_v23 = vmul.f32 %v1347_v16, %v417_v19 }
  0xef   :  { %v906_v24 = vsel %vm778_vm4, %v714_v13, %v842_v20  ;;  %v746_v25 = vadd.f32 %v1352_v17, %v678_v21 }
  0xf0   :  { %970 = vst [vmem:[%s1678_s4 + $0x48] sm:$0xff] %v906_v24  ;;  %v922_v26 = vsel %vm794_vm5, %v730_v14, %v858_v22  ;;  %v762_v27 = vadd.f32 %v1352_v17, %v694_v23  ;;  %v276_v28 = vpop.f32.mrf.mxu0  ;;  %v324_v29 = vpop.f32.mrf.mxu1 }
  0xf1   :  { %986 = vst [vmem:[%s1678_s4 + $0xc8] sm:$0xff] %v922_v26  ;;  %vm810_vm6 = vcmp.ge.f32.partialorder %v746_v25, 0.0  ;;  %v874_v30 = vmul.f32 0.2, %v746_v25  ;;  %v647_v31 = vmul.f32 %v1347_v16, %v276_v28  ;;  %v663_v32 = vmul.f32 %v1347_v16, %v324_v29 }
  0xf2   :  { %vm826_vm7 = vcmp.ge.f32.partialorder %v762_v27, 0.0  ;;  %v890_v33 = vmul.f32 0.2, %v762_v27 }
  0xf3   :  { %v938_v34 = vsel %vm810_vm6, %v746_v25, %v874_v30  ;;  %v715_v35 = vadd.f32 %v1352_v17, %v647_v31  ;;  %v731_v36 = vadd.f32 %v1352_v17, %v663_v32 }
  0xf4   :  { %1002 = vst [vmem:[%s1678_s4 + $0x148] sm:$0xff] %v938_v34  ;;  %v954_v37 = vsel %vm826_vm7, %v762_v27, %v890_v33  ;;  %v372_v38 = vpop.f32.mrf.mxu2  ;;  %v420_v39 = vpop.f32.mrf.mxu3 }
  0xf5   :  { %1018 = vst [vmem:[%s1678_s4 + $0x1c8] sm:$0xff] %v954_v37  ;;  %vm779_vm8 = vcmp.ge.f32.partialorder %v715_v35, 0.0  ;;  %v843_v40 = vmul.f32 0.2, %v715_v35  ;;  %vm795_vm9 = vcmp.ge.f32.partialorder %v731_v36, 0.0  ;;  %v679_v41 = vmul.f32 %v1347_v16, %v372_v38 }
  0xf6   :  { %v859_v42 = vmul.f32 0.2, %v731_v36  ;;  %v695_v43 = vmul.f32 %v1347_v16, %v420_v39 }
  0xf7   :  { %v907_v44 = vsel %vm779_vm8, %v715_v35, %v843_v40  ;;  %v747_v45 = vadd.f32 %v1352_v17, %v679_v41 }
  0xf8   :  { %971 = vst [vmem:[%s1678_s4 + $0x50] sm:$0xff] %v907_v44  ;;  %v923_v46 = vsel %vm795_vm9, %v731_v36, %v859_v42  ;;  %v763_v47 = vadd.f32 %v1352_v17, %v695_v43  ;;  %v279_v48 = vpop.f32.mrf.mxu0  ;;  %v327_v49 = vpop.f32.mrf.mxu1 }
  0xf9   :  { %987 = vst [vmem:[%s1678_s4 + $0xd0] sm:$0xff] %v923_v46  ;;  %vm811_vm10 = vcmp.ge.f32.partialorder %v747_v45, 0.0  ;;  %v875_v50 = vmul.f32 0.2, %v747_v45  ;;  %v648_v51 = vmul.f32 %v1347_v16, %v279_v48  ;;  %v664_v52 = vmul.f32 %v1347_v16, %v327_v49 }
  0xfa   :  { %vm827_vm11 = vcmp.ge.f32.partialorder %v763_v47, 0.0  ;;  %v891_v53 = vmul.f32 0.2, %v763_v47 }
  0xfb   :  { %v939_v54 = vsel %vm811_vm10, %v747_v45, %v875_v50  ;;  %v716_v55 = vadd.f32 %v1352_v17, %v648_v51  ;;  %v732_v56 = vadd.f32 %v1352_v17, %v664_v52 }
  0xfc   :  { %1003 = vst [vmem:[%s1678_s4 + $0x150] sm:$0xff] %v939_v54  ;;  %v955_v57 = vsel %vm827_vm11, %v763_v47, %v891_v53  ;;  %v375_v58 = vpop.f32.mrf.mxu2  ;;  %v423_v59 = vpop.f32.mrf.mxu3 }
  0xfd   :  { %1019 = vst [vmem:[%s1678_s4 + $0x1d0] sm:$0xff] %v955_v57  ;;  %vm780_vm12 = vcmp.ge.f32.partialorder %v716_v55, 0.0  ;;  %v844_v60 = vmul.f32 0.2, %v716_v55  ;;  %vm796_vm13 = vcmp.ge.f32.partialorder %v732_v56, 0.0  ;;  %v680_v61 = vmul.f32 %v1347_v16, %v375_v58 }
  0xfe   :  { %v860_v62 = vmul.f32 0.2, %v732_v56  ;;  %v696_v63 = vmul.f32 %v1347_v16, %v423_v59 }
  0xff   :  { %v908_v0 = vsel %vm780_vm12, %v716_v55, %v844_v60  ;;  %v748_v1 = vadd.f32 %v1352_v17, %v680_v61 }
 0x100   :  { %972 = vst [vmem:[%s1678_s4 + $0x58] sm:$0xff] %v908_v0  ;;  %v924_v2 = vsel %vm796_vm13, %v732_v56, %v860_v62  ;;  %v764_v3 = vadd.f32 %v1352_v17, %v696_v63  ;;  %v282_v4 = vpop.f32.mrf.mxu0  ;;  %v330_v5 = vpop.f32.mrf.mxu1 }
 0x101   :  { %988 = vst [vmem:[%s1678_s4 + $0xd8] sm:$0xff] %v924_v2  ;;  %vm812_vm14 = vcmp.ge.f32.partialorder %v748_v1, 0.0  ;;  %v876_v6 = vmul.f32 0.2, %v748_v1  ;;  %v649_v7 = vmul.f32 %v1347_v16, %v282_v4  ;;  %v665_v8 = vmul.f32 %v1347_v16, %v330_v5 }
 0x102   :  { %vm828_vm15 = vcmp.ge.f32.partialorder %v764_v3, 0.0  ;;  %v892_v9 = vmul.f32 0.2, %v764_v3 }
 0x103   :  { %v940_v10 = vsel %vm812_vm14, %v748_v1, %v876_v6  ;;  %v717_v11 = vadd.f32 %v1352_v17, %v649_v7  ;;  %v733_v12 = vadd.f32 %v1352_v17, %v665_v8 }
 0x104   :  { %1004 = vst [vmem:[%s1678_s4 + $0x158] sm:$0xff] %v940_v10  ;;  %v956_v13 = vsel %vm828_vm15, %v764_v3, %v892_v9  ;;  %v378_v14 = vpop.f32.mrf.mxu2  ;;  %v426_v15 = vpop.f32.mrf.mxu3 }
 0x105   :  { %1020 = vst [vmem:[%s1678_s4 + $0x1d8] sm:$0xff] %v956_v13  ;;  %vm781_vm0 = vcmp.ge.f32.partialorder %v717_v11, 0.0  ;;  %v845_v18 = vmul.f32 0.2, %v717_v11  ;;  %vm797_vm1 = vcmp.ge.f32.partialorder %v733_v12, 0.0  ;;  %v681_v19 = vmul.f32 %v1347_v16, %v378_v14 }
 0x106   :  { %v861_v20 = vmul.f32 0.2, %v733_v12  ;;  %v697_v21 = vmul.f32 %v1347_v16, %v426_v15 }
 0x107   :  { %v909_v22 = vsel %vm781_vm0, %v717_v11, %v845_v18  ;;  %v749_v23 = vadd.f32 %v1352_v17, %v681_v19 }
 0x108   :  { %973 = vst [vmem:[%s1678_s4 + $0x60] sm:$0xff] %v909_v22  ;;  %v925_v24 = vsel %vm797_vm1, %v733_v12, %v861_v20  ;;  %v765_v25 = vadd.f32 %v1352_v17, %v697_v21  ;;  %v285_v26 = vpop.f32.mrf.mxu0  ;;  %v333_v27 = vpop.f32.mrf.mxu1 }
 0x109   :  { %989 = vst [vmem:[%s1678_s4 + $0xe0] sm:$0xff] %v925_v24  ;;  %vm813_vm2 = vcmp.ge.f32.partialorder %v749_v23, 0.0  ;;  %v877_v28 = vmul.f32 0.2, %v749_v23  ;;  %v650_v29 = vmul.f32 %v1347_v16, %v285_v26  ;;  %v666_v30 = vmul.f32 %v1347_v16, %v333_v27 }
 0x10a   :  { %vm829_vm3 = vcmp.ge.f32.partialorder %v765_v25, 0.0  ;;  %v893_v31 = vmul.f32 0.2, %v765_v25 }
 0x10b   :  { %v941_v32 = vsel %vm813_vm2, %v749_v23, %v877_v28  ;;  %v718_v33 = vadd.f32 %v1352_v17, %v650_v29  ;;  %v734_v34 = vadd.f32 %v1352_v17, %v666_v30 }
 0x10c   :  { %1005 = vst [vmem:[%s1678_s4 + $0x160] sm:$0xff] %v941_v32  ;;  %v957_v35 = vsel %vm829_vm3, %v765_v25, %v893_v31  ;;  %v381_v36 = vpop.f32.mrf.mxu2  ;;  %v429_v37 = vpop.f32.mrf.mxu3 }
 0x10d   :  { %1021 = vst [vmem:[%s1678_s4 + $0x1e0] sm:$0xff] %v957_v35  ;;  %vm782_vm4 = vcmp.ge.f32.partialorder %v718_v33, 0.0  ;;  %v846_v38 = vmul.f32 0.2, %v718_v33  ;;  %vm798_vm5 = vcmp.ge.f32.partialorder %v734_v34, 0.0  ;;  %v682_v39 = vmul.f32 %v1347_v16, %v381_v36 }
 0x10e   :  { %v862_v40 = vmul.f32 0.2, %v734_v34  ;;  %v698_v41 = vmul.f32 %v1347_v16, %v429_v37 }
 0x10f   :  { %v910_v42 = vsel %vm782_vm4, %v718_v33, %v846_v38  ;;  %v750_v43 = vadd.f32 %v1352_v17, %v682_v39 }
 0x110   :  { %974 = vst [vmem:[%s1678_s4 + $0x68] sm:$0xff] %v910_v42  ;;  %v926_v44 = vsel %vm798_vm5, %v734_v34, %v862_v40  ;;  %v766_v45 = vadd.f32 %v1352_v17, %v698_v41  ;;  %v288_v46 = vpop.f32.mrf.mxu0  ;;  %v336_v47 = vpop.f32.mrf.mxu1 }
 0x111   :  { %990 = vst [vmem:[%s1678_s4 + $0xe8] sm:$0xff] %v926_v44  ;;  %vm814_vm6 = vcmp.ge.f32.partialorder %v750_v43, 0.0  ;;  %v878_v48 = vmul.f32 0.2, %v750_v43  ;;  %v651_v49 = vmul.f32 %v1347_v16, %v288_v46  ;;  %v667_v50 = vmul.f32 %v1347_v16, %v336_v47 }
 0x112   :  { %vm830_vm7 = vcmp.ge.f32.partialorder %v766_v45, 0.0  ;;  %v894_v51 = vmul.f32 0.2, %v766_v45 }
 0x113   :  { %v942_v52 = vsel %vm814_vm6, %v750_v43, %v878_v48  ;;  %v719_v53 = vadd.f32 %v1352_v17, %v651_v49  ;;  %v735_v54 = vadd.f32 %v1352_v17, %v667_v50 }
 0x114   :  { %1006 = vst [vmem:[%s1678_s4 + $0x168] sm:$0xff] %v942_v52  ;;  %v958_v55 = vsel %vm830_vm7, %v766_v45, %v894_v51  ;;  %v384_v56 = vpop.f32.mrf.mxu2  ;;  %v432_v57 = vpop.f32.mrf.mxu3 }
 0x115   :  { %1022 = vst [vmem:[%s1678_s4 + $0x1e8] sm:$0xff] %v958_v55  ;;  %vm783_vm8 = vcmp.ge.f32.partialorder %v719_v53, 0.0  ;;  %v847_v58 = vmul.f32 0.2, %v719_v53  ;;  %vm799_vm9 = vcmp.ge.f32.partialorder %v735_v54, 0.0  ;;  %v683_v59 = vmul.f32 %v1347_v16, %v384_v56 }
 0x116   :  { %v863_v60 = vmul.f32 0.2, %v735_v54  ;;  %v699_v61 = vmul.f32 %v1347_v16, %v432_v57 }
 0x117   :  { %v911_v62 = vsel %vm783_vm8, %v719_v53, %v847_v58  ;;  %v751_v63 = vadd.f32 %v1352_v17, %v683_v59 }
 0x118   :  { %975 = vst [vmem:[%s1678_s4 + $0x70] sm:$0xff] %v911_v62  ;;  %v927_v0 = vsel %vm799_vm9, %v735_v54, %v863_v60  ;;  %v767_v1 = vadd.f32 %v1352_v17, %v699_v61  ;;  %v291_v2 = vpop.f32.mrf.mxu0  ;;  %v339_v3 = vpop.f32.mrf.mxu1 }
 0x119   :  { %991 = vst [vmem:[%s1678_s4 + $0xf0] sm:$0xff] %v927_v0  ;;  %vm815_vm10 = vcmp.ge.f32.partialorder %v751_v63, 0.0  ;;  %v879_v4 = vmul.f32 0.2, %v751_v63  ;;  %v652_v5 = vmul.f32 %v1347_v16, %v291_v2  ;;  %v668_v6 = vmul.f32 %v1347_v16, %v339_v3 }
 0x11a   :  { %vm831_vm11 = vcmp.ge.f32.partialorder %v767_v1, 0.0  ;;  %v895_v7 = vmul.f32 0.2, %v767_v1 }
 0x11b   :  { %v943_v8 = vsel %vm815_vm10, %v751_v63, %v879_v4  ;;  %v720_v9 = vadd.f32 %v1352_v17, %v652_v5  ;;  %v736_v10 = vadd.f32 %v1352_v17, %v668_v6 }
 0x11c   :  { %1007 = vst [vmem:[%s1678_s4 + $0x170] sm:$0xff] %v943_v8  ;;  %v959_v11 = vsel %vm831_vm11, %v767_v1, %v895_v7  ;;  %v387_v12 = vpop.f32.mrf.mxu2  ;;  %v435_v13 = vpop.f32.mrf.mxu3 }
 0x11d   :  { %1023 = vst [vmem:[%s1678_s4 + $0x1f0] sm:$0xff] %v959_v11  ;;  %vm784_vm12 = vcmp.ge.f32.partialorder %v720_v9, 0.0  ;;  %v848_v14 = vmul.f32 0.2, %v720_v9  ;;  %vm800_vm13 = vcmp.ge.f32.partialorder %v736_v10, 0.0  ;;  %v684_v15 = vmul.f32 %v1347_v16, %v387_v12 }
 0x11e   :  { %v864_v18 = vmul.f32 0.2, %v736_v10  ;;  %v700_v19 = vmul.f32 %v1347_v16, %v435_v13 }
 0x11f   :  { %v912_v20 = vsel %vm784_vm12, %v720_v9, %v848_v14  ;;  %v752_v21 = vadd.f32 %v1352_v17, %v684_v15 }
 0x120   :  { %976 = vst [vmem:[%s1678_s4 + $0x78] sm:$0xff] %v912_v20  ;;  %v928_v22 = vsel %vm800_vm13, %v736_v10, %v864_v18  ;;  %v768_v23 = vadd.f32 %v1352_v17, %v700_v19 }
 0x121   :  { %992 = vst [vmem:[%s1678_s4 + $0xf8] sm:$0xff] %v928_v22  ;;  %vm816_vm14 = vcmp.ge.f32.partialorder %v752_v21, 0.0  ;;  %v880_v24 = vmul.f32 0.2, %v752_v21 }
 0x122   :  { %vm832_vm15 = vcmp.ge.f32.partialorder %v768_v23, 0.0  ;;  %v896_v25 = vmul.f32 0.2, %v768_v23 }
 0x123   :  { %v944_v26 = vsel %vm816_vm14, %v752_v21, %v880_v24 }
 0x124   :  { %1008 = vst [vmem:[%s1678_s4 + $0x178] sm:$0xff] %v944_v26  ;;  %v960_v16 = vsel %vm832_vm15, %v768_v23, %v896_v25 }
 0x125   :  { %1024 = vst [vmem:[%s1678_s4 + $0x1f8] sm:$0xff] %v960_v16 }

// kernel: discriminator_forward.5
= control target key start
LH: loop header
LB: loop body
LE: loop exit
PB: predicated region body
PF: predicated region fallthrough
CT: control target
= control target key end

     0   :  { %s1271_s15 = smov 0   ;;  %s1273_s16 = smov 0   ;;  %s1692_s0 = inlined_call_operand.vmem [shape: f32[128,1024], index: 0, kind: input, shape index: {}]   ;;  %s1693_s1 = inlined_call_operand.vmem [shape: f32[1024,128], index: 1, kind: input, shape index: {}]   ;;  %s1694_s2 = inlined_call_operand.vmem [shape: f32[1,128], index: 2, kind: input, shape index: {}]   ;;  %s1695_s3 = inlined_call_operand.vmem [shape: f32[1,128], index: 3, kind: input, shape index: {}]   ;;  %s1696_s4 = inlined_call_operand.vmem [shape: f32[128,128], index: 4, kind: output, shape index: {}]  }
   0x1   :  { %s1275_s17 = smov 0   ;;  %s1277_s18 = smov 0  }
   0x2   :  { %s1279_s19 = smov 0  }
   0x3 LB: > { %s26_s20 = sadd.s32 1, %s1239_s18  ;;  %p49_p1 = scmp.ne.s32.totalorder %s1231_s16, %s1227_s15  ;;  %s1243_s19 = sphi %s1279_s19, %s14_s19   ;;  %s1239_s18 = sphi %s1277_s18, %s1700_s18   ;;  %s1235_s17 = sphi %s1275_s17, %s1699_s17   ;;  %s1231_s16 = sphi %s1273_s16, %s1698_s16   ;;  %s1227_s15 = sphi %s1271_s15, %s1697_s15  }
   0x4   : > { %p27_p0 = scmp.ge.s32.totalorder %s26_s20, 2  ;;  %p50_p2 = scmp.eq.s32.totalorder %s1243_s19, 0 }
   0x5   : > { %s42_s22 = sadd.s32 1, %s1231_s16  ;;  %p1147_p5 = scmp.ge.s32.totalorder %s1243_s19, 2 }
   0x6   : > { %s1702_s20 = smov (%p27_p0, %s26_s20), 0  ;;  %p51_p3 = por %p50_p2, %p49_p1 }
   0x7   : > { %s38_s21 = ssub.s32 %s1239_s18, %s1702_s20  ;;  %195 = sbr.rel (%p1147_p5) target bundleno = 80 (0x50), region = 24 }
   0x8   : > { %p40_p4 = scmp.eq.s32.totalorder %s38_s21, 0 }
   0xa   : > { %s1306_s23 = scalar_select %p40_p4, %s1231_s16, %s42_s22  }
   0xc   : > { %198 = sbr.rel (!%p51_p3) target bundleno = 80 (0x50), region = 28  ;;  %s200_s24 = sand.u32 (%p51_p3), 1, %s1231_s16  }
   0xd   : > { %s1161_s25 = sshll.u32 (%p51_p3), %s1239_s18, 5  ;;  %s1148_s26 = sshll.u32 (%p51_p3), %s200_s24, 9 }
   0xe   : > { %s1314_s29 = scalar_lea.vmem (%p51_p3), %s1692_s0, %s1161_s25  ;;  %s1319_s30 = scalar_lea.vmem (%p51_p3), [#allocation3], %s1148_s26 }
   0xf   : > { %v221_v0 = vld [vmem:[%s1314_s29] sm:$0xff] (%p51_p3)  ;;  %v223_v1 = vld [vmem:[%s1314_s29 + $0x8] sm:$0xff] (%p51_p3)  ;;  %v225_v2 = vld [vmem:[%s1314_s29 + $0x10] sm:$0xff] (%p51_p3) }
  0x10   : > { %222 = vst [vmem:[%s1319_s30] sm:$0xff] (%p51_p3), %v221_v0  ;;  %v227_v3 = vld [vmem:[%s1314_s29 + $0x18] sm:$0xff] (%p51_p3)  ;;  %v229_v4 = vld [vmem:[%s1314_s29 + $0x40] sm:$0xff] (%p51_p3)  ;;  %v231_v5 = vld [vmem:[%s1314_s29 + $0x48] sm:$0xff] (%p51_p3) }
  0x11   : > { %224 = vst [vmem:[%s1319_s30 + $0x8] sm:$0xff] %v223_v1  ;;  %v233_v6 = vld [vmem:[%s1314_s29 + $0x50] sm:$0xff]  ;;  %v235_v7 = vld [vmem:[%s1314_s29 + $0x58] sm:$0xff]  ;;  %v237_v8 = vld [vmem:[%s1314_s29 + $0x80] sm:$0xff] }
  0x12   : > { %226 = vst [vmem:[%s1319_s30 + $0x10] sm:$0xff] %v225_v2  ;;  %v239_v9 = vld [vmem:[%s1314_s29 + $0x88] sm:$0xff]  ;;  %v241_v10 = vld [vmem:[%s1314_s29 + $0x90] sm:$0xff]  ;;  %v243_v11 = vld [vmem:[%s1314_s29 + $0x98] sm:$0xff] }
  0x13   : > { %228 = vst [vmem:[%s1319_s30 + $0x18] sm:$0xff] %v227_v3  ;;  %v245_v12 = vld [vmem:[%s1314_s29 + $0xc0] sm:$0xff]  ;;  %v247_v13 = vld [vmem:[%s1314_s29 + $0xc8] sm:$0xff]  ;;  %v249_v14 = vld [vmem:[%s1314_s29 + $0xd0] sm:$0xff] }
  0x14   : > { %230 = vst [vmem:[%s1319_s30 + $0x20] sm:$0xff] %v229_v4  ;;  %v251_v15 = vld [vmem:[%s1314_s29 + $0xd8] sm:$0xff]  ;;  %v253_v16 = vld [vmem:[%s1314_s29 + $0x100] sm:$0xff]  ;;  %v255_v17 = vld [vmem:[%s1314_s29 + $0x108] sm:$0xff] }
  0x15   : > { %232 = vst [vmem:[%s1319_s30 + $0x28] sm:$0xff] %v231_v5  ;;  %v257_v18 = vld [vmem:[%s1314_s29 + $0x110] sm:$0xff]  ;;  %v259_v19 = vld [vmem:[%s1314_s29 + $0x118] sm:$0xff]  ;;  %v261_v20 = vld [vmem:[%s1314_s29 + $0x140] sm:$0xff] }
  0x16   : > { %234 = vst [vmem:[%s1319_s30 + $0x30] sm:$0xff] %v233_v6  ;;  %v263_v21 = vld [vmem:[%s1314_s29 + $0x148] sm:$0xff]  ;;  %v265_v22 = vld [vmem:[%s1314_s29 + $0x150] sm:$0xff]  ;;  %v267_v23 = vld [vmem:[%s1314_s29 + $0x158] sm:$0xff] }
  0x17   : > { %236 = vst [vmem:[%s1319_s30 + $0x38] sm:$0xff] %v235_v7  ;;  %v269_v24 = vld [vmem:[%s1314_s29 + $0x180] sm:$0xff]  ;;  %v271_v25 = vld [vmem:[%s1314_s29 + $0x188] sm:$0xff]  ;;  %v273_v26 = vld [vmem:[%s1314_s29 + $0x190] sm:$0xff] }
  0x18   : > { %238 = vst [vmem:[%s1319_s30 + $0x40] sm:$0xff] %v237_v8  ;;  %v275_v27 = vld [vmem:[%s1314_s29 + $0x198] sm:$0xff]  ;;  %v277_v28 = vld [vmem:[%s1314_s29 + $0x1c0] sm:$0xff]  ;;  %v279_v29 = vld [vmem:[%s1314_s29 + $0x1c8] sm:$0xff] }
  0x19   : > { %240 = vst [vmem:[%s1319_s30 + $0x48] sm:$0xff] %v239_v9  ;;  %v281_v30 = vld [vmem:[%s1314_s29 + $0x1d0] sm:$0xff]  ;;  %v283_v31 = vld [vmem:[%s1314_s29 + $0x1d8] sm:$0xff]  ;;  %v285_v32 = vld [vmem:[%s1314_s29 + $0x200] sm:$0xff] }
  0x1a   : > { %242 = vst [vmem:[%s1319_s30 + $0x50] sm:$0xff] %v241_v10  ;;  %v287_v33 = vld [vmem:[%s1314_s29 + $0x208] sm:$0xff]  ;;  %v289_v34 = vld [vmem:[%s1314_s29 + $0x210] sm:$0xff]  ;;  %v291_v35 = vld [vmem:[%s1314_s29 + $0x218] sm:$0xff] }
  0x1b   : > { %244 = vst [vmem:[%s1319_s30 + $0x58] sm:$0xff] %v243_v11  ;;  %v293_v36 = vld [vmem:[%s1314_s29 + $0x240] sm:$0xff]  ;;  %v295_v37 = vld [vmem:[%s1314_s29 + $0x248] sm:$0xff]  ;;  %v297_v38 = vld [vmem:[%s1314_s29 + $0x250] sm:$0xff] }
  0x1c   : > { %246 = vst [vmem:[%s1319_s30 + $0x60] sm:$0xff] %v245_v12  ;;  %v299_v39 = vld [vmem:[%s1314_s29 + $0x258] sm:$0xff]  ;;  %v301_v40 = vld [vmem:[%s1314_s29 + $0x280] sm:$0xff]  ;;  %v303_v41 = vld [vmem:[%s1314_s29 + $0x288] sm:$0xff] }
  0x1d   : > { %248 = vst [vmem:[%s1319_s30 + $0x68] sm:$0xff] %v247_v13  ;;  %v305_v42 = vld [vmem:[%s1314_s29 + $0x290] sm:$0xff]  ;;  %v307_v43 = vld [vmem:[%s1314_s29 + $0x298] sm:$0xff]  ;;  %v309_v44 = vld [vmem:[%s1314_s29 + $0x2c0] sm:$0xff] }
  0x1e   : > { %250 = vst [vmem:[%s1319_s30 + $0x70] sm:$0xff] %v249_v14  ;;  %v311_v45 = vld [vmem:[%s1314_s29 + $0x2c8] sm:$0xff]  ;;  %v313_v46 = vld [vmem:[%s1314_s29 + $0x2d0] sm:$0xff]  ;;  %v315_v47 = vld [vmem:[%s1314_s29 + $0x2d8] sm:$0xff] }
  0x1f   : > { %252 = vst [vmem:[%s1319_s30 + $0x78] sm:$0xff] %v251_v15  ;;  %v317_v48 = vld [vmem:[%s1314_s29 + $0x300] sm:$0xff]  ;;  %v319_v49 = vld [vmem:[%s1314_s29 + $0x308] sm:$0xff]  ;;  %v321_v50 = vld [vmem:[%s1314_s29 + $0x310] sm:$0xff] }
  0x20   : > { %254 = vst [vmem:[%s1319_s30 + $0x80] sm:$0xff] %v253_v16  ;;  %v323_v51 = vld [vmem:[%s1314_s29 + $0x318] sm:$0xff]  ;;  %v325_v52 = vld [vmem:[%s1314_s29 + $0x340] sm:$0xff]  ;;  %v327_v53 = vld [vmem:[%s1314_s29 + $0x348] sm:$0xff] }
  0x21   : > { %256 = vst [vmem:[%s1319_s30 + $0x88] sm:$0xff] %v255_v17  ;;  %v329_v54 = vld [vmem:[%s1314_s29 + $0x350] sm:$0xff]  ;;  %v331_v55 = vld [vmem:[%s1314_s29 + $0x358] sm:$0xff]  ;;  %v333_v56 = vld [vmem:[%s1314_s29 + $0x380] sm:$0xff] }
  0x22   : > { %258 = vst [vmem:[%s1319_s30 + $0x90] sm:$0xff] %v257_v18  ;;  %v335_v57 = vld [vmem:[%s1314_s29 + $0x388] sm:$0xff]  ;;  %v337_v58 = vld [vmem:[%s1314_s29 + $0x390] sm:$0xff]  ;;  %v339_v59 = vld [vmem:[%s1314_s29 + $0x398] sm:$0xff] }
  0x23   : > { %260 = vst [vmem:[%s1319_s30 + $0x98] sm:$0xff] %v259_v19  ;;  %v341_v60 = vld [vmem:[%s1314_s29 + $0x3c0] sm:$0xff]  ;;  %v343_v61 = vld [vmem:[%s1314_s29 + $0x3c8] sm:$0xff]  ;;  %v345_v62 = vld [vmem:[%s1314_s29 + $0x3d0] sm:$0xff] }
  0x24   : > { %262 = vst [vmem:[%s1319_s30 + $0xa0] sm:$0xff] %v261_v20  ;;  %v347_v63 = vld [vmem:[%s1314_s29 + $0x3d8] sm:$0xff] }
  0x25   : > { %264 = vst [vmem:[%s1319_s30 + $0xa8] sm:$0xff] %v263_v21 }
  0x26   : > { %266 = vst [vmem:[%s1319_s30 + $0xb0] sm:$0xff] %v265_v22 }
  0x27   : > { %268 = vst [vmem:[%s1319_s30 + $0xb8] sm:$0xff] %v267_v23 }
  0x28   : > { %270 = vst [vmem:[%s1319_s30 + $0xc0] sm:$0xff] %v269_v24 }
  0x29   : > { %272 = vst [vmem:[%s1319_s30 + $0xc8] sm:$0xff] %v271_v25 }
  0x2a   : > { %274 = vst [vmem:[%s1319_s30 + $0xd0] sm:$0xff] %v273_v26 }
  0x2b   : > { %276 = vst [vmem:[%s1319_s30 + $0xd8] sm:$0xff] %v275_v27 }
  0x2c   : > { %278 = vst [vmem:[%s1319_s30 + $0xe0] sm:$0xff] %v277_v28 }
  0x2d   : > { %280 = vst [vmem:[%s1319_s30 + $0xe8] sm:$0xff] %v279_v29 }
  0x2e   : > { %282 = vst [vmem:[%s1319_s30 + $0xf0] sm:$0xff] %v281_v30 }
  0x2f   : > { %284 = vst [vmem:[%s1319_s30 + $0xf8] sm:$0xff] %v283_v31 }
  0x30   : > { %286 = vst [vmem:[%s1319_s30 + $0x100] sm:$0xff] %v285_v32 }
  0x31   : > { %288 = vst [vmem:[%s1319_s30 + $0x108] sm:$0xff] %v287_v33 }
  0x32   : > { %290 = vst [vmem:[%s1319_s30 + $0x110] sm:$0xff] %v289_v34 }
  0x33   : > { %292 = vst [vmem:[%s1319_s30 + $0x118] sm:$0xff] %v291_v35 }
  0x34   : > { %294 = vst [vmem:[%s1319_s30 + $0x120] sm:$0xff] %v293_v36 }
  0x35   : > { %296 = vst [vmem:[%s1319_s30 + $0x128] sm:$0xff] %v295_v37 }
  0x36   : > { %298 = vst [vmem:[%s1319_s30 + $0x130] sm:$0xff] %v297_v38 }
  0x37   : > { %300 = vst [vmem:[%s1319_s30 + $0x138] sm:$0xff] %v299_v39 }
  0x38   : > { %302 = vst [vmem:[%s1319_s30 + $0x140] sm:$0xff] %v301_v40 }
  0x39   : > { %304 = vst [vmem:[%s1319_s30 + $0x148] sm:$0xff] %v303_v41 }
  0x3a   : > { %306 = vst [vmem:[%s1319_s30 + $0x150] sm:$0xff] %v305_v42 }
  0x3b   : > { %308 = vst [vmem:[%s1319_s30 + $0x158] sm:$0xff] %v307_v43 }
  0x3c   : > { %310 = vst [vmem:[%s1319_s30 + $0x160] sm:$0xff] %v309_v44 }
  0x3d   : > { %312 = vst [vmem:[%s1319_s30 + $0x168] sm:$0xff] %v311_v45 }
  0x3e   : > { %314 = vst [vmem:[%s1319_s30 + $0x170] sm:$0xff] %v313_v46 }
  0x3f   : > { %316 = vst [vmem:[%s1319_s30 + $0x178] sm:$0xff] %v315_v47 }
  0x40   : > { %318 = vst [vmem:[%s1319_s30 + $0x180] sm:$0xff] %v317_v48 }
  0x41   : > { %320 = vst [vmem:[%s1319_s30 + $0x188] sm:$0xff] %v319_v49 }
  0x42   : > { %322 = vst [vmem:[%s1319_s30 + $0x190] sm:$0xff] %v321_v50 }
  0x43   : > { %324 = vst [vmem:[%s1319_s30 + $0x198] sm:$0xff] %v323_v51 }
  0x44   : > { %326 = vst [vmem:[%s1319_s30 + $0x1a0] sm:$0xff] %v325_v52 }
  0x45   : > { %328 = vst [vmem:[%s1319_s30 + $0x1a8] sm:$0xff] %v327_v53 }
  0x46   : > { %330 = vst [vmem:[%s1319_s30 + $0x1b0] sm:$0xff] %v329_v54 }
  0x47   : > { %332 = vst [vmem:[%s1319_s30 + $0x1b8] sm:$0xff] %v331_v55 }
  0x48   : > { %334 = vst [vmem:[%s1319_s30 + $0x1c0] sm:$0xff] %v333_v56 }
  0x49   : > { %336 = vst [vmem:[%s1319_s30 + $0x1c8] sm:$0xff] %v335_v57 }
  0x4a   : > { %338 = vst [vmem:[%s1319_s30 + $0x1d0] sm:$0xff] %v337_v58 }
  0x4b   : > { %340 = vst [vmem:[%s1319_s30 + $0x1d8] sm:$0xff] %v339_v59 }
  0x4c   : > { %342 = vst [vmem:[%s1319_s30 + $0x1e0] sm:$0xff] %v341_v60 }
  0x4d   : > { %344 = vst [vmem:[%s1319_s30 + $0x1e8] sm:$0xff] %v343_v61 }
  0x4e   : > { %346 = vst [vmem:[%s1319_s30 + $0x1f0] sm:$0xff] %v345_v62 }
  0x4f   : > { %348 = vst [vmem:[%s1319_s30 + $0x1f8] sm:$0xff] %v347_v63 }
  0x50 PF: > { %p1151_p6 = scmp.ge.s32.totalorder %s1243_s19, 1  ;;  %p365_p7 = scmp.lt.s32.totalorder %s1243_s19, 3 }
  0x52   : > { %p366_p8 = pnand %p1151_p6, %p365_p7 }
  0x53   : > { %s372_s5 = sand.u32 (!%p366_p8), 1, %s1227_s15   ;;  %s1153_s6 = sshll.u32 (!%p366_p8), %s1235_s17, 6 }
  0x54   : > { %369 = sbr.rel (%p366_p8) target bundleno = 429 (0x1ad), region = 55  ;;  %s1152_s7 = sshll.u32 (!%p366_p8), %s372_s5, 9 }
  0x55   : > { %p417_p9 = scmp.lt.s32.totalorder (!%p366_p8), %s1153_s6, 127  ;;  %s1455_s12 = scalar_lea.vmem (!%p366_p8), [#allocation3], %s1152_s7 }
  0x56   : > { %p1155_p10 = scmp.ne.s32.totalorder (!%p366_p8), %s1235_s17, 0 }
  0x59   : > { %s1704_s6 = smov (!%p417_p9, %s1153_s6), 127  ;;  %443 = sbr.rel (%p1155_p10) target bundleno = 111 (0x6f), region = 63 }
  0x5a   : > { %s1154_s8 = sshll.u32 %s1704_s6, 3 }
  0x5b   : > { %s1453_s11 = scalar_lea.vmem %s1693_s1, %s1154_s8 }
  0x5e   : > { %v1245_v0 = vmov 0.0  }
  0x5f   : > { %444 = vst [vmem:[#allocation2 + $0x30] sm:$0xff] %v1245_v0 }
  0x60   : > { %445 = vst [vmem:[#allocation2] sm:$0xff] %v1245_v0 }
  0x61   : > { %446 = vst [vmem:[#allocation2 + $0x58] sm:$0xff] %v1245_v0 }
  0x62   : > { %447 = vst [vmem:[#allocation2 + $0x18] sm:$0xff] %v1245_v0 }
  0x63   : > { %448 = vst [vmem:[#allocation2 + $0x50] sm:$0xff] %v1245_v0 }
  0x64   : > { %449 = vst [vmem:[#allocation2 + $0x68] sm:$0xff] %v1245_v0 }
  0x65   : > { %450 = vst [vmem:[#allocation2 + $0x8] sm:$0xff] %v1245_v0 }
  0x66   : > { %451 = vst [vmem:[#allocation2 + $0x48] sm:$0xff] %v1245_v0 }
  0x67   : > { %452 = vst [vmem:[#allocation2 + $0x40] sm:$0xff] %v1245_v0 }
  0x68   : > { %453 = vst [vmem:[#allocation2 + $0x20] sm:$0xff] %v1245_v0 }
  0x69   : > { %454 = vst [vmem:[#allocation2 + $0x10] sm:$0xff] %v1245_v0 }
  0x6a   : > { %455 = vst [vmem:[#allocation2 + $0x38] sm:$0xff] %v1245_v0 }
  0x6b   : > { %456 = vst [vmem:[#allocation2 + $0x60] sm:$0xff] %v1245_v0 }
  0x6c   : > { %457 = vst [vmem:[#allocation2 + $0x70] sm:$0xff] %v1245_v0 }
  0x6d   : > { %458 = vst [vmem:[#allocation2 + $0x78] sm:$0xff] %v1245_v0 }
  0x6e   : > { %459 = vst [vmem:[#allocation2 + $0x28] sm:$0xff] %v1245_v0 }
  0x6f PF: > { %v587_v1 = vld [vmem:[%s1453_s11 + $0x178] sm:$0xff]  ;;  %v586_v2 = vld [vmem:[%s1453_s11 + $0x170] sm:$0xff]  ;;  %v585_v6 = vld [vmem:[%s1453_s11 + $0x168] sm:$0xff]  ;;  %p1156_p11 = scmp.ne.s32.totalorder %s1235_s17, 1 }
  0x70   : > { %v603_v3 = vld [vmem:[%s1453_s11 + $0x1f8] sm:$0xff]  ;;  %734 = vmatpush.msra.mxu2 %v587_v1  ;;  %v602_v7 = vld [vmem:[%s1453_s11 + $0x1f0] sm:$0xff]  ;;  %v601_v10 = vld [vmem:[%s1453_s11 + $0x1e8] sm:$0xff] }
  0x71   : > { %799 = vmatpush.msra.mxu3 %v603_v3  ;;  %v555_v4 = vld [vmem:[%s1453_s11 + $0x78] sm:$0xff]  ;;  %v554_v8 = vld [vmem:[%s1453_s11 + $0x70] sm:$0xff]  ;;  %v553_v11 = vld [vmem:[%s1453_s11 + $0x68] sm:$0xff] }
  0x72   : > { %v571_v5 = vld [vmem:[%s1453_s11 + $0xf8] sm:$0xff]  ;;  %604 = vmatpush.msra.mxu0 %v555_v4  ;;  %v570_v9 = vld [vmem:[%s1453_s11 + $0xf0] sm:$0xff]  ;;  %735 = vmatpush.msra.mxu2 %v586_v2  ;;  %v584_v12 = vld [vmem:[%s1453_s11 + $0x160] sm:$0xff] }
  0x73   : > { %669 = vmatpush.msra.mxu1 %v571_v5  ;;  %800 = vmatpush.msra.mxu3 %v602_v7  ;;  %v569_v13 = vld [vmem:[%s1453_s11 + $0xe8] sm:$0xff]  ;;  %v600_v14 = vld [vmem:[%s1453_s11 + $0x1e0] sm:$0xff]  ;;  %v583_v17 = vld [vmem:[%s1453_s11 + $0x158] sm:$0xff] }
  0x74   : > { %605 = vmatpush.msra.mxu0 %v554_v8  ;;  %736 = vmatpush.msra.mxu2 %v585_v6  ;;  %v552_v15 = vld [vmem:[%s1453_s11 + $0x60] sm:$0xff]  ;;  %v599_v18 = vld [vmem:[%s1453_s11 + $0x1d8] sm:$0xff]  ;;  %v582_v21 = vld [vmem:[%s1453_s11 + $0x150] sm:$0xff] }
  0x75   : > { %670 = vmatpush.msra.mxu1 %v570_v9  ;;  %801 = vmatpush.msra.mxu3 %v601_v10  ;;  %v568_v16 = vld [vmem:[%s1453_s11 + $0xe0] sm:$0xff]  ;;  %v551_v19 = vld [vmem:[%s1453_s11 + $0x58] sm:$0xff]  ;;  %v598_v22 = vld [vmem:[%s1453_s11 + $0x1d0] sm:$0xff] }
  0x76   : > { %606 = vmatpush.msra.mxu0 %v553_v11  ;;  %737 = vmatpush.msra.mxu2 %v584_v12  ;;  %v567_v20 = vld [vmem:[%s1453_s11 + $0xd8] sm:$0xff]  ;;  %v550_v23 = vld [vmem:[%s1453_s11 + $0x50] sm:$0xff]  ;;  %v581_v25 = vld [vmem:[%s1453_s11 + $0x148] sm:$0xff] }
  0x77   : > { %671 = vmatpush.msra.mxu1 %v569_v13  ;;  %802 = vmatpush.msra.mxu3 %v600_v14  ;;  %v566_v24 = vld [vmem:[%s1453_s11 + $0xd0] sm:$0xff]  ;;  %v597_v26 = vld [vmem:[%s1453_s11 + $0x1c8] sm:$0xff]  ;;  %v580_v29 = vld [vmem:[%s1453_s11 + $0x140] sm:$0xff] }
  0x78   : > { %607 = vmatpush.msra.mxu0 %v552_v15  ;;  %738 = vmatpush.msra.mxu2 %v583_v17  ;;  %v549_v27 = vld [vmem:[%s1453_s11 + $0x48] sm:$0xff]  ;;  %v596_v30 = vld [vmem:[%s1453_s11 + $0x1c0] sm:$0xff]  ;;  %v579_v33 = vld [vmem:[%s1453_s11 + $0x138] sm:$0xff] }
  0x79   : > { %672 = vmatpush.msra.mxu1 %v568_v16  ;;  %803 = vmatpush.msra.mxu3 %v599_v18  ;;  %v565_v28 = vld [vmem:[%s1453_s11 + $0xc8] sm:$0xff]  ;;  %v548_v31 = vld [vmem:[%s1453_s11 + $0x40] sm:$0xff]  ;;  %v595_v34 = vld [vmem:[%s1453_s11 + $0x1b8] sm:$0xff] }
  0x7a   : > { %608 = vmatpush.msra.mxu0 %v551_v19  ;;  %739 = vmatpush.msra.mxu2 %v582_v21  ;;  %v564_v32 = vld [vmem:[%s1453_s11 + $0xc0] sm:$0xff]  ;;  %v547_v35 = vld [vmem:[%s1453_s11 + $0x38] sm:$0xff]  ;;  %v578_v37 = vld [vmem:[%s1453_s11 + $0x130] sm:$0xff] }
  0x7b   : > { %673 = vmatpush.msra.mxu1 %v567_v20  ;;  %804 = vmatpush.msra.mxu3 %v598_v22  ;;  %v563_v36 = vld [vmem:[%s1453_s11 + $0xb8] sm:$0xff]  ;;  %v594_v38 = vld [vmem:[%s1453_s11 + $0x1b0] sm:$0xff]  ;;  %v577_v41 = vld [vmem:[%s1453_s11 + $0x128] sm:$0xff] }
  0x7c   : > { %609 = vmatpush.msra.mxu0 %v550_v23  ;;  %740 = vmatpush.msra.mxu2 %v581_v25  ;;  %v546_v39 = vld [vmem:[%s1453_s11 + $0x30] sm:$0xff]  ;;  %v593_v42 = vld [vmem:[%s1453_s11 + $0x1a8] sm:$0xff]  ;;  %v576_v45 = vld [vmem:[%s1453_s11 + $0x120] sm:$0xff] }
  0x7d   : > { %674 = vmatpush.msra.mxu1 %v566_v24  ;;  %805 = vmatpush.msra.mxu3 %v597_v26  ;;  %v562_v40 = vld [vmem:[%s1453_s11 + $0xb0] sm:$0xff]  ;;  %v545_v43 = vld [vmem:[%s1453_s11 + $0x28] sm:$0xff]  ;;  %v592_v46 = vld [vmem:[%s1453_s11 + $0x1a0] sm:$0xff] }
  0x7e   : > { %610 = vmatpush.msra.mxu0 %v549_v27  ;;  %741 = vmatpush.msra.mxu2 %v580_v29  ;;  %v561_v44 = vld [vmem:[%s1453_s11 + $0xa8] sm:$0xff]  ;;  %v544_v47 = vld [vmem:[%s1453_s11 + $0x20] sm:$0xff]  ;;  %v575_v49 = vld [vmem:[%s1453_s11 + $0x118] sm:$0xff] }
  0x7f   : > { %675 = vmatpush.msra.mxu1 %v565_v28  ;;  %806 = vmatpush.msra.mxu3 %v596_v30  ;;  %v560_v48 = vld [vmem:[%s1453_s11 + $0xa0] sm:$0xff]  ;;  %v591_v50 = vld [vmem:[%s1453_s11 + $0x198] sm:$0xff]  ;;  %v574_v53 = vld [vmem:[%s1453_s11 + $0x110] sm:$0xff] }
  0x80   : > { %611 = vmatpush.msra.mxu0 %v548_v31  ;;  %742 = vmatpush.msra.mxu2 %v579_v33  ;;  %v543_v51 = vld [vmem:[%s1453_s11 + $0x18] sm:$0xff]  ;;  %v590_v54 = vld [vmem:[%s1453_s11 + $0x190] sm:$0xff]  ;;  %v573_v57 = vld [vmem:[%s1453_s11 + $0x108] sm:$0xff] }
  0x81   : > { %676 = vmatpush.msra.mxu1 %v564_v32  ;;  %807 = vmatpush.msra.mxu3 %v595_v34  ;;  %v559_v52 = vld [vmem:[%s1453_s11 + $0x98] sm:$0xff]  ;;  %v542_v55 = vld [vmem:[%s1453_s11 + $0x10] sm:$0xff]  ;;  %v589_v58 = vld [vmem:[%s1453_s11 + $0x188] sm:$0xff] }
  0x82   : > { %612 = vmatpush.msra.mxu0 %v547_v35  ;;  %743 = vmatpush.msra.mxu2 %v578_v37  ;;  %v558_v56 = vld [vmem:[%s1453_s11 + $0x90] sm:$0xff]  ;;  %v541_v59 = vld [vmem:[%s1453_s11 + $0x8] sm:$0xff]  ;;  %v572_v61 = vld [vmem:[%s1453_s11 + $0x100] sm:$0xff] }
  0x83   : > { %677 = vmatpush.msra.mxu1 %v563_v36  ;;  %808 = vmatpush.msra.mxu3 %v594_v38  ;;  %v557_v60 = vld [vmem:[%s1453_s11 + $0x88] sm:$0xff]  ;;  %v588_v62 = vld [vmem:[%s1453_s11 + $0x180] sm:$0xff]  ;;  %v478_v63 = vld [vmem:[%s1455_s12 + $0x10] sm:$0xff] }
  0x84   : > { %613 = vmatpush.msra.mxu0 %v546_v39  ;;  %744 = vmatpush.msra.mxu2 %v577_v41  ;;  %v479_v0 = vld [vmem:[%s1455_s12 + $0x18] sm:$0xff]  ;;  %v540_v1 = vld [vmem:[%s1453_s11] sm:$0xff]  ;;  %v477_v4 = vld [vmem:[%s1455_s12 + $0x8] sm:$0xff] }
  0x85   : > { %678 = vmatpush.msra.mxu1 %v562_v40  ;;  %809 = vmatpush.msra.mxu3 %v593_v42  ;;  %v556_v2 = vld [vmem:[%s1453_s11 + $0x80] sm:$0xff]  ;;  %v482_v5 = vld [vmem:[%s1455_s12 + $0x30] sm:$0xff]  ;;  %v483_v6 = vld [vmem:[%s1455_s12 + $0x38] sm:$0xff] }
  0x86   : > { %614 = vmatpush.msra.mxu0 %v545_v43  ;;  %745 = vmatpush.msra.mxu2 %v576_v45  ;;  %v476_v3 = vld [vmem:[%s1455_s12] sm:$0xff]  ;;  %v481_v8 = vld [vmem:[%s1455_s12 + $0x28] sm:$0xff]  ;;  %v486_v9 = vld [vmem:[%s1455_s12 + $0x50] sm:$0xff] }
  0x87   : > { %679 = vmatpush.msra.mxu1 %v561_v44  ;;  %810 = vmatpush.msra.mxu3 %v592_v46  ;;  %v480_v7 = vld [vmem:[%s1455_s12 + $0x20] sm:$0xff]  ;;  %v487_v10 = vld [vmem:[%s1455_s12 + $0x58] sm:$0xff]  ;;  %v485_v12 = vld [vmem:[%s1455_s12 + $0x48] sm:$0xff] }
  0x88   : > { %615 = vmatpush.msra.mxu0 %v544_v47  ;;  %746 = vmatpush.msra.mxu2 %v575_v49  ;;  %v484_v11 = vld [vmem:[%s1455_s12 + $0x40] sm:$0xff]  ;;  %v490_v13 = vld [vmem:[%s1455_s12 + $0x70] sm:$0xff]  ;;  %v491_v14 = vld [vmem:[%s1455_s12 + $0x78] sm:$0xff] }
  0x89   : > { %680 = vmatpush.msra.mxu1 %v560_v48  ;;  %811 = vmatpush.msra.mxu3 %v591_v50  ;;  %v488_v15 = vld [vmem:[%s1455_s12 + $0x60] sm:$0xff]  ;;  %v489_v16 = vld [vmem:[%s1455_s12 + $0x68] sm:$0xff]  ;;  %v494_v17 = vld [vmem:[%s1455_s12 + $0x90] sm:$0xff] }
  0x8a   : > { %616 = vmatpush.msra.mxu0 %v543_v51  ;;  %747 = vmatpush.msra.mxu2 %v574_v53  ;;  %v495_v18 = vld [vmem:[%s1455_s12 + $0x98] sm:$0xff]  ;;  %v492_v19 = vld [vmem:[%s1455_s12 + $0x80] sm:$0xff]  ;;  %v493_v20 = vld [vmem:[%s1455_s12 + $0x88] sm:$0xff] }
  0x8b   : > { %681 = vmatpush.msra.mxu1 %v559_v52  ;;  %812 = vmatpush.msra.mxu3 %v590_v54  ;;  %v498_v21 = vld [vmem:[%s1455_s12 + $0xb0] sm:$0xff]  ;;  %v499_v22 = vld [vmem:[%s1455_s12 + $0xb8] sm:$0xff]  ;;  %v496_v23 = vld [vmem:[%s1455_s12 + $0xa0] sm:$0xff] }
  0x8c   : > { %617 = vmatpush.msra.mxu0 %v542_v55  ;;  %748 = vmatpush.msra.mxu2 %v573_v57  ;;  %v497_v24 = vld [vmem:[%s1455_s12 + $0xa8] sm:$0xff]  ;;  %v502_v25 = vld [vmem:[%s1455_s12 + $0xd0] sm:$0xff]  ;;  %v503_v26 = vld [vmem:[%s1455_s12 + $0xd8] sm:$0xff] }
  0x8d   : > { %682 = vmatpush.msra.mxu1 %v558_v56  ;;  %813 = vmatpush.msra.mxu3 %v589_v58  ;;  %v500_v27 = vld [vmem:[%s1455_s12 + $0xc0] sm:$0xff]  ;;  %v501_v28 = vld [vmem:[%s1455_s12 + $0xc8] sm:$0xff]  ;;  %v506_v29 = vld [vmem:[%s1455_s12 + $0xf0] sm:$0xff] }
  0x8e   : > { %618 = vmatpush.msra.mxu0 %v541_v59  ;;  %749 = vmatpush.msra.mxu2 %v572_v61  ;;  %v507_v30 = vld [vmem:[%s1455_s12 + $0xf8] sm:$0xff]  ;;  %v504_v31 = vld [vmem:[%s1455_s12 + $0xe0] sm:$0xff]  ;;  %v505_v32 = vld [vmem:[%s1455_s12 + $0xe8] sm:$0xff] }
  0x8f   : > { %683 = vmatpush.msra.mxu1 %v557_v60  ;;  %814 = vmatpush.msra.mxu3 %v588_v62  ;;  %v510_v33 = vld [vmem:[%s1455_s12 + $0x110] sm:$0xff]  ;;  %v511_v34 = vld [vmem:[%s1455_s12 + $0x118] sm:$0xff]  ;;  %v508_v35 = vld [vmem:[%s1455_s12 + $0x100] sm:$0xff] }
  0x90   : > { %750 = vmatmul.f32.vlgmr.msra.gmra.mxu2 %v478_v63  ;;  %815 = vmatmul.f32.vlgmr.msra.gmra.mxu3 %v479_v0  ;;  %v509_v36 = vld [vmem:[%s1455_s12 + $0x108] sm:$0xff]  ;;  %v514_v37 = vld [vmem:[%s1455_s12 + $0x130] sm:$0xff]  ;;  %v515_v38 = vld [vmem:[%s1455_s12 + $0x138] sm:$0xff] }
  0x91   : > { %619 = vmatpush.msra.mxu0 %v540_v1  ;;  %684 = vmatpush.msra.mxu1 %v556_v2  ;;  %v512_v39 = vld [vmem:[%s1455_s12 + $0x120] sm:$0xff]  ;;  %v513_v40 = vld [vmem:[%s1455_s12 + $0x128] sm:$0xff]  ;;  %v518_v41 = vld [vmem:[%s1455_s12 + $0x150] sm:$0xff] }
  0x92   : > { %620 = vmatmul.f32.vlgmr.msra.gmra.mxu0 %v476_v3  ;;  %685 = vmatmul.f32.vlgmr.msra.gmra.mxu1 %v477_v4  ;;  %v519_v42 = vld [vmem:[%s1455_s12 + $0x158] sm:$0xff]  ;;  %v516_v43 = vld [vmem:[%s1455_s12 + $0x140] sm:$0xff]  ;;  %v517_v44 = vld [vmem:[%s1455_s12 + $0x148] sm:$0xff] }
  0x93   : > { %v522_v45 = vld [vmem:[%s1455_s12 + $0x170] sm:$0xff]  ;;  %v523_v46 = vld [vmem:[%s1455_s12 + $0x178] sm:$0xff]  ;;  %v520_v47 = vld [vmem:[%s1455_s12 + $0x160] sm:$0xff] }
  0x94   : > { %v521_v48 = vld [vmem:[%s1455_s12 + $0x168] sm:$0xff]  ;;  %v526_v49 = vld [vmem:[%s1455_s12 + $0x190] sm:$0xff]  ;;  %v527_v50 = vld [vmem:[%s1455_s12 + $0x198] sm:$0xff] }
  0x95   : > { %v524_v51 = vld [vmem:[%s1455_s12 + $0x180] sm:$0xff]  ;;  %v525_v52 = vld [vmem:[%s1455_s12 + $0x188] sm:$0xff]  ;;  %v530_v53 = vld [vmem:[%s1455_s12 + $0x1b0] sm:$0xff] }
  0x96   : > { %v531_v54 = vld [vmem:[%s1455_s12 + $0x1b8] sm:$0xff]  ;;  %v528_v55 = vld [vmem:[%s1455_s12 + $0x1a0] sm:$0xff]  ;;  %v529_v56 = vld [vmem:[%s1455_s12 + $0x1a8] sm:$0xff] }
  0x97   : > { %v534_v57 = vld [vmem:[%s1455_s12 + $0x1d0] sm:$0xff]  ;;  %v535_v58 = vld [vmem:[%s1455_s12 + $0x1d8] sm:$0xff]  ;;  %v532_v59 = vld [vmem:[%s1455_s12 + $0x1c0] sm:$0xff] }
  0x98   : > { %753 = vmatmul.f32.gmra.mxu2 %v482_v5  ;;  %818 = vmatmul.f32.gmra.mxu3 %v483_v6  ;;  %v533_v60 = vld [vmem:[%s1455_s12 + $0x1c8] sm:$0xff]  ;;  %v538_v61 = vld [vmem:[%s1455_s12 + $0x1f0] sm:$0xff]  ;;  %v539_v62 = vld [vmem:[%s1455_s12 + $0x1f8] sm:$0xff] }
  0x99   : > { %v536_v63 = vld [vmem:[%s1455_s12 + $0x1e0] sm:$0xff]  ;;  %v537_v0 = vld [vmem:[%s1455_s12 + $0x1e8] sm:$0xff] }
  0x9a   : > { %623 = vmatmul.f32.gmra.mxu0 %v480_v7  ;;  %688 = vmatmul.f32.gmra.mxu1 %v481_v8  ;;  %v460_v7 = vld [vmem:[#allocation2 + $0x30] sm:$0xff] }
  0xa0   : > { %756 = vmatmul.f32.gmra.mxu2 %v486_v9  ;;  %821 = vmatmul.f32.gmra.mxu3 %v487_v10 }
  0xa2   : > { %626 = vmatmul.f32.gmra.mxu0 %v484_v11  ;;  %691 = vmatmul.f32.gmra.mxu1 %v485_v12 }
  0xa8   : > { %759 = vmatmul.f32.gmra.mxu2 %v490_v13  ;;  %824 = vmatmul.f32.gmra.mxu3 %v491_v14 }
  0xaa   : > { %629 = vmatmul.f32.gmra.mxu0 %v488_v15  ;;  %694 = vmatmul.f32.gmra.mxu1 %v489_v16  ;;  %v461_v16 = vld [vmem:[#allocation2] sm:$0xff] }
  0xb0   : > { %762 = vmatmul.f32.gmra.mxu2 %v494_v17  ;;  %827 = vmatmul.f32.gmra.mxu3 %v495_v18 }
  0xb2   : > { %632 = vmatmul.f32.gmra.mxu0 %v492_v19  ;;  %697 = vmatmul.f32.gmra.mxu1 %v493_v20 }
  0xb8   : > { %765 = vmatmul.f32.gmra.mxu2 %v498_v21  ;;  %830 = vmatmul.f32.gmra.mxu3 %v499_v22 }
  0xba   : > { %635 = vmatmul.f32.gmra.mxu0 %v496_v23  ;;  %700 = vmatmul.f32.gmra.mxu1 %v497_v24 }
  0xc0   : > { %768 = vmatmul.f32.gmra.mxu2 %v502_v25  ;;  %833 = vmatmul.f32.gmra.mxu3 %v503_v26  ;;  %v462_v25 = vld [vmem:[#allocation2 + $0x58] sm:$0xff] }
  0xc2   : > { %638 = vmatmul.f32.gmra.mxu0 %v500_v27  ;;  %703 = vmatmul.f32.gmra.mxu1 %v501_v28 }
  0xc8   : > { %771 = vmatmul.f32.gmra.mxu2 %v506_v29  ;;  %836 = vmatmul.f32.gmra.mxu3 %v507_v30 }
  0xca   : > { %641 = vmatmul.f32.gmra.mxu0 %v504_v31  ;;  %706 = vmatmul.f32.gmra.mxu1 %v505_v32 }
  0xd0   : > { %774 = vmatmul.f32.gmra.mxu2 %v510_v33  ;;  %839 = vmatmul.f32.gmra.mxu3 %v511_v34  ;;  %v463_v34 = vld [vmem:[#allocation2 + $0x18] sm:$0xff] }
  0xd2   : > { %644 = vmatmul.f32.gmra.mxu0 %v508_v35  ;;  %709 = vmatmul.f32.gmra.mxu1 %v509_v36 }
  0xd8   : > { %777 = vmatmul.f32.gmra.mxu2 %v514_v37  ;;  %842 = vmatmul.f32.gmra.mxu3 %v515_v38 }
  0xda   : > { %647 = vmatmul.f32.gmra.mxu0 %v512_v39  ;;  %712 = vmatmul.f32.gmra.mxu1 %v513_v40 }
  0xe0   : > { %780 = vmatmul.f32.gmra.mxu2 %v518_v41  ;;  %845 = vmatmul.f32.gmra.mxu3 %v519_v42 }
  0xe2   : > { %650 = vmatmul.f32.gmra.mxu0 %v516_v43  ;;  %715 = vmatmul.f32.gmra.mxu1 %v517_v44  ;;  %v464_v43 = vld [vmem:[#allocation2 + $0x50] sm:$0xff] }
  0xe8   : > { %783 = vmatmul.f32.gmra.mxu2 %v522_v45  ;;  %848 = vmatmul.f32.gmra.mxu3 %v523_v46 }
  0xea   : > { %653 = vmatmul.f32.gmra.mxu0 %v520_v47  ;;  %718 = vmatmul.f32.gmra.mxu1 %v521_v48 }
  0xf0   : > { %786 = vmatmul.f32.gmra.mxu2 %v526_v49  ;;  %851 = vmatmul.f32.gmra.mxu3 %v527_v50 }
  0xf2   : > { %656 = vmatmul.f32.gmra.mxu0 %v524_v51  ;;  %721 = vmatmul.f32.gmra.mxu1 %v525_v52  ;;  %v465_v52 = vld [vmem:[#allocation2 + $0x68] sm:$0xff] }
  0xf8   : > { %789 = vmatmul.f32.gmra.mxu2 %v530_v53  ;;  %854 = vmatmul.f32.gmra.mxu3 %v531_v54 }
  0xfa   : > { %659 = vmatmul.f32.gmra.mxu0 %v528_v55  ;;  %724 = vmatmul.f32.gmra.mxu1 %v529_v56 }
 0x100   : > { %792 = vmatmul.f32.gmra.mxu2 %v534_v57  ;;  %857 = vmatmul.f32.gmra.mxu3 %v535_v58 }
 0x102   : > { %662 = vmatmul.f32.gmra.mxu0 %v532_v59  ;;  %727 = vmatmul.f32.gmra.mxu1 %v533_v60 }
 0x108   : > { %795 = vmatmul.f32.gmra.mxu2 %v538_v61  ;;  %860 = vmatmul.f32.gmra.mxu3 %v539_v62  ;;  %v466_v61 = vld [vmem:[#allocation2 + $0x8] sm:$0xff] }
 0x10a   : > { %665 = vmatmul.f32.gmra.mxu0 %v536_v63  ;;  %730 = vmatmul.f32.gmra.mxu1 %v537_v0 }
 0x10f   : > { %v621_v1 = vpop.f32.mrf.mxu0  ;;  %v686_v2 = vpop.f32.mrf.mxu1 }
 0x110   : > { %v687_v3 = vadd.f32 %v686_v2, %v621_v1 }
 0x113   : > { %v751_v4 = vpop.f32.mrf.mxu2  ;;  %v816_v5 = vpop.f32.mrf.mxu3 }
 0x114   : > { %v752_v6 = vadd.f32 %v751_v4, %v687_v3 }
 0x116   : > { %v817_v8 = vadd.f32 %v816_v5, %v752_v6  ;;  %v467_v6 = vld [vmem:[#allocation2 + $0x48] sm:$0xff] }
 0x117   : > { %v624_v9 = vpop.f32.mrf.mxu0  ;;  %v689_v10 = vpop.f32.mrf.mxu1 }
 0x118   : > { %v864_v11 = vadd.f32 %v817_v8, %v460_v7  ;;  %v690_v12 = vadd.f32 %v689_v10, %v624_v9 }
 0x11a   : > { %880 = vst [vmem:[#allocation2 + $0x30] sm:$0xff] %v864_v11 }
 0x11b   : > { %v754_v13 = vpop.f32.mrf.mxu2  ;;  %v819_v14 = vpop.f32.mrf.mxu3 }
 0x11c   : > { %v755_v15 = vadd.f32 %v754_v13, %v690_v12 }
 0x11e   : > { %v820_v17 = vadd.f32 %v819_v14, %v755_v15  ;;  %v468_v15 = vld [vmem:[#allocation2 + $0x40] sm:$0xff] }
 0x11f   : > { %v627_v18 = vpop.f32.mrf.mxu0  ;;  %v692_v19 = vpop.f32.mrf.mxu1 }
 0x120   : > { %v865_v20 = vadd.f32 %v820_v17, %v461_v16  ;;  %v693_v21 = vadd.f32 %v692_v19, %v627_v18 }
 0x122   : > { %881 = vst [vmem:[#allocation2] sm:$0xff] %v865_v20 }
 0x123   : > { %v757_v22 = vpop.f32.mrf.mxu2  ;;  %v822_v23 = vpop.f32.mrf.mxu3 }
 0x124   : > { %v758_v24 = vadd.f32 %v757_v22, %v693_v21 }
 0x126   : > { %v823_v26 = vadd.f32 %v822_v23, %v758_v24  ;;  %v469_v24 = vld [vmem:[#allocation2 + $0x20] sm:$0xff] }
 0x127   : > { %v630_v27 = vpop.f32.mrf.mxu0  ;;  %v695_v28 = vpop.f32.mrf.mxu1 }
 0x128   : > { %v866_v29 = vadd.f32 %v823_v26, %v462_v25  ;;  %v696_v30 = vadd.f32 %v695_v28, %v630_v27 }
 0x12a   : > { %882 = vst [vmem:[#allocation2 + $0x58] sm:$0xff] %v866_v29 }
 0x12b   : > { %v760_v31 = vpop.f32.mrf.mxu2  ;;  %v825_v32 = vpop.f32.mrf.mxu3 }
 0x12c   : > { %v761_v33 = vadd.f32 %v760_v31, %v696_v30 }
 0x12e   : > { %v826_v35 = vadd.f32 %v825_v32, %v761_v33  ;;  %v470_v33 = vld [vmem:[#allocation2 + $0x10] sm:$0xff] }
 0x12f   : > { %v633_v36 = vpop.f32.mrf.mxu0  ;;  %v698_v37 = vpop.f32.mrf.mxu1 }
 0x130   : > { %v867_v38 = vadd.f32 %v826_v35, %v463_v34  ;;  %v699_v39 = vadd.f32 %v698_v37, %v633_v36 }
 0x132   : > { %883 = vst [vmem:[#allocation2 + $0x18] sm:$0xff] %v867_v38 }
 0x133   : > { %v763_v40 = vpop.f32.mrf.mxu2  ;;  %v828_v41 = vpop.f32.mrf.mxu3 }
 0x134   : > { %v764_v42 = vadd.f32 %v763_v40, %v699_v39 }
 0x136   : > { %v829_v44 = vadd.f32 %v828_v41, %v764_v42  ;;  %v471_v42 = vld [vmem:[#allocation2 + $0x38] sm:$0xff] }
 0x137   : > { %v636_v45 = vpop.f32.mrf.mxu0  ;;  %v701_v46 = vpop.f32.mrf.mxu1 }
 0x138   : > { %v868_v47 = vadd.f32 %v829_v44, %v464_v43  ;;  %v702_v48 = vadd.f32 %v701_v46, %v636_v45 }
 0x13a   : > { %884 = vst [vmem:[#allocation2 + $0x50] sm:$0xff] %v868_v47 }
 0x13b   : > { %v766_v49 = vpop.f32.mrf.mxu2  ;;  %v831_v50 = vpop.f32.mrf.mxu3 }
 0x13c   : > { %v767_v51 = vadd.f32 %v766_v49, %v702_v48 }
 0x13e   : > { %v832_v53 = vadd.f32 %v831_v50, %v767_v51  ;;  %v472_v51 = vld [vmem:[#allocation2 + $0x60] sm:$0xff] }
 0x13f   : > { %v639_v54 = vpop.f32.mrf.mxu0  ;;  %v704_v55 = vpop.f32.mrf.mxu1 }
 0x140   : > { %v869_v56 = vadd.f32 %v832_v53, %v465_v52  ;;  %v705_v57 = vadd.f32 %v704_v55, %v639_v54 }
 0x142   : > { %885 = vst [vmem:[#allocation2 + $0x68] sm:$0xff] %v869_v56 }
 0x143   : > { %v769_v58 = vpop.f32.mrf.mxu2  ;;  %v834_v59 = vpop.f32.mrf.mxu3 }
 0x144   : > { %v770_v60 = vadd.f32 %v769_v58, %v705_v57 }
 0x146   : > { %v835_v62 = vadd.f32 %v834_v59, %v770_v60  ;;  %v473_v60 = vld [vmem:[#allocation2 + $0x70] sm:$0xff] }
 0x147   : > { %v642_v63 = vpop.f32.mrf.mxu0  ;;  %v707_v0 = vpop.f32.mrf.mxu1 }
 0x148   : > { %v870_v1 = vadd.f32 %v835_v62, %v466_v61  ;;  %v708_v2 = vadd.f32 %v707_v0, %v642_v63 }
 0x14a   : > { %886 = vst [vmem:[#allocation2 + $0x8] sm:$0xff] %v870_v1 }
 0x14b   : > { %v772_v3 = vpop.f32.mrf.mxu2  ;;  %v837_v4 = vpop.f32.mrf.mxu3 }
 0x14c   : > { %v773_v5 = vadd.f32 %v772_v3, %v708_v2 }
 0x14e   : > { %v838_v7 = vadd.f32 %v837_v4, %v773_v5  ;;  %v474_v5 = vld [vmem:[#allocation2 + $0x78] sm:$0xff] }
 0x14f   : > { %v645_v8 = vpop.f32.mrf.mxu0  ;;  %v710_v9 = vpop.f32.mrf.mxu1 }
 0x150   : > { %v871_v10 = vadd.f32 %v838_v7, %v467_v6  ;;  %v711_v11 = vadd.f32 %v710_v9, %v645_v8 }
 0x152   : > { %887 = vst [vmem:[#allocation2 + $0x48] sm:$0xff] %v871_v10 }
 0x153   : > { %v775_v12 = vpop.f32.mrf.mxu2  ;;  %v840_v13 = vpop.f32.mrf.mxu3 }
 0x154   : > { %v776_v14 = vadd.f32 %v775_v12, %v711_v11 }
 0x156   : > { %v841_v16 = vadd.f32 %v840_v13, %v776_v14  ;;  %v475_v14 = vld [vmem:[#allocation2 + $0x28] sm:$0xff] }
 0x157   : > { %v648_v17 = vpop.f32.mrf.mxu0  ;;  %v713_v18 = vpop.f32.mrf.mxu1 }
 0x158   : > { %v872_v19 = vadd.f32 %v841_v16, %v468_v15  ;;  %v714_v20 = vadd.f32 %v713_v18, %v648_v17 }
 0x15a   : > { %888 = vst [vmem:[#allocation2 + $0x40] sm:$0xff] %v872_v19 }
 0x15b   : > { %v778_v21 = vpop.f32.mrf.mxu2  ;;  %v843_v22 = vpop.f32.mrf.mxu3 }
 0x15c   : > { %v779_v23 = vadd.f32 %v778_v21, %v714_v20 }
 0x15e   : > { %v844_v25 = vadd.f32 %v843_v22, %v779_v23 }
 0x15f   : > { %v651_v26 = vpop.f32.mrf.mxu0  ;;  %v716_v27 = vpop.f32.mrf.mxu1 }
 0x160   : > { %v873_v28 = vadd.f32 %v844_v25, %v469_v24  ;;  %v717_v29 = vadd.f32 %v716_v27, %v651_v26 }
 0x162   : > { %889 = vst [vmem:[#allocation2 + $0x20] sm:$0xff] %v873_v28 }
 0x163   : > { %v781_v30 = vpop.f32.mrf.mxu2  ;;  %v846_v31 = vpop.f32.mrf.mxu3 }
 0x164   : > { %v782_v32 = vadd.f32 %v781_v30, %v717_v29 }
 0x166   : > { %v847_v34 = vadd.f32 %v846_v31, %v782_v32 }
 0x167   : > { %v654_v35 = vpop.f32.mrf.mxu0  ;;  %v719_v36 = vpop.f32.mrf.mxu1 }
 0x168   : > { %v874_v37 = vadd.f32 %v847_v34, %v470_v33  ;;  %v720_v38 = vadd.f32 %v719_v36, %v654_v35 }
 0x16a   : > { %890 = vst [vmem:[#allocation2 + $0x10] sm:$0xff] %v874_v37 }
 0x16b   : > { %v784_v39 = vpop.f32.mrf.mxu2  ;;  %v849_v40 = vpop.f32.mrf.mxu3 }
 0x16c   : > { %v785_v41 = vadd.f32 %v784_v39, %v720_v38 }
 0x16e   : > { %v850_v43 = vadd.f32 %v849_v40, %v785_v41 }
 0x16f   : > { %v657_v44 = vpop.f32.mrf.mxu0  ;;  %v722_v45 = vpop.f32.mrf.mxu1 }
 0x170   : > { %v875_v46 = vadd.f32 %v850_v43, %v471_v42  ;;  %v723_v47 = vadd.f32 %v722_v45, %v657_v44 }
 0x172   : > { %891 = vst [vmem:[#allocation2 + $0x38] sm:$0xff] %v875_v46 }
 0x173   : > { %v787_v48 = vpop.f32.mrf.mxu2  ;;  %v852_v49 = vpop.f32.mrf.mxu3 }
 0x174   : > { %v788_v50 = vadd.f32 %v787_v48, %v723_v47 }
 0x176   : > { %v853_v52 = vadd.f32 %v852_v49, %v788_v50 }
 0x177   : > { %v660_v53 = vpop.f32.mrf.mxu0  ;;  %v725_v54 = vpop.f32.mrf.mxu1 }
 0x178   : > { %v876_v55 = vadd.f32 %v853_v52, %v472_v51  ;;  %v726_v56 = vadd.f32 %v725_v54, %v660_v53 }
 0x17a   : > { %892 = vst [vmem:[#allocation2 + $0x60] sm:$0xff] %v876_v55 }
 0x17b   : > { %v790_v57 = vpop.f32.mrf.mxu2  ;;  %v855_v58 = vpop.f32.mrf.mxu3 }
 0x17c   : > { %v791_v59 = vadd.f32 %v790_v57, %v726_v56 }
 0x17e   : > { %v856_v61 = vadd.f32 %v855_v58, %v791_v59 }
 0x17f   : > { %v663_v62 = vpop.f32.mrf.mxu0  ;;  %v728_v63 = vpop.f32.mrf.mxu1 }
 0x180   : > { %v877_v0 = vadd.f32 %v856_v61, %v473_v60  ;;  %v729_v1 = vadd.f32 %v728_v63, %v663_v62 }
 0x182   : > { %893 = vst [vmem:[#allocation2 + $0x70] sm:$0xff] %v877_v0 }
 0x183   : > { %v793_v2 = vpop.f32.mrf.mxu2  ;;  %v858_v3 = vpop.f32.mrf.mxu3 }
 0x184   : > { %v794_v4 = vadd.f32 %v793_v2, %v729_v1 }
 0x186   : > { %v859_v6 = vadd.f32 %v858_v3, %v794_v4 }
 0x187   : > { %v666_v7 = vpop.f32.mrf.mxu0  ;;  %v731_v8 = vpop.f32.mrf.mxu1 }
 0x188   : > { %v878_v9 = vadd.f32 %v859_v6, %v474_v5  ;;  %v732_v10 = vadd.f32 %v731_v8, %v666_v7 }
 0x18a   : > { %894 = vst [vmem:[#allocation2 + $0x78] sm:$0xff] %v878_v9 }
 0x18b   : > { %v796_v11 = vpop.f32.mrf.mxu2  ;;  %v861_v12 = vpop.f32.mrf.mxu3 }
 0x18c   : > { %v797_v13 = vadd.f32 %v796_v11, %v732_v10 }
 0x18e   : > { %v862_v15 = vadd.f32 %v861_v12, %v797_v13  ;;  %899 = sbr.rel (%p1156_p11) target bundleno = 429 (0x1ad), region = 67 }
 0x190   : > { %v879_v16 = vadd.f32 %v862_v15, %v475_v14 }
 0x192   : > { %895 = vst [vmem:[#allocation2 + $0x28] sm:$0xff] %v879_v16 }
 0x193   : > { %v900_v17 = vld [vmem:[#allocation2 + $0x30] sm:$0xff]  ;;  %v1590_v18 = vld [vmem:[%s1694_s2] ss:$0 sm:$0xff]  ;;  %v902_v23 = vld [vmem:[#allocation2 + $0x58] sm:$0xff] }
 0x194   : > { %v1595_v19 = vld [vmem:[%s1695_s3] ss:$0 sm:$0xff]  ;;  %v920_v21 = vmul.f32 %v1590_v18, %v900_v17  ;;  %v903_v24 = vld [vmem:[#allocation2 + $0x18] sm:$0xff]  ;;  %v904_v25 = vld [vmem:[#allocation2 + $0x50] sm:$0xff]  ;;  %v922_v26 = vmul.f32 %v1590_v18, %v902_v23 }
 0x195   : > { %v901_v20 = vld [vmem:[#allocation2] sm:$0xff]  ;;  %v923_v27 = vmul.f32 %v1590_v18, %v903_v24  ;;  %v924_v28 = vmul.f32 %v1590_v18, %v904_v25  ;;  %v905_v29 = vld [vmem:[#allocation2 + $0x68] sm:$0xff]  ;;  %v910_v49 = vld [vmem:[#allocation2 + $0x10] sm:$0xff] }
 0x196   : > { %v921_v22 = vmul.f32 %v1590_v18, %v901_v20  ;;  %v906_v30 = vld [vmem:[#allocation2 + $0x8] sm:$0xff]  ;;  %v940_v32 = vadd.f32 %v1595_v19, %v920_v21  ;;  %v925_v34 = vmul.f32 %v1590_v18, %v905_v29  ;;  %v942_v36 = vadd.f32 %v1595_v19, %v922_v26  ;;  %v908_v40 = vld [vmem:[#allocation2 + $0x40] sm:$0xff]  ;;  %v911_v58 = vld [vmem:[#allocation2 + $0x38] sm:$0xff] }
 0x197   : > { %v907_v31 = vld [vmem:[#allocation2 + $0x48] sm:$0xff]  ;;  %v926_v35 = vmul.f32 %v1590_v18, %v906_v30  ;;  %v943_v37 = vadd.f32 %v1595_v19, %v923_v27  ;;  %v944_v38 = vadd.f32 %v1595_v19, %v924_v28  ;;  %v909_v41 = vld [vmem:[#allocation2 + $0x20] sm:$0xff]  ;;  %v928_v56 = vmul.f32 %v1590_v18, %v908_v40  ;;  %v913_v5 = vld [vmem:[#allocation2 + $0x70] sm:$0xff] }
 0x198   : > { %v941_v33 = vadd.f32 %v1595_v19, %v921_v22  ;;  %v927_v39 = vmul.f32 %v1590_v18, %v907_v31  ;;  %vm956_vm0 = vcmp.ge.f32.partialorder %v940_v32, 0.0  ;;  %v972_v42 = vmul.f32 0.2, %v940_v32  ;;  %v912_v4 = vld [vmem:[#allocation2 + $0x60] sm:$0xff]  ;;  %v914_v9 = vld [vmem:[#allocation2 + $0x78] sm:$0xff] }
 0x199   : > { %vm958_vm2 = vcmp.ge.f32.partialorder %v942_v36, 0.0  ;;  %v974_v44 = vmul.f32 0.2, %v942_v36  ;;  %vm959_vm3 = vcmp.ge.f32.partialorder %v943_v37, 0.0  ;;  %v975_v45 = vmul.f32 0.2, %v943_v37 }
 0x19a   : > { %vm957_vm1 = vcmp.ge.f32.partialorder %v941_v33, 0.0  ;;  %v973_v43 = vmul.f32 0.2, %v941_v33  ;;  %v988_v46 = vsel %vm956_vm0, %v940_v32, %v972_v42  ;;  %vm960_vm4 = vcmp.ge.f32.partialorder %v944_v38, 0.0  ;;  %v915_v12 = vld [vmem:[#allocation2 + $0x28] sm:$0xff] }
 0x19b   : > { %v976_v48 = vmul.f32 0.2, %v944_v38  ;;  %1004 = vst [vmem:[%s1696_s4] sm:$0xff] %v988_v46  ;;  %v990_v50 = vsel %vm958_vm2, %v942_v36, %v974_v44  ;;  %v991_v51 = vsel %vm959_vm3, %v943_v37, %v975_v45  ;;  %v945_v52 = vadd.f32 %v1595_v19, %v925_v34 }
 0x19c   : > { %v989_v47 = vsel %vm957_vm1, %v941_v33, %v973_v43  ;;  %v946_v53 = vadd.f32 %v1595_v19, %v926_v35  ;;  %v947_v55 = vadd.f32 %v1595_v19, %v927_v39  ;;  %v929_v57 = vmul.f32 %v1590_v18, %v909_v41  ;;  %1006 = vst [vmem:[%s1696_s4 + $0x10] sm:$0xff] %v990_v50 }
 0x19d   : > { %1005 = vst [vmem:[%s1696_s4 + $0x8] sm:$0xff] %v989_v47  ;;  %v992_v54 = vsel %vm960_vm4, %v944_v38, %v976_v48  ;;  %vm961_vm5 = vcmp.ge.f32.partialorder %v945_v52, 0.0  ;;  %v977_v59 = vmul.f32 0.2, %v945_v52  ;;  %v930_v60 = vmul.f32 %v1590_v18, %v910_v49 }
 0x19e   : > { %vm962_vm6 = vcmp.ge.f32.partialorder %v946_v53, 0.0  ;;  %1007 = vst [vmem:[%s1696_s4 + $0x18] sm:$0xff] %v991_v51  ;;  %v978_v61 = vmul.f32 0.2, %v946_v53  ;;  %vm963_vm7 = vcmp.ge.f32.partialorder %v947_v55, 0.0  ;;  %v948_v63 = vadd.f32 %v1595_v19, %v928_v56 }
 0x19f   : > { %v979_v62 = vmul.f32 0.2, %v947_v55  ;;  %1008 = vst [vmem:[%s1696_s4 + $0x20] sm:$0xff] %v992_v54  ;;  %v993_v0 = vsel %vm961_vm5, %v945_v52, %v977_v59  ;;  %v949_v1 = vadd.f32 %v1595_v19, %v929_v57  ;;  %v950_v2 = vadd.f32 %v1595_v19, %v930_v60 }
 0x1a0   : > { %v931_v3 = vmul.f32 %v1590_v18, %v911_v58  ;;  %1009 = vst [vmem:[%s1696_s4 + $0x28] sm:$0xff] %v993_v0  ;;  %v994_v6 = vsel %vm962_vm6, %v946_v53, %v978_v61  ;;  %vm964_vm8 = vcmp.ge.f32.partialorder %v948_v63, 0.0  ;;  %v980_v8 = vmul.f32 0.2, %v948_v63 }
 0x1a1   : > { %v995_v7 = vsel %vm963_vm7, %v947_v55, %v979_v62  ;;  %1010 = vst [vmem:[%s1696_s4 + $0x30] sm:$0xff] %v994_v6  ;;  %vm965_vm9 = vcmp.ge.f32.partialorder %v949_v1, 0.0  ;;  %v981_v10 = vmul.f32 0.2, %v949_v1  ;;  %vm966_vm10 = vcmp.ge.f32.partialorder %v950_v2, 0.0 }
 0x1a2   : > { %v951_v11 = vadd.f32 %v1595_v19, %v931_v3  ;;  %1011 = vst [vmem:[%s1696_s4 + $0x38] sm:$0xff] %v995_v7  ;;  %v996_v13 = vsel %vm964_vm8, %v948_v63, %v980_v8  ;;  %v982_v14 = vmul.f32 0.2, %v950_v2  ;;  %v932_v15 = vmul.f32 %v1590_v18, %v912_v4 }
 0x1a3   : > { %v933_v16 = vmul.f32 %v1590_v18, %v913_v5  ;;  %1012 = vst [vmem:[%s1696_s4 + $0x40] sm:$0xff] %v996_v13  ;;  %v997_v17 = vsel %vm965_vm9, %v949_v1, %v981_v10  ;;  %v934_v21 = vmul.f32 %v1590_v18, %v914_v9  ;;  %v935_v25 = vmul.f32 %v1590_v18, %v915_v12 }
 0x1a4   : > { %vm967_vm11 = vcmp.ge.f32.partialorder %v951_v11, 0.0  ;;  %v983_v20 = vmul.f32 0.2, %v951_v11  ;;  %1013 = vst [vmem:[%s1696_s4 + $0x48] sm:$0xff] %v997_v17  ;;  %v998_v22 = vsel %vm966_vm10, %v950_v2, %v982_v14  ;;  %v952_v23 = vadd.f32 %v1595_v19, %v932_v15 }
 0x1a5   : > { %v953_v24 = vadd.f32 %v1595_v19, %v933_v16  ;;  %1014 = vst [vmem:[%s1696_s4 + $0x50] sm:$0xff] %v998_v22  ;;  %v954_v27 = vadd.f32 %v1595_v19, %v934_v21  ;;  %v955_v29 = vadd.f32 %v1595_v19, %v935_v25 }
 0x1a6   : > { %v999_v26 = vsel %vm967_vm11, %v951_v11, %v983_v20  ;;  %vm968_vm12 = vcmp.ge.f32.partialorder %v952_v23, 0.0  ;;  %v984_v28 = vmul.f32 0.2, %v952_v23 }
 0x1a7   : > { %1015 = vst [vmem:[%s1696_s4 + $0x58] sm:$0xff] %v999_v26  ;;  %vm969_vm13 = vcmp.ge.f32.partialorder %v953_v24, 0.0  ;;  %v985_v30 = vmul.f32 0.2, %v953_v24  ;;  %vm970_vm14 = vcmp.ge.f32.partialorder %v954_v27, 0.0  ;;  %vm971_vm15 = vcmp.ge.f32.partialorder %v955_v29, 0.0 }
 0x1a8   : > { %v986_v31 = vmul.f32 0.2, %v954_v27  ;;  %v1000_v18 = vsel %vm968_vm12, %v952_v23, %v984_v28  ;;  %v987_v32 = vmul.f32 0.2, %v955_v29 }
 0x1a9   : > { %1016 = vst [vmem:[%s1696_s4 + $0x60] sm:$0xff] %v1000_v18  ;;  %v1001_v33 = vsel %vm969_vm13, %v953_v24, %v985_v30 }
 0x1aa   : > { %v1002_v34 = vsel %vm970_vm14, %v954_v27, %v986_v31  ;;  %1017 = vst [vmem:[%s1696_s4 + $0x68] sm:$0xff] %v1001_v33  ;;  %v1003_v35 = vsel %vm971_vm15, %v955_v29, %v987_v32 }
 0x1ab   : > { %1018 = vst [vmem:[%s1696_s4 + $0x70] sm:$0xff] %v1002_v34 }
 0x1ac   : > { %1019 = vst [vmem:[%s1696_s4 + $0x78] sm:$0xff] %v1003_v35 }
 0x1ad PF: > { %s14_s19 = sadd.s32 1, %s1243_s19   ;;  %s1697_s15 = smov %s1231_s16 }
 0x1ae   : > { %p11_p12 = scmp.ge.s32.totalorder %s14_s19, 4   ;;  %s1698_s16 = smov %s1306_s23 }
 0x1af   : > { %s1699_s17 = smov %s1239_s18  ;;  %s1700_s18 = smov %s1702_s20 }
 0x1b0   :  { %13 = sbr.rel (!%p11_p12) target bundleno = 3 (0x3), region = 111 }

// kernel: discriminator_forward.6
= control target key start
LH: loop header
LB: loop body
LE: loop exit
PB: predicated region body
PF: predicated region fallthrough
CT: control target
= control target key end

     0   :  { %s1114_s15 = smov 0   ;;  %s1116_s16 = smov 0   ;;  %s1429_s0 = inlined_call_operand.vmem [shape: f32[32,2048], index: 0, kind: input, shape index: {}]   ;;  %s1430_s1 = inlined_call_operand.vmem [shape: f32[2048,256], index: 1, kind: input, shape index: {}]   ;;  %s1431_s2 = inlined_call_operand.vmem [shape: f32[1,256], index: 2, kind: input, shape index: {}]   ;;  %s1432_s3 = inlined_call_operand.vmem [shape: f32[1,256], index: 3, kind: input, shape index: {}]   ;;  %s1433_s4 = inlined_call_operand.vmem [shape: f32[32,256], index: 4, kind: output, shape index: {}]  }
   0x1   :  { %s1118_s17 = smov 0   ;;  %s1120_s18 = smov 0  }
   0x2   :  { %s1122_s19 = smov 0  }
   0x3 LB: > { %s26_s20 = sadd.s32 1, %s1082_s18  ;;  %p49_p1 = scmp.ne.s32.totalorder %s1074_s16, %s1070_s15  ;;  %s1086_s19 = sphi %s1122_s19, %s14_s19   ;;  %s1082_s18 = sphi %s1120_s18, %s1437_s18   ;;  %s1078_s17 = sphi %s1118_s17, %s1436_s17   ;;  %s1074_s16 = sphi %s1116_s16, %s1435_s16   ;;  %s1070_s15 = sphi %s1114_s15, %s1434_s15  }
   0x4   : > { %p27_p0 = scmp.ge.s32.totalorder %s26_s20, 4  ;;  %p50_p2 = scmp.eq.s32.totalorder %s1086_s19, 0 }
   0x5   : > { %s42_s22 = sadd.s32 1, %s1074_s16  ;;  %p990_p5 = scmp.ge.s32.totalorder %s1086_s19, 4 }
   0x6   : > { %s1439_s20 = smov (%p27_p0, %s26_s20), 0  ;;  %p51_p3 = por %p50_p2, %p49_p1 }
   0x7   : > { %s38_s21 = ssub.s32 %s1082_s18, %s1439_s20  ;;  %199 = sbr.rel (%p990_p5) target bundleno = 32 (0x20), region = 24 }
   0x8   : > { %p40_p4 = scmp.eq.s32.totalorder %s38_s21, 0 }
   0xa   : > { %s1149_s23 = scalar_select %p40_p4, %s1074_s16, %s42_s22  }
   0xc   : > { %202 = sbr.rel (!%p51_p3) target bundleno = 32 (0x20), region = 28  ;;  %s204_s24 = sand.u32 (%p51_p3), 1, %s1074_s16  }
   0xd   : > { %s1005_s25 = sshll.u32 (%p51_p3), %s1082_s18, 5  ;;  %s991_s26 = sshll.u32 (%p51_p3), %s204_s24, 7 }
   0xe   : > { %s1157_s29 = scalar_lea.vmem (%p51_p3), %s1429_s0, %s1005_s25  ;;  %s206_s30 = scalar_lea.vmem (%p51_p3), [#allocation3], %s991_s26 }
   0xf   : > { %v225_v0 = vld [vmem:[%s1157_s29] sm:$0xff] (%p51_p3)  ;;  %v227_v1 = vld [vmem:[%s1157_s29 + $0x8] sm:$0xff] (%p51_p3)  ;;  %v229_v2 = vld [vmem:[%s1157_s29 + $0x10] sm:$0xff] (%p51_p3) }
  0x10   : > { %226 = vst [vmem:[%s206_s30] sm:$0xff] (%p51_p3), %v225_v0  ;;  %v231_v3 = vld [vmem:[%s1157_s29 + $0x18] sm:$0xff] (%p51_p3)  ;;  %v233_v4 = vld [vmem:[%s1157_s29 + $0x80] sm:$0xff] (%p51_p3)  ;;  %v235_v5 = vld [vmem:[%s1157_s29 + $0x88] sm:$0xff] (%p51_p3) }
  0x11   : > { %228 = vst [vmem:[%s206_s30 + $0x8] sm:$0xff] %v227_v1  ;;  %v237_v6 = vld [vmem:[%s1157_s29 + $0x90] sm:$0xff]  ;;  %v239_v7 = vld [vmem:[%s1157_s29 + $0x98] sm:$0xff]  ;;  %v241_v8 = vld [vmem:[%s1157_s29 + $0x100] sm:$0xff] }
  0x12   : > { %230 = vst [vmem:[%s206_s30 + $0x10] sm:$0xff] %v229_v2  ;;  %v243_v9 = vld [vmem:[%s1157_s29 + $0x108] sm:$0xff]  ;;  %v245_v10 = vld [vmem:[%s1157_s29 + $0x110] sm:$0xff]  ;;  %v247_v11 = vld [vmem:[%s1157_s29 + $0x118] sm:$0xff] }
  0x13   : > { %232 = vst [vmem:[%s206_s30 + $0x18] sm:$0xff] %v231_v3  ;;  %v249_v12 = vld [vmem:[%s1157_s29 + $0x180] sm:$0xff]  ;;  %v251_v13 = vld [vmem:[%s1157_s29 + $0x188] sm:$0xff]  ;;  %v253_v14 = vld [vmem:[%s1157_s29 + $0x190] sm:$0xff] }
  0x14   : > { %234 = vst [vmem:[%s206_s30 + $0x20] sm:$0xff] %v233_v4  ;;  %v255_v15 = vld [vmem:[%s1157_s29 + $0x198] sm:$0xff] }
  0x15   : > { %236 = vst [vmem:[%s206_s30 + $0x28] sm:$0xff] %v235_v5 }
  0x16   : > { %238 = vst [vmem:[%s206_s30 + $0x30] sm:$0xff] %v237_v6 }
  0x17   : > { %240 = vst [vmem:[%s206_s30 + $0x38] sm:$0xff] %v239_v7 }
  0x18   : > { %242 = vst [vmem:[%s206_s30 + $0x40] sm:$0xff] %v241_v8 }
  0x19   : > { %244 = vst [vmem:[%s206_s30 + $0x48] sm:$0xff] %v243_v9 }
  0x1a   : > { %246 = vst [vmem:[%s206_s30 + $0x50] sm:$0xff] %v245_v10 }
  0x1b   : > { %248 = vst [vmem:[%s206_s30 + $0x58] sm:$0xff] %v247_v11 }
  0x1c   : > { %250 = vst [vmem:[%s206_s30 + $0x60] sm:$0xff] %v249_v12 }
  0x1d   : > { %252 = vst [vmem:[%s206_s30 + $0x68] sm:$0xff] %v251_v13 }
  0x1e   : > { %254 = vst [vmem:[%s206_s30 + $0x70] sm:$0xff] %v253_v14 }
  0x1f   : > { %256 = vst [vmem:[%s206_s30 + $0x78] sm:$0xff] %v255_v15 }
  0x20 PF: > { %p994_p6 = scmp.ge.s32.totalorder %s1086_s19, 1  ;;  %p276_p7 = scmp.lt.s32.totalorder %s1086_s19, 5 }
  0x22   : > { %p277_p8 = pnand %p994_p6, %p276_p7 }
  0x23   : > { %s283_s5 = sand.u32 (!%p277_p8), 1, %s1070_s15   ;;  %s996_s6 = sshll.u32 (!%p277_p8), %s1078_s17, 6 }
  0x24   : > { %280 = sbr.rel (%p277_p8) target bundleno = 308 (0x134), region = 55  ;;  %s995_s7 = sshll.u32 (!%p277_p8), %s283_s5, 7 }
  0x25   : > { %p335_p9 = scmp.lt.s32.totalorder (!%p277_p8), %s996_s6, 255  ;;  %s1184_s12 = scalar_lea.vmem (!%p277_p8), [#allocation3], %s995_s7 }
  0x26   : > { %p999_p10 = scmp.ne.s32.totalorder (!%p277_p8), %s1078_s17, 0 }
  0x29   : > { %s1441_s6 = smov (!%p335_p9, %s996_s6), 255  ;;  %370 = sbr.rel (%p999_p10) target bundleno = 55 (0x37), region = 63 }
  0x2a   : > { %s1006_s8 = sshll.u32 %s1441_s6, 4 }
  0x2b   : > { %s1182_s11 = scalar_lea.vmem %s1430_s1, %s1006_s8 }
  0x2e   : > { %v1088_v16 = vmov 0.0  }
  0x2f   : > { %371 = vst [vmem:[#allocation2 + $0x30] sm:$0xff] %v1088_v16 }
  0x30   : > { %372 = vst [vmem:[#allocation2] sm:$0xff] %v1088_v16 }
  0x31   : > { %373 = vst [vmem:[#allocation2 + $0x18] sm:$0xff] %v1088_v16 }
  0x32   : > { %374 = vst [vmem:[#allocation2 + $0x10] sm:$0xff] %v1088_v16 }
  0x33   : > { %375 = vst [vmem:[#allocation2 + $0x8] sm:$0xff] %v1088_v16 }
  0x34   : > { %376 = vst [vmem:[#allocation2 + $0x20] sm:$0xff] %v1088_v16 }
  0x35   : > { %377 = vst [vmem:[#allocation2 + $0x28] sm:$0xff] %v1088_v16 }
  0x36   : > { %378 = vst [vmem:[#allocation2 + $0x38] sm:$0xff] %v1088_v16 }
  0x37 PF: > { %v497_v17 = vld [vmem:[%s1182_s11 + $0x2f0] sm:$0xff]  ;;  %v495_v18 = vld [vmem:[%s1182_s11 + $0x2e0] sm:$0xff]  ;;  %v1253_v16 = vld [vmem:[%s1184_s12 + $0x18] sm:$0xff]  ;;  %p1000_p11 = scmp.ne.s32.totalorder %s1078_s17, 3 }
  0x38   : > { %v529_v19 = vld [vmem:[%s1182_s11 + $0x3f0] sm:$0xff]  ;;  %589 = vmatpush.msra.mxu2 %v497_v17  ;;  %v527_v23 = vld [vmem:[%s1182_s11 + $0x3e0] sm:$0xff]  ;;  %v498_v17 = vld [vmem:[%s1182_s11 + $0x2f8] sm:$0xff] }
  0x39   : > { %618 = vmatpush.msra.mxu3 %v529_v19  ;;  %v433_v20 = vld [vmem:[%s1182_s11 + $0xf0] sm:$0xff]  ;;  %v431_v24 = vld [vmem:[%s1182_s11 + $0xe0] sm:$0xff] }
  0x3a   : > { %v465_v21 = vld [vmem:[%s1182_s11 + $0x1f0] sm:$0xff]  ;;  %531 = vmatpush.msra.mxu0 %v433_v20  ;;  %v463_v25 = vld [vmem:[%s1182_s11 + $0x1e0] sm:$0xff]  ;;  %590 = vmatpush.msra.mxu2 %v495_v18  ;;  %v530_v18 = vld [vmem:[%s1182_s11 + $0x3f8] sm:$0xff] }
  0x3b   : > { %v493_v22 = vld [vmem:[%s1182_s11 + $0x2d0] sm:$0xff]  ;;  %560 = vmatpush.msra.mxu1 %v465_v21  ;;  %619 = vmatpush.msra.mxu3 %v527_v23  ;;  %v491_v28 = vld [vmem:[%s1182_s11 + $0x2c0] sm:$0xff]  ;;  %v496_v21 = vld [vmem:[%s1182_s11 + $0x2e8] sm:$0xff] }
  0x3c   : > { %v525_v26 = vld [vmem:[%s1182_s11 + $0x3d0] sm:$0xff]  ;;  %532 = vmatpush.msra.mxu0 %v431_v24  ;;  %v523_v30 = vld [vmem:[%s1182_s11 + $0x3c0] sm:$0xff]  ;;  %591 = vmatpush.msra.mxu2 %v493_v22  ;;  %v1266_v23 = vld [vmem:[%s1184_s12 + $0x8] sm:$0xff] }
  0x3d   : > { %v429_v27 = vld [vmem:[%s1182_s11 + $0xd0] sm:$0xff]  ;;  %561 = vmatpush.msra.mxu1 %v463_v25  ;;  %620 = vmatpush.msra.mxu3 %v525_v26  ;;  %v427_v31 = vld [vmem:[%s1182_s11 + $0xc0] sm:$0xff]  ;;  %v434_v24 = vld [vmem:[%s1182_s11 + $0xf8] sm:$0xff] }
  0x3e   : > { %v461_v29 = vld [vmem:[%s1182_s11 + $0x1d0] sm:$0xff]  ;;  %v459_v32 = vld [vmem:[%s1182_s11 + $0x1c0] sm:$0xff]  ;;  %533 = vmatpush.msra.mxu0 %v429_v27  ;;  %592 = vmatpush.msra.mxu2 %v491_v28  ;;  %v466_v25 = vld [vmem:[%s1182_s11 + $0x1f8] sm:$0xff] }
  0x3f   : > { %562 = vmatpush.msra.mxu1 %v461_v29  ;;  %v489_v33 = vld [vmem:[%s1182_s11 + $0x2b0] sm:$0xff]  ;;  %621 = vmatpush.msra.mxu3 %v523_v30  ;;  %v487_v37 = vld [vmem:[%s1182_s11 + $0x2a0] sm:$0xff]  ;;  %v494_v26 = vld [vmem:[%s1182_s11 + $0x2d8] sm:$0xff] }
  0x40   : > { %v521_v34 = vld [vmem:[%s1182_s11 + $0x3b0] sm:$0xff]  ;;  %534 = vmatpush.msra.mxu0 %v427_v31  ;;  %v519_v38 = vld [vmem:[%s1182_s11 + $0x3a0] sm:$0xff]  ;;  %593 = vmatpush.msra.mxu2 %v489_v33  ;;  %v528_v27 = vld [vmem:[%s1182_s11 + $0x3e8] sm:$0xff] }
  0x41   : > { %v425_v35 = vld [vmem:[%s1182_s11 + $0xb0] sm:$0xff]  ;;  %563 = vmatpush.msra.mxu1 %v459_v32  ;;  %622 = vmatpush.msra.mxu3 %v521_v34  ;;  %v423_v39 = vld [vmem:[%s1182_s11 + $0xa0] sm:$0xff]  ;;  %v432_v28 = vld [vmem:[%s1182_s11 + $0xe8] sm:$0xff] }
  0x42   : > { %v457_v36 = vld [vmem:[%s1182_s11 + $0x1b0] sm:$0xff]  ;;  %v455_v40 = vld [vmem:[%s1182_s11 + $0x1a0] sm:$0xff]  ;;  %535 = vmatpush.msra.mxu0 %v425_v35  ;;  %594 = vmatpush.msra.mxu2 %v487_v37  ;;  %v464_v29 = vld [vmem:[%s1182_s11 + $0x1e8] sm:$0xff] }
  0x43   : > { %564 = vmatpush.msra.mxu1 %v457_v36  ;;  %v485_v41 = vld [vmem:[%s1182_s11 + $0x290] sm:$0xff]  ;;  %623 = vmatpush.msra.mxu3 %v519_v38  ;;  %v483_v45 = vld [vmem:[%s1182_s11 + $0x280] sm:$0xff]  ;;  %v492_v30 = vld [vmem:[%s1182_s11 + $0x2c8] sm:$0xff] }
  0x44   : > { %v517_v42 = vld [vmem:[%s1182_s11 + $0x390] sm:$0xff]  ;;  %536 = vmatpush.msra.mxu0 %v423_v39  ;;  %v515_v46 = vld [vmem:[%s1182_s11 + $0x380] sm:$0xff]  ;;  %595 = vmatpush.msra.mxu2 %v485_v41  ;;  %v526_v31 = vld [vmem:[%s1182_s11 + $0x3d8] sm:$0xff] }
  0x45   : > { %v421_v43 = vld [vmem:[%s1182_s11 + $0x90] sm:$0xff]  ;;  %565 = vmatpush.msra.mxu1 %v455_v40  ;;  %624 = vmatpush.msra.mxu3 %v517_v42  ;;  %v419_v47 = vld [vmem:[%s1182_s11 + $0x80] sm:$0xff]  ;;  %v430_v33 = vld [vmem:[%s1182_s11 + $0xd8] sm:$0xff] }
  0x46   : > { %v453_v44 = vld [vmem:[%s1182_s11 + $0x190] sm:$0xff]  ;;  %v451_v48 = vld [vmem:[%s1182_s11 + $0x180] sm:$0xff]  ;;  %537 = vmatpush.msra.mxu0 %v421_v43  ;;  %596 = vmatpush.msra.mxu2 %v483_v45  ;;  %v462_v34 = vld [vmem:[%s1182_s11 + $0x1d8] sm:$0xff] }
  0x47   : > { %566 = vmatpush.msra.mxu1 %v453_v44  ;;  %v481_v49 = vld [vmem:[%s1182_s11 + $0x270] sm:$0xff]  ;;  %625 = vmatpush.msra.mxu3 %v515_v46  ;;  %v479_v53 = vld [vmem:[%s1182_s11 + $0x260] sm:$0xff]  ;;  %v490_v35 = vld [vmem:[%s1182_s11 + $0x2b8] sm:$0xff] }
  0x48   : > { %v513_v50 = vld [vmem:[%s1182_s11 + $0x370] sm:$0xff]  ;;  %538 = vmatpush.msra.mxu0 %v419_v47  ;;  %v511_v54 = vld [vmem:[%s1182_s11 + $0x360] sm:$0xff]  ;;  %597 = vmatpush.msra.mxu2 %v481_v49  ;;  %v524_v36 = vld [vmem:[%s1182_s11 + $0x3c8] sm:$0xff] }
  0x49   : > { %v417_v51 = vld [vmem:[%s1182_s11 + $0x70] sm:$0xff]  ;;  %567 = vmatpush.msra.mxu1 %v451_v48  ;;  %626 = vmatpush.msra.mxu3 %v513_v50  ;;  %v415_v55 = vld [vmem:[%s1182_s11 + $0x60] sm:$0xff]  ;;  %v1287_v37 = vld [vmem:[%s1184_s12 + $0x38] sm:$0xff] }
  0x4a   : > { %v449_v52 = vld [vmem:[%s1182_s11 + $0x170] sm:$0xff]  ;;  %v447_v56 = vld [vmem:[%s1182_s11 + $0x160] sm:$0xff]  ;;  %539 = vmatpush.msra.mxu0 %v417_v51  ;;  %598 = vmatpush.msra.mxu2 %v479_v53  ;;  %v428_v38 = vld [vmem:[%s1182_s11 + $0xc8] sm:$0xff] }
  0x4b   : > { %568 = vmatpush.msra.mxu1 %v449_v52  ;;  %v477_v57 = vld [vmem:[%s1182_s11 + $0x250] sm:$0xff]  ;;  %627 = vmatpush.msra.mxu3 %v511_v54  ;;  %v475_v61 = vld [vmem:[%s1182_s11 + $0x240] sm:$0xff]  ;;  %v460_v39 = vld [vmem:[%s1182_s11 + $0x1c8] sm:$0xff] }
  0x4c   : > { %v509_v58 = vld [vmem:[%s1182_s11 + $0x350] sm:$0xff]  ;;  %540 = vmatpush.msra.mxu0 %v415_v55  ;;  %v507_v62 = vld [vmem:[%s1182_s11 + $0x340] sm:$0xff]  ;;  %599 = vmatpush.msra.mxu2 %v477_v57  ;;  %v488_v40 = vld [vmem:[%s1182_s11 + $0x2a8] sm:$0xff] }
  0x4d   : > { %v413_v59 = vld [vmem:[%s1182_s11 + $0x50] sm:$0xff]  ;;  %569 = vmatpush.msra.mxu1 %v447_v56  ;;  %628 = vmatpush.msra.mxu3 %v509_v58  ;;  %v411_v63 = vld [vmem:[%s1182_s11 + $0x40] sm:$0xff]  ;;  %v522_v41 = vld [vmem:[%s1182_s11 + $0x3b8] sm:$0xff] }
  0x4e   : > { %v445_v60 = vld [vmem:[%s1182_s11 + $0x150] sm:$0xff]  ;;  %v443_v0 = vld [vmem:[%s1182_s11 + $0x140] sm:$0xff]  ;;  %541 = vmatpush.msra.mxu0 %v413_v59  ;;  %600 = vmatpush.msra.mxu2 %v475_v61  ;;  %v1298_v43 = vld [vmem:[%s1184_s12 + $0x28] sm:$0xff] }
  0x4f   : > { %570 = vmatpush.msra.mxu1 %v445_v60  ;;  %v473_v1 = vld [vmem:[%s1182_s11 + $0x230] sm:$0xff]  ;;  %629 = vmatpush.msra.mxu3 %v507_v62  ;;  %v471_v5 = vld [vmem:[%s1182_s11 + $0x220] sm:$0xff]  ;;  %v426_v44 = vld [vmem:[%s1182_s11 + $0xb8] sm:$0xff] }
  0x50   : > { %v505_v2 = vld [vmem:[%s1182_s11 + $0x330] sm:$0xff]  ;;  %542 = vmatpush.msra.mxu0 %v411_v63  ;;  %v503_v6 = vld [vmem:[%s1182_s11 + $0x320] sm:$0xff]  ;;  %601 = vmatpush.msra.mxu2 %v473_v1  ;;  %v458_v45 = vld [vmem:[%s1182_s11 + $0x1b8] sm:$0xff] }
  0x51   : > { %v409_v3 = vld [vmem:[%s1182_s11 + $0x30] sm:$0xff]  ;;  %571 = vmatpush.msra.mxu1 %v443_v0  ;;  %630 = vmatpush.msra.mxu3 %v505_v2  ;;  %v407_v7 = vld [vmem:[%s1182_s11 + $0x20] sm:$0xff]  ;;  %v486_v46 = vld [vmem:[%s1182_s11 + $0x298] sm:$0xff] }
  0x52   : > { %v441_v4 = vld [vmem:[%s1182_s11 + $0x130] sm:$0xff]  ;;  %v439_v8 = vld [vmem:[%s1182_s11 + $0x120] sm:$0xff]  ;;  %543 = vmatpush.msra.mxu0 %v409_v3  ;;  %602 = vmatpush.msra.mxu2 %v471_v5  ;;  %v520_v47 = vld [vmem:[%s1182_s11 + $0x3a8] sm:$0xff] }
  0x53   : > { %572 = vmatpush.msra.mxu1 %v441_v4  ;;  %v469_v9 = vld [vmem:[%s1182_s11 + $0x210] sm:$0xff]  ;;  %631 = vmatpush.msra.mxu3 %v503_v6  ;;  %v467_v13 = vld [vmem:[%s1182_s11 + $0x200] sm:$0xff]  ;;  %v424_v48 = vld [vmem:[%s1182_s11 + $0xa8] sm:$0xff] }
  0x54   : > { %v501_v10 = vld [vmem:[%s1182_s11 + $0x310] sm:$0xff]  ;;  %544 = vmatpush.msra.mxu0 %v407_v7  ;;  %v499_v14 = vld [vmem:[%s1182_s11 + $0x300] sm:$0xff]  ;;  %603 = vmatpush.msra.mxu2 %v469_v9  ;;  %v456_v49 = vld [vmem:[%s1182_s11 + $0x1a8] sm:$0xff] }
  0x55   : > { %v405_v11 = vld [vmem:[%s1182_s11 + $0x10] sm:$0xff]  ;;  %573 = vmatpush.msra.mxu1 %v439_v8  ;;  %632 = vmatpush.msra.mxu3 %v501_v10  ;;  %v403_v19 = vld [vmem:[%s1182_s11] sm:$0xff]  ;;  %v484_v50 = vld [vmem:[%s1182_s11 + $0x288] sm:$0xff] }
  0x56   : > { %v437_v12 = vld [vmem:[%s1182_s11 + $0x110] sm:$0xff]  ;;  %545 = vmatpush.msra.mxu0 %v405_v11  ;;  %604 = vmatpush.msra.mxu2 %v467_v13  ;;  %v435_v20 = vld [vmem:[%s1182_s11 + $0x100] sm:$0xff]  ;;  %v518_v51 = vld [vmem:[%s1182_s11 + $0x398] sm:$0xff] }
  0x57   : > { %v1250_v15 = vld [vmem:[%s1184_s12 + $0x10] sm:$0xff]  ;;  %574 = vmatpush.msra.mxu1 %v437_v12  ;;  %633 = vmatpush.msra.mxu3 %v499_v14  ;;  %v1263_v22 = vld [vmem:[%s1184_s12] sm:$0xff]  ;;  %v422_v53 = vld [vmem:[%s1182_s11 + $0x98] sm:$0xff] }
  0x58   : > { %605 = vmatmul.f32.vlgmr.msra.gmra.mxu2 %v1250_v15  ;;  %634 = vmatmul.f32.vlgmr.msra.gmra.mxu3 %v1253_v16  ;;  %v1279_v32 = vld [vmem:[%s1184_s12 + $0x30] sm:$0xff]  ;;  %v1294_v42 = vld [vmem:[%s1184_s12 + $0x20] sm:$0xff]  ;;  %v454_v54 = vld [vmem:[%s1182_s11 + $0x198] sm:$0xff] }
  0x59   : > { %705 = vmatpush.msrb.mxu2 %v498_v17  ;;  %734 = vmatpush.msrb.mxu3 %v530_v18  ;;  %v1311_v52 = vld [vmem:[%s1184_s12 + $0x50] sm:$0xff]  ;;  %v482_v55 = vld [vmem:[%s1182_s11 + $0x278] sm:$0xff]  ;;  %v516_v56 = vld [vmem:[%s1182_s11 + $0x388] sm:$0xff] }
  0x5a   : > { %546 = vmatpush.msra.mxu0 %v403_v19  ;;  %575 = vmatpush.msra.mxu1 %v435_v20  ;;  %v1319_v57 = vld [vmem:[%s1184_s12 + $0x58] sm:$0xff]  ;;  %v420_v58 = vld [vmem:[%s1182_s11 + $0x88] sm:$0xff]  ;;  %v1326_v62 = vld [vmem:[%s1184_s12 + $0x40] sm:$0xff] }
  0x5b   : > { %706 = vmatpush.msrb.mxu2 %v496_v21  ;;  %547 = vmatmul.f32.vlgmr.msra.gmra.mxu0 %v1263_v22  ;;  %v452_v59 = vld [vmem:[%s1182_s11 + $0x188] sm:$0xff]  ;;  %v514_v61 = vld [vmem:[%s1182_s11 + $0x378] sm:$0xff]  ;;  %v1343_v8 = vld [vmem:[%s1184_s12 + $0x70] sm:$0xff] }
  0x5c   : > { %576 = vmatmul.f32.vlgmr.msra.gmra.mxu1 %v1266_v23  ;;  %647 = vmatpush.msrb.mxu0 %v434_v24  ;;  %v480_v60 = vld [vmem:[%s1182_s11 + $0x268] sm:$0xff]  ;;  %v418_v0 = vld [vmem:[%s1182_s11 + $0x78] sm:$0xff]  ;;  %v399_v20 = vld [vmem:[%s1184_s12 + $0x60] sm:$0xff] }
  0x5d   : > { %676 = vmatpush.msrb.mxu1 %v466_v25  ;;  %707 = vmatpush.msrb.mxu2 %v494_v26  ;;  %v1330_v63 = vld [vmem:[%s1184_s12 + $0x48] sm:$0xff]  ;;  %v450_v1 = vld [vmem:[%s1182_s11 + $0x178] sm:$0xff] }
  0x5e   : > { %735 = vmatpush.msrb.mxu3 %v528_v27  ;;  %648 = vmatpush.msrb.mxu0 %v432_v28  ;;  %v478_v2 = vld [vmem:[%s1182_s11 + $0x258] sm:$0xff]  ;;  %v512_v3 = vld [vmem:[%s1182_s11 + $0x368] sm:$0xff] }
  0x5f   : > { %677 = vmatpush.msrb.mxu1 %v464_v29  ;;  %708 = vmatpush.msrb.mxu2 %v492_v30  ;;  %v416_v4 = vld [vmem:[%s1182_s11 + $0x68] sm:$0xff]  ;;  %v510_v7 = vld [vmem:[%s1182_s11 + $0x358] sm:$0xff] }
  0x60   : > { %736 = vmatpush.msrb.mxu3 %v526_v31  ;;  %608 = vmatmul.f32.gmra.mxu2 %v1279_v32  ;;  %v448_v5 = vld [vmem:[%s1182_s11 + $0x168] sm:$0xff]  ;;  %v414_v9 = vld [vmem:[%s1182_s11 + $0x58] sm:$0xff] }
  0x61   : > { %649 = vmatpush.msrb.mxu0 %v430_v33  ;;  %678 = vmatpush.msrb.mxu1 %v462_v34  ;;  %v476_v6 = vld [vmem:[%s1182_s11 + $0x248] sm:$0xff]  ;;  %v446_v10 = vld [vmem:[%s1182_s11 + $0x158] sm:$0xff] }
  0x62   : > { %709 = vmatpush.msrb.mxu2 %v490_v35  ;;  %737 = vmatpush.msrb.mxu3 %v524_v36  ;;  %v474_v11 = vld [vmem:[%s1182_s11 + $0x238] sm:$0xff]  ;;  %v508_v12 = vld [vmem:[%s1182_s11 + $0x348] sm:$0xff] }
  0x63   : > { %637 = vmatmul.f32.gmra.mxu3 %v1287_v37  ;;  %650 = vmatpush.msrb.mxu0 %v428_v38  ;;  %v402_v13 = vld [vmem:[%s1184_s12 + $0x78] sm:$0xff]  ;;  %v412_v14 = vld [vmem:[%s1182_s11 + $0x48] sm:$0xff] }
  0x64   : > { %679 = vmatpush.msrb.mxu1 %v460_v39  ;;  %710 = vmatpush.msrb.mxu2 %v488_v40  ;;  %v444_v17 = vld [vmem:[%s1182_s11 + $0x148] sm:$0xff]  ;;  %v506_v19 = vld [vmem:[%s1182_s11 + $0x338] sm:$0xff]  ;;  %v379_v39 = vld [vmem:[#allocation2 + $0x30] sm:$0xff] }
  0x65   : > { %738 = vmatpush.msrb.mxu3 %v522_v41  ;;  %550 = vmatmul.f32.gmra.mxu0 %v1294_v42  ;;  %v472_v18 = vld [vmem:[%s1182_s11 + $0x228] sm:$0xff]  ;;  %v410_v24 = vld [vmem:[%s1182_s11 + $0x38] sm:$0xff] }
  0x66   : > { %579 = vmatmul.f32.gmra.mxu1 %v1298_v43  ;;  %651 = vmatpush.msrb.mxu0 %v426_v44  ;;  %v400_v21 = vld [vmem:[%s1184_s12 + $0x68] sm:$0xff]  ;;  %v442_v25 = vld [vmem:[%s1182_s11 + $0x138] sm:$0xff] }
  0x67   : > { %680 = vmatpush.msrb.mxu1 %v458_v45  ;;  %711 = vmatpush.msrb.mxu2 %v486_v46  ;;  %v470_v26 = vld [vmem:[%s1182_s11 + $0x218] sm:$0xff]  ;;  %v504_v27 = vld [vmem:[%s1182_s11 + $0x328] sm:$0xff] }
  0x68   : > { %739 = vmatpush.msrb.mxu3 %v520_v47  ;;  %652 = vmatpush.msrb.mxu0 %v424_v48  ;;  %v408_v28 = vld [vmem:[%s1182_s11 + $0x28] sm:$0xff]  ;;  %v502_v31 = vld [vmem:[%s1182_s11 + $0x318] sm:$0xff] }
  0x69   : > { %681 = vmatpush.msrb.mxu1 %v456_v49  ;;  %712 = vmatpush.msrb.mxu2 %v484_v50  ;;  %v440_v29 = vld [vmem:[%s1182_s11 + $0x128] sm:$0xff]  ;;  %v406_v33 = vld [vmem:[%s1182_s11 + $0x18] sm:$0xff] }
  0x6a   : > { %740 = vmatpush.msrb.mxu3 %v518_v51  ;;  %611 = vmatmul.f32.gmra.mxu2 %v1311_v52  ;;  %v468_v30 = vld [vmem:[%s1182_s11 + $0x208] sm:$0xff]  ;;  %v438_v34 = vld [vmem:[%s1182_s11 + $0x118] sm:$0xff] }
  0x6b   : > { %653 = vmatpush.msrb.mxu0 %v422_v53  ;;  %682 = vmatpush.msrb.mxu1 %v454_v54  ;;  %v500_v35 = vld [vmem:[%s1182_s11 + $0x308] sm:$0xff]  ;;  %v381_v48 = vld [vmem:[#allocation2 + $0x18] sm:$0xff] }
  0x6c   : > { %713 = vmatpush.msrb.mxu2 %v482_v55  ;;  %741 = vmatpush.msrb.mxu3 %v516_v56  ;;  %v404_v36 = vld [vmem:[%s1182_s11 + $0x8] sm:$0xff] }
  0x6d   : > { %640 = vmatmul.f32.gmra.mxu3 %v1319_v57  ;;  %654 = vmatpush.msrb.mxu0 %v420_v58  ;;  %v436_v38 = vld [vmem:[%s1182_s11 + $0x108] sm:$0xff] }
  0x6e   : > { %683 = vmatpush.msrb.mxu1 %v452_v59  ;;  %714 = vmatpush.msrb.mxu2 %v480_v60 }
  0x6f   : > { %742 = vmatpush.msrb.mxu3 %v514_v61  ;;  %553 = vmatmul.f32.gmra.mxu0 %v1326_v62 }
  0x70   : > { %582 = vmatmul.f32.gmra.mxu1 %v1330_v63  ;;  %655 = vmatpush.msrb.mxu0 %v418_v0 }
  0x71   : > { %684 = vmatpush.msrb.mxu1 %v450_v1  ;;  %715 = vmatpush.msrb.mxu2 %v478_v2  ;;  %v385_v2 = vld [vmem:[#allocation2 + $0x28] sm:$0xff] }
  0x72   : > { %743 = vmatpush.msrb.mxu3 %v512_v3  ;;  %656 = vmatpush.msrb.mxu0 %v416_v4 }
  0x73   : > { %685 = vmatpush.msrb.mxu1 %v448_v5  ;;  %716 = vmatpush.msrb.mxu2 %v476_v6 }
  0x74   : > { %744 = vmatpush.msrb.mxu3 %v510_v7  ;;  %614 = vmatmul.f32.gmra.mxu2 %v1343_v8 }
  0x75   : > { %657 = vmatpush.msrb.mxu0 %v414_v9  ;;  %686 = vmatpush.msrb.mxu1 %v446_v10  ;;  %v380_v10 = vld [vmem:[#allocation2] sm:$0xff] }
  0x76   : > { %717 = vmatpush.msrb.mxu2 %v474_v11  ;;  %745 = vmatpush.msrb.mxu3 %v508_v12 }
  0x77   : > { %643 = vmatmul.f32.gmra.mxu3 %v402_v13  ;;  %658 = vmatpush.msrb.mxu0 %v412_v14 }
  0x78   : > { %687 = vmatpush.msrb.mxu1 %v444_v17  ;;  %718 = vmatpush.msrb.mxu2 %v472_v18 }
  0x79   : > { %746 = vmatpush.msrb.mxu3 %v506_v19  ;;  %556 = vmatmul.f32.gmra.mxu0 %v399_v20 }
  0x7a   : > { %585 = vmatmul.f32.gmra.mxu1 %v400_v21  ;;  %659 = vmatpush.msrb.mxu0 %v410_v24 }
  0x7b   : > { %688 = vmatpush.msrb.mxu1 %v442_v25  ;;  %719 = vmatpush.msrb.mxu2 %v470_v26 }
  0x7c   : > { %747 = vmatpush.msrb.mxu3 %v504_v27  ;;  %660 = vmatpush.msrb.mxu0 %v408_v28 }
  0x7d   : > { %689 = vmatpush.msrb.mxu1 %v440_v29  ;;  %720 = vmatpush.msrb.mxu2 %v468_v30 }
  0x7e   : > { %748 = vmatpush.msrb.mxu3 %v502_v31  ;;  %661 = vmatpush.msrb.mxu0 %v406_v33  ;;  %v384_v33 = vld [vmem:[#allocation2 + $0x20] sm:$0xff] }
  0x7f   : > { %690 = vmatpush.msrb.mxu1 %v438_v34  ;;  %721 = vmatmul.f32.vlgmr.msrb.gmra.mxu2 %v1250_v15 }
  0x80   : > { %749 = vmatpush.msrb.mxu3 %v500_v35  ;;  %662 = vmatpush.msrb.mxu0 %v404_v36 }
  0x81   : > { %691 = vmatpush.msrb.mxu1 %v436_v38  ;;  %750 = vmatmul.f32.vlgmr.msrb.gmra.mxu3 %v1253_v16 }
  0x82   : > { %663 = vmatmul.f32.vlgmr.msrb.gmra.mxu0 %v1263_v22  ;;  %692 = vmatmul.f32.vlgmr.msrb.gmra.mxu1 %v1266_v23 }
  0x87   : > { %724 = vmatmul.f32.gmra.mxu2 %v1279_v32 }
  0x89   : > { %753 = vmatmul.f32.gmra.mxu3 %v1287_v37 }
  0x8a   : > { %666 = vmatmul.f32.gmra.mxu0 %v1294_v42  ;;  %695 = vmatmul.f32.gmra.mxu1 %v1298_v43 }
  0x8f   : > { %727 = vmatmul.f32.gmra.mxu2 %v1311_v52 }
  0x91   : > { %756 = vmatmul.f32.gmra.mxu3 %v1319_v57  ;;  %v383_v57 = vld [vmem:[#allocation2 + $0x8] sm:$0xff] }
  0x92   : > { %669 = vmatmul.f32.gmra.mxu0 %v1326_v62  ;;  %698 = vmatmul.f32.gmra.mxu1 %v1330_v63 }
  0x97   : > { %730 = vmatmul.f32.gmra.mxu2 %v1343_v8 }
  0x99   : > { %759 = vmatmul.f32.gmra.mxu3 %v402_v13 }
  0x9a   : > { %672 = vmatmul.f32.gmra.mxu0 %v399_v20  ;;  %701 = vmatmul.f32.gmra.mxu1 %v400_v21  ;;  %v382_v21 = vld [vmem:[#allocation2 + $0x10] sm:$0xff] }
  0xd8   : > { %v548_v15 = vpop.f32.mrf.mxu0 }
  0xd9   : > { %v577_v16 = vpop.f32.mrf.mxu1 }
  0xda   : > { %v578_v22 = vadd.f32 %v577_v16, %v548_v15 }
  0xdb   : > { %v606_v23 = vpop.f32.mrf.mxu2  ;;  %v635_v32 = vpop.f32.mrf.mxu3 }
  0xdc   : > { %v607_v37 = vadd.f32 %v606_v23, %v578_v22 }
  0xde   : > { %v636_v40 = vadd.f32 %v635_v32, %v607_v37  ;;  %v386_v32 = vld [vmem:[#allocation2 + $0x38] sm:$0xff] }
  0xe0   : > { %v763_v41 = vadd.f32 %v636_v40, %v379_v39 }
  0xe2   : > { %771 = vst [vmem:[#allocation2 + $0x30] sm:$0xff] %v763_v41  ;;  %v551_v42 = vpop.f32.mrf.mxu0 }
  0xe3   : > { %v580_v43 = vpop.f32.mrf.mxu1  ;;  %v609_v44 = vpop.f32.mrf.mxu2 }
  0xe4   : > { %v581_v45 = vadd.f32 %v580_v43, %v551_v42 }
  0xe6   : > { %v610_v46 = vadd.f32 %v609_v44, %v581_v45  ;;  %v638_v47 = vpop.f32.mrf.mxu3 }
  0xe8   : > { %v639_v49 = vadd.f32 %v638_v47, %v610_v46 }
  0xea   : > { %v765_v50 = vadd.f32 %v639_v49, %v381_v48 }
  0xec   : > { %773 = vst [vmem:[#allocation2 + $0x18] sm:$0xff] %v765_v50  ;;  %v554_v51 = vpop.f32.mrf.mxu0 }
  0xed   : > { %v583_v52 = vpop.f32.mrf.mxu1  ;;  %v612_v53 = vpop.f32.mrf.mxu2 }
  0xee   : > { %v584_v54 = vadd.f32 %v583_v52, %v554_v51 }
  0xf0   : > { %v613_v55 = vadd.f32 %v612_v53, %v584_v54  ;;  %v641_v56 = vpop.f32.mrf.mxu3 }
  0xf2   : > { %v642_v58 = vadd.f32 %v641_v56, %v613_v55 }
  0xf4   : > { %v767_v59 = vadd.f32 %v642_v58, %v383_v57 }
  0xf6   : > { %775 = vst [vmem:[#allocation2 + $0x8] sm:$0xff] %v767_v59  ;;  %v557_v60 = vpop.f32.mrf.mxu0 }
  0xf7   : > { %v586_v61 = vpop.f32.mrf.mxu1  ;;  %v615_v62 = vpop.f32.mrf.mxu2 }
  0xf8   : > { %v587_v63 = vadd.f32 %v586_v61, %v557_v60 }
  0xfa   : > { %v616_v0 = vadd.f32 %v615_v62, %v587_v63  ;;  %v644_v1 = vpop.f32.mrf.mxu3 }
  0xfc   : > { %v645_v3 = vadd.f32 %v644_v1, %v616_v0 }
  0xfe   : > { %v769_v4 = vadd.f32 %v645_v3, %v385_v2 }
  0xff   : > { %v664_v5 = vpop.f32.mrf.mxu0  ;;  %v693_v6 = vpop.f32.mrf.mxu1 }
 0x100   : > { %777 = vst [vmem:[#allocation2 + $0x28] sm:$0xff] %v769_v4  ;;  %v694_v7 = vadd.f32 %v693_v6, %v664_v5 }
 0x102   : > { %v722_v8 = vpop.f32.mrf.mxu2 }
 0x103   : > { %v723_v9 = vadd.f32 %v722_v8, %v694_v7 }
 0x104   : > { %v751_v11 = vpop.f32.mrf.mxu3 }
 0x105   : > { %v752_v12 = vadd.f32 %v751_v11, %v723_v9 }
 0x107   : > { %v764_v13 = vadd.f32 %v752_v12, %v380_v10  ;;  %v667_v14 = vpop.f32.mrf.mxu0  ;;  %v696_v17 = vpop.f32.mrf.mxu1 }
 0x108   : > { %v697_v18 = vadd.f32 %v696_v17, %v667_v14 }
 0x109   : > { %772 = vst [vmem:[#allocation2] sm:$0xff] %v764_v13 }
 0x10a   : > { %v725_v19 = vpop.f32.mrf.mxu2 }
 0x10b   : > { %v726_v20 = vadd.f32 %v725_v19, %v697_v18 }
 0x10c   : > { %v754_v24 = vpop.f32.mrf.mxu3 }
 0x10d   : > { %v755_v25 = vadd.f32 %v754_v24, %v726_v20 }
 0x10f   : > { %v766_v26 = vadd.f32 %v755_v25, %v382_v21  ;;  %v670_v27 = vpop.f32.mrf.mxu0  ;;  %v699_v28 = vpop.f32.mrf.mxu1 }
 0x110   : > { %v700_v29 = vadd.f32 %v699_v28, %v670_v27 }
 0x111   : > { %774 = vst [vmem:[#allocation2 + $0x10] sm:$0xff] %v766_v26 }
 0x112   : > { %v728_v30 = vpop.f32.mrf.mxu2 }
 0x113   : > { %v729_v31 = vadd.f32 %v728_v30, %v700_v29 }
 0x114   : > { %v757_v34 = vpop.f32.mrf.mxu3 }
 0x115   : > { %v758_v35 = vadd.f32 %v757_v34, %v729_v31 }
 0x117   : > { %v768_v36 = vadd.f32 %v758_v35, %v384_v33  ;;  %v673_v38 = vpop.f32.mrf.mxu0  ;;  %v702_v15 = vpop.f32.mrf.mxu1 }
 0x118   : > { %v703_v16 = vadd.f32 %v702_v15, %v673_v38 }
 0x119   : > { %776 = vst [vmem:[#allocation2 + $0x20] sm:$0xff] %v768_v36 }
 0x11a   : > { %v731_v22 = vpop.f32.mrf.mxu2 }
 0x11b   : > { %v732_v23 = vadd.f32 %v731_v22, %v703_v16 }
 0x11c   : > { %v760_v37 = vpop.f32.mrf.mxu3 }
 0x11d   : > { %v761_v39 = vadd.f32 %v760_v37, %v732_v23  ;;  %782 = sbr.rel (%p1000_p11) target bundleno = 308 (0x134), region = 67 }
 0x11f   : > { %v770_v40 = vadd.f32 %v761_v39, %v386_v32 }
 0x121   : > { %778 = vst [vmem:[#allocation2 + $0x38] sm:$0xff] %v770_v40 }
 0x122   : > { %v783_v41 = vld [vmem:[#allocation2 + $0x30] sm:$0xff]  ;;  %v791_v42 = vld [vmem:[%s1431_s2] sm:$0x3]  ;;  %v785_v49 = vld [vmem:[#allocation2 + $0x18] sm:$0xff] }
 0x123   : > { %v805_v43 = vld [vmem:[%s1432_s3] sm:$0x3]  ;;  %v793_v44 = vperm.slane %v791_v42, 0  ;;  %v794_v47 = vperm.slane %v791_v42, 1  ;;  %v786_v50 = vld [vmem:[#allocation2 + $0x10] sm:$0xff]  ;;  %v787_v51 = vld [vmem:[#allocation2 + $0x8] sm:$0xff] }
 0x124   : > { %v807_v45 = vperm.slane %v805_v43, 0  ;;  %v784_v46 = vld [vmem:[#allocation2] sm:$0xff]  ;;  %v808_v48 = vperm.slane %v805_v43, 1  ;;  %v789_v57 = vld [vmem:[#allocation2 + $0x28] sm:$0xff] }
 0x125   : > { %v788_v52 = vld [vmem:[#allocation2 + $0x20] sm:$0xff]  ;;  %v797_v53 = vmul.f32 %v793_v44, %v783_v41  ;;  %v798_v54 = vmul.f32 %v794_v47, %v784_v46  ;;  %v799_v55 = vmul.f32 %v793_v44, %v785_v49  ;;  %v800_v56 = vmul.f32 %v794_v47, %v786_v50 }
 0x126   : > { %v801_v59 = vmul.f32 %v793_v44, %v787_v51  ;;  %v802_v60 = vmul.f32 %v794_v47, %v788_v52  ;;  %v803_v61 = vmul.f32 %v793_v44, %v789_v57 }
 0x127   : > { %v811_v63 = vadd.f32 %v807_v45, %v797_v53  ;;  %v812_v0 = vadd.f32 %v808_v48, %v798_v54  ;;  %v813_v1 = vadd.f32 %v807_v45, %v799_v55  ;;  %v814_v2 = vadd.f32 %v808_v48, %v800_v56 }
 0x128   : > { %v790_v58 = vld [vmem:[#allocation2 + $0x38] sm:$0xff]  ;;  %v815_v3 = vadd.f32 %v807_v45, %v801_v59  ;;  %v816_v4 = vadd.f32 %v808_v48, %v802_v60  ;;  %v817_v5 = vadd.f32 %v807_v45, %v803_v61 }
 0x129   : > { %v804_v62 = vmul.f32 %v794_v47, %v790_v58  ;;  %vm819_vm0 = vcmp.ge.f32.partialorder %v811_v63, 0.0  ;;  %v827_v7 = vmul.f32 0.2, %v811_v63  ;;  %vm820_vm1 = vcmp.ge.f32.partialorder %v812_v0, 0.0 }
 0x12a   : > { %v828_v8 = vmul.f32 0.2, %v812_v0  ;;  %vm821_vm2 = vcmp.ge.f32.partialorder %v813_v1, 0.0  ;;  %v829_v9 = vmul.f32 0.2, %v813_v1  ;;  %vm822_vm3 = vcmp.ge.f32.partialorder %v814_v2, 0.0 }
 0x12b   : > { %v818_v6 = vadd.f32 %v808_v48, %v804_v62  ;;  %v830_v10 = vmul.f32 0.2, %v814_v2  ;;  %v835_v11 = vsel %vm819_vm0, %v811_v63, %v827_v7  ;;  %vm823_vm4 = vcmp.ge.f32.partialorder %v815_v3, 0.0 }
 0x12c   : > { %v836_v12 = vsel %vm820_vm1, %v812_v0, %v828_v8  ;;  %v831_v13 = vmul.f32 0.2, %v815_v3  ;;  %843 = vst [vmem:[%s1433_s4] sm:$0xff] %v835_v11  ;;  %v837_v14 = vsel %vm821_vm2, %v813_v1, %v829_v9  ;;  %vm824_vm5 = vcmp.ge.f32.partialorder %v816_v4, 0.0 }
 0x12d   : > { %v838_v17 = vsel %vm822_vm3, %v814_v2, %v830_v10  ;;  %v832_v18 = vmul.f32 0.2, %v816_v4  ;;  %844 = vst [vmem:[%s1433_s4 + $0x8] sm:$0xff] %v836_v12  ;;  %vm825_vm6 = vcmp.ge.f32.partialorder %v817_v5, 0.0  ;;  %v833_v20 = vmul.f32 0.2, %v817_v5 }
 0x12e   : > { %v839_v19 = vsel %vm823_vm4, %v815_v3, %v831_v13  ;;  %vm826_vm7 = vcmp.ge.f32.partialorder %v818_v6, 0.0  ;;  %845 = vst [vmem:[%s1433_s4 + $0x10] sm:$0xff] %v837_v14  ;;  %v834_v24 = vmul.f32 0.2, %v818_v6 }
 0x12f   : > { %v840_v21 = vsel %vm824_vm5, %v816_v4, %v832_v18  ;;  %846 = vst [vmem:[%s1433_s4 + $0x18] sm:$0xff] %v838_v17  ;;  %v841_v25 = vsel %vm825_vm6, %v817_v5, %v833_v20 }
 0x130   : > { %847 = vst [vmem:[%s1433_s4 + $0x20] sm:$0xff] %v839_v19  ;;  %v842_v26 = vsel %vm826_vm7, %v818_v6, %v834_v24 }
 0x131   : > { %848 = vst [vmem:[%s1433_s4 + $0x28] sm:$0xff] %v840_v21 }
 0x132   : > { %849 = vst [vmem:[%s1433_s4 + $0x30] sm:$0xff] %v841_v25 }
 0x133   : > { %850 = vst [vmem:[%s1433_s4 + $0x38] sm:$0xff] %v842_v26 }
 0x134 PF: > { %s14_s19 = sadd.s32 1, %s1086_s19   ;;  %s1434_s15 = smov %s1074_s16 }
 0x135   : > { %p11_p12 = scmp.ge.s32.totalorder %s14_s19, 6   ;;  %s1435_s16 = smov %s1149_s23 }
 0x136   : > { %s1436_s17 = smov %s1082_s18  ;;  %s1437_s18 = smov %s1439_s20 }
 0x137   :  { %13 = sbr.rel (!%p11_p12) target bundleno = 3 (0x3), region = 111 }

// kernel: discriminator_forward.7
= control target key start
LH: loop header
LB: loop body
LE: loop exit
PB: predicated region body
PF: predicated region fallthrough
CT: control target
= control target key end

     0   :  { %s807_s15 = smov 0   ;;  %s809_s16 = smov 0   ;;  %s969_s0 = inlined_call_operand.vmem [shape: f32[24,4096], index: 0, kind: input, shape index: {}]   ;;  %s970_s1 = inlined_call_operand.vmem [shape: f32[4096,128], index: 1, kind: input, shape index: {}]   ;;  %s971_s2 = inlined_call_operand.vmem [shape: f32[1,128], index: 2, kind: input, shape index: {}]   ;;  %s972_s3 = inlined_call_operand.vmem [shape: f32[1,128], index: 3, kind: input, shape index: {}]   ;;  %s973_s4 = inlined_call_operand.vmem [shape: f32[24,128], index: 4, kind: output, shape index: {}]  }
   0x1   :  { %s811_s17 = smov 0   ;;  %s813_s18 = smov 0  }
   0x2   :  { %s815_s19 = smov 0  }
   0x3 LB: > { %s26_s20 = sadd.s32 1, %s775_s18  ;;  %p49_p1 = scmp.ne.s32.totalorder %s767_s16, %s763_s15  ;;  %s779_s19 = sphi %s815_s19, %s14_s19   ;;  %s775_s18 = sphi %s813_s18, %s977_s18   ;;  %s771_s17 = sphi %s811_s17, %s976_s17   ;;  %s767_s16 = sphi %s809_s16, %s975_s16   ;;  %s763_s15 = sphi %s807_s15, %s974_s15  }
   0x4   : > { %p27_p0 = scmp.ge.s32.totalorder %s26_s20, 8  ;;  %p50_p2 = scmp.eq.s32.totalorder %s779_s19, 0 }
   0x5   : > { %s42_s22 = sadd.s32 1, %s767_s16  ;;  %p683_p5 = scmp.ge.s32.totalorder %s779_s19, 8 }
   0x6   : > { %s979_s20 = smov (%p27_p0, %s26_s20), 0  ;;  %p51_p3 = por %p50_p2, %p49_p1 }
   0x7   : > { %s38_s21 = ssub.s32 %s775_s18, %s979_s20  ;;  %195 = sbr.rel (%p683_p5) target bundleno = 28 (0x1c), region = 24 }
   0x8   : > { %p40_p4 = scmp.eq.s32.totalorder %s38_s21, 0 }
   0xa   : > { %s842_s23 = scalar_select %p40_p4, %s767_s16, %s42_s22  }
   0xc   : > { %198 = sbr.rel (!%p51_p3) target bundleno = 28 (0x1c), region = 28  ;;  %s200_s24 = sand.u32 (%p51_p3), 1, %s767_s16  }
   0xd   : > { %s695_s25 = sshll.u32 (%p51_p3), %s775_s18, 5  ;;  %s696_s26 = smul.u32 (%p51_p3), 96, %s200_s24 }
   0xe   : > { %s208_s29 = scalar_lea.vmem (%p51_p3), %s969_s0, %s695_s25 }
   0xf   : > { %v221_v0 = vld [vmem:[%s208_s29] sm:$0xff] (%p51_p3)  ;;  %v223_v1 = vld [vmem:[%s208_s29 + $0x8] sm:$0xff] (%p51_p3)  ;;  %v225_v2 = vld [vmem:[%s208_s29 + $0x10] sm:$0xff] (%p51_p3)  ;;  %s202_s30 = scalar_lea.vmem (%p51_p3), [#allocation3], %s696_s26 }
  0x10   : > { %222 = vst [vmem:[%s202_s30] sm:$0xff] (%p51_p3), %v221_v0  ;;  %v227_v3 = vld [vmem:[%s208_s29 + $0x18] sm:$0xff] (%p51_p3)  ;;  %v229_v4 = vld [vmem:[%s208_s29 + $0x100] sm:$0xff] (%p51_p3)  ;;  %v231_v5 = vld [vmem:[%s208_s29 + $0x108] sm:$0xff] (%p51_p3) }
  0x11   : > { %224 = vst [vmem:[%s202_s30 + $0x8] sm:$0xff] %v223_v1  ;;  %v233_v6 = vld [vmem:[%s208_s29 + $0x110] sm:$0xff]  ;;  %v235_v7 = vld [vmem:[%s208_s29 + $0x118] sm:$0xff]  ;;  %v237_v8 = vld [vmem:[%s208_s29 + $0x200] sm:$0xff] }
  0x12   : > { %226 = vst [vmem:[%s202_s30 + $0x10] sm:$0xff] %v225_v2  ;;  %v239_v9 = vld [vmem:[%s208_s29 + $0x208] sm:$0xff]  ;;  %v241_v10 = vld [vmem:[%s208_s29 + $0x210] sm:$0xff]  ;;  %v243_v11 = vld [vmem:[%s208_s29 + $0x218] sm:$0xff] }
  0x13   : > { %228 = vst [vmem:[%s202_s30 + $0x18] sm:$0xff] %v227_v3 }
  0x14   : > { %230 = vst [vmem:[%s202_s30 + $0x20] sm:$0xff] %v229_v4 }
  0x15   : > { %232 = vst [vmem:[%s202_s30 + $0x28] sm:$0xff] %v231_v5 }
  0x16   : > { %234 = vst [vmem:[%s202_s30 + $0x30] sm:$0xff] %v233_v6 }
  0x17   : > { %236 = vst [vmem:[%s202_s30 + $0x38] sm:$0xff] %v235_v7 }
  0x18   : > { %238 = vst [vmem:[%s202_s30 + $0x40] sm:$0xff] %v237_v8 }
  0x19   : > { %240 = vst [vmem:[%s202_s30 + $0x48] sm:$0xff] %v239_v9 }
  0x1a   : > { %242 = vst [vmem:[%s202_s30 + $0x50] sm:$0xff] %v241_v10 }
  0x1b   : > { %244 = vst [vmem:[%s202_s30 + $0x58] sm:$0xff] %v243_v11 }
  0x1c PF: > { %p686_p6 = scmp.ge.s32.totalorder %s779_s19, 1  ;;  %p261_p7 = scmp.lt.s32.totalorder %s779_s19, 9 }
  0x1e   : > { %p262_p8 = pnand %p686_p6, %p261_p7 }
  0x1f   : > { %s268_s5 = sand.u32 (!%p262_p8), 1, %s763_s15   ;;  %s687_s6 = sshll.u32 (!%p262_p8), %s771_s17, 6 }
  0x20   : > { %265 = sbr.rel (%p262_p8) target bundleno = 246 (0xf6), region = 55  ;;  %p313_p9 = scmp.lt.s32.totalorder (!%p262_p8), %s687_s6, 511 }
  0x21   : > { %s697_s7 = smul.u32 (!%p262_p8), 96, %s268_s5  ;;  %p689_p10 = scmp.ne.s32.totalorder (!%p262_p8), %s771_s17, 0 }
  0x23   : > { %s859_s12 = scalar_lea.vmem (!%p262_p8), [#allocation3], %s697_s7 }
  0x25   : > { %s981_s6 = smov (!%p313_p9, %s687_s6), 511  ;;  %339 = sbr.rel (%p689_p10) target bundleno = 46 (0x2e), region = 63 }
  0x26   : > { %s688_s8 = sshll.u32 %s981_s6, 3 }
  0x27   : > { %s857_s11 = scalar_lea.vmem %s970_s1, %s688_s8 }
  0x2a   : > { %v781_v12 = vmov 0.0  }
  0x2b   : > { %340 = vst [vmem:[#allocation2 + $0x10] sm:$0xff] %v781_v12 }
  0x2c   : > { %341 = vst [vmem:[#allocation2] sm:$0xff] %v781_v12 }
  0x2d   : > { %342 = vst [vmem:[#allocation2 + $0x8] sm:$0xff] %v781_v12 }
  0x2e PF: > { %v405_v13 = vld [vmem:[%s857_s11 + $0x178] sm:$0xff]  ;;  %v404_v14 = vld [vmem:[%s857_s11 + $0x170] sm:$0xff]  ;;  %v403_v18 = vld [vmem:[%s857_s11 + $0x168] sm:$0xff]  ;;  %p690_p11 = scmp.ne.s32.totalorder %s771_s17, 7 }
  0x2f   : > { %v421_v15 = vld [vmem:[%s857_s11 + $0x1f8] sm:$0xff]  ;;  %474 = vmatpush.msra.mxu2 %v405_v13  ;;  %v420_v19 = vld [vmem:[%s857_s11 + $0x1f0] sm:$0xff]  ;;  %v419_v22 = vld [vmem:[%s857_s11 + $0x1e8] sm:$0xff] }
  0x30   : > { %500 = vmatpush.msra.mxu3 %v421_v15  ;;  %v373_v16 = vld [vmem:[%s857_s11 + $0x78] sm:$0xff]  ;;  %v372_v20 = vld [vmem:[%s857_s11 + $0x70] sm:$0xff]  ;;  %v371_v23 = vld [vmem:[%s857_s11 + $0x68] sm:$0xff] }
  0x31   : > { %v389_v17 = vld [vmem:[%s857_s11 + $0xf8] sm:$0xff]  ;;  %422 = vmatpush.msra.mxu0 %v373_v16  ;;  %v388_v21 = vld [vmem:[%s857_s11 + $0xf0] sm:$0xff]  ;;  %475 = vmatpush.msra.mxu2 %v404_v14  ;;  %v402_v24 = vld [vmem:[%s857_s11 + $0x160] sm:$0xff] }
  0x32   : > { %448 = vmatpush.msra.mxu1 %v389_v17  ;;  %501 = vmatpush.msra.mxu3 %v420_v19  ;;  %v387_v25 = vld [vmem:[%s857_s11 + $0xe8] sm:$0xff]  ;;  %v418_v26 = vld [vmem:[%s857_s11 + $0x1e0] sm:$0xff]  ;;  %v401_v29 = vld [vmem:[%s857_s11 + $0x158] sm:$0xff] }
  0x33   : > { %423 = vmatpush.msra.mxu0 %v372_v20  ;;  %476 = vmatpush.msra.mxu2 %v403_v18  ;;  %v370_v27 = vld [vmem:[%s857_s11 + $0x60] sm:$0xff]  ;;  %v417_v30 = vld [vmem:[%s857_s11 + $0x1d8] sm:$0xff]  ;;  %v400_v33 = vld [vmem:[%s857_s11 + $0x150] sm:$0xff] }
  0x34   : > { %449 = vmatpush.msra.mxu1 %v388_v21  ;;  %502 = vmatpush.msra.mxu3 %v419_v22  ;;  %v386_v28 = vld [vmem:[%s857_s11 + $0xe0] sm:$0xff]  ;;  %v369_v31 = vld [vmem:[%s857_s11 + $0x58] sm:$0xff]  ;;  %v416_v34 = vld [vmem:[%s857_s11 + $0x1d0] sm:$0xff] }
  0x35   : > { %424 = vmatpush.msra.mxu0 %v371_v23  ;;  %477 = vmatpush.msra.mxu2 %v402_v24  ;;  %v385_v32 = vld [vmem:[%s857_s11 + $0xd8] sm:$0xff]  ;;  %v368_v35 = vld [vmem:[%s857_s11 + $0x50] sm:$0xff]  ;;  %v399_v37 = vld [vmem:[%s857_s11 + $0x148] sm:$0xff] }
  0x36   : > { %450 = vmatpush.msra.mxu1 %v387_v25  ;;  %503 = vmatpush.msra.mxu3 %v418_v26  ;;  %v384_v36 = vld [vmem:[%s857_s11 + $0xd0] sm:$0xff]  ;;  %v415_v38 = vld [vmem:[%s857_s11 + $0x1c8] sm:$0xff]  ;;  %v398_v41 = vld [vmem:[%s857_s11 + $0x140] sm:$0xff] }
  0x37   : > { %425 = vmatpush.msra.mxu0 %v370_v27  ;;  %478 = vmatpush.msra.mxu2 %v401_v29  ;;  %v367_v39 = vld [vmem:[%s857_s11 + $0x48] sm:$0xff]  ;;  %v414_v42 = vld [vmem:[%s857_s11 + $0x1c0] sm:$0xff]  ;;  %v397_v45 = vld [vmem:[%s857_s11 + $0x138] sm:$0xff] }
  0x38   : > { %451 = vmatpush.msra.mxu1 %v386_v28  ;;  %504 = vmatpush.msra.mxu3 %v417_v30  ;;  %v383_v40 = vld [vmem:[%s857_s11 + $0xc8] sm:$0xff]  ;;  %v366_v43 = vld [vmem:[%s857_s11 + $0x40] sm:$0xff]  ;;  %v413_v46 = vld [vmem:[%s857_s11 + $0x1b8] sm:$0xff] }
  0x39   : > { %426 = vmatpush.msra.mxu0 %v369_v31  ;;  %479 = vmatpush.msra.mxu2 %v400_v33  ;;  %v382_v44 = vld [vmem:[%s857_s11 + $0xc0] sm:$0xff]  ;;  %v365_v47 = vld [vmem:[%s857_s11 + $0x38] sm:$0xff]  ;;  %v396_v49 = vld [vmem:[%s857_s11 + $0x130] sm:$0xff] }
  0x3a   : > { %452 = vmatpush.msra.mxu1 %v385_v32  ;;  %505 = vmatpush.msra.mxu3 %v416_v34  ;;  %v381_v48 = vld [vmem:[%s857_s11 + $0xb8] sm:$0xff]  ;;  %v412_v50 = vld [vmem:[%s857_s11 + $0x1b0] sm:$0xff]  ;;  %v395_v53 = vld [vmem:[%s857_s11 + $0x128] sm:$0xff] }
  0x3b   : > { %427 = vmatpush.msra.mxu0 %v368_v35  ;;  %480 = vmatpush.msra.mxu2 %v399_v37  ;;  %v364_v51 = vld [vmem:[%s857_s11 + $0x30] sm:$0xff]  ;;  %v411_v54 = vld [vmem:[%s857_s11 + $0x1a8] sm:$0xff]  ;;  %v394_v57 = vld [vmem:[%s857_s11 + $0x120] sm:$0xff] }
  0x3c   : > { %453 = vmatpush.msra.mxu1 %v384_v36  ;;  %506 = vmatpush.msra.mxu3 %v415_v38  ;;  %v380_v52 = vld [vmem:[%s857_s11 + $0xb0] sm:$0xff]  ;;  %v363_v55 = vld [vmem:[%s857_s11 + $0x28] sm:$0xff]  ;;  %v410_v58 = vld [vmem:[%s857_s11 + $0x1a0] sm:$0xff] }
  0x3d   : > { %428 = vmatpush.msra.mxu0 %v367_v39  ;;  %481 = vmatpush.msra.mxu2 %v398_v41  ;;  %v379_v56 = vld [vmem:[%s857_s11 + $0xa8] sm:$0xff]  ;;  %v362_v59 = vld [vmem:[%s857_s11 + $0x20] sm:$0xff]  ;;  %v393_v61 = vld [vmem:[%s857_s11 + $0x118] sm:$0xff] }
  0x3e   : > { %454 = vmatpush.msra.mxu1 %v383_v40  ;;  %507 = vmatpush.msra.mxu3 %v414_v42  ;;  %v378_v60 = vld [vmem:[%s857_s11 + $0xa0] sm:$0xff]  ;;  %v409_v62 = vld [vmem:[%s857_s11 + $0x198] sm:$0xff]  ;;  %v392_v1 = vld [vmem:[%s857_s11 + $0x110] sm:$0xff] }
  0x3f   : > { %429 = vmatpush.msra.mxu0 %v366_v43  ;;  %482 = vmatpush.msra.mxu2 %v397_v45  ;;  %v361_v63 = vld [vmem:[%s857_s11 + $0x18] sm:$0xff]  ;;  %v408_v2 = vld [vmem:[%s857_s11 + $0x190] sm:$0xff]  ;;  %v391_v5 = vld [vmem:[%s857_s11 + $0x108] sm:$0xff] }
  0x40   : > { %455 = vmatpush.msra.mxu1 %v382_v44  ;;  %508 = vmatpush.msra.mxu3 %v413_v46  ;;  %v377_v0 = vld [vmem:[%s857_s11 + $0x98] sm:$0xff]  ;;  %v360_v3 = vld [vmem:[%s857_s11 + $0x10] sm:$0xff]  ;;  %v407_v6 = vld [vmem:[%s857_s11 + $0x188] sm:$0xff] }
  0x41   : > { %430 = vmatpush.msra.mxu0 %v365_v47  ;;  %483 = vmatpush.msra.mxu2 %v396_v49  ;;  %v376_v4 = vld [vmem:[%s857_s11 + $0x90] sm:$0xff]  ;;  %v359_v7 = vld [vmem:[%s857_s11 + $0x8] sm:$0xff]  ;;  %v390_v9 = vld [vmem:[%s857_s11 + $0x100] sm:$0xff] }
  0x42   : > { %456 = vmatpush.msra.mxu1 %v381_v48  ;;  %509 = vmatpush.msra.mxu3 %v412_v50  ;;  %v375_v8 = vld [vmem:[%s857_s11 + $0x88] sm:$0xff]  ;;  %v406_v10 = vld [vmem:[%s857_s11 + $0x180] sm:$0xff]  ;;  %v349_v12 = vld [vmem:[%s859_s12 + $0x18] sm:$0xff] }
  0x43   : > { %431 = vmatpush.msra.mxu0 %v364_v51  ;;  %484 = vmatpush.msra.mxu2 %v395_v53  ;;  %v348_v11 = vld [vmem:[%s859_s12 + $0x10] sm:$0xff]  ;;  %v358_v13 = vld [vmem:[%s857_s11] sm:$0xff]  ;;  %v346_v15 = vld [vmem:[%s859_s12] sm:$0xff] }
  0x44   : > { %457 = vmatpush.msra.mxu1 %v380_v52  ;;  %510 = vmatpush.msra.mxu3 %v411_v54  ;;  %v374_v14 = vld [vmem:[%s857_s11 + $0x80] sm:$0xff]  ;;  %v352_v17 = vld [vmem:[%s859_s12 + $0x30] sm:$0xff]  ;;  %v353_v18 = vld [vmem:[%s859_s12 + $0x38] sm:$0xff] }
  0x45   : > { %432 = vmatpush.msra.mxu0 %v363_v55  ;;  %485 = vmatpush.msra.mxu2 %v394_v57  ;;  %v347_v16 = vld [vmem:[%s859_s12 + $0x8] sm:$0xff]  ;;  %v350_v19 = vld [vmem:[%s859_s12 + $0x20] sm:$0xff]  ;;  %v356_v21 = vld [vmem:[%s859_s12 + $0x50] sm:$0xff] }
  0x46   : > { %458 = vmatpush.msra.mxu1 %v379_v56  ;;  %511 = vmatpush.msra.mxu3 %v410_v58  ;;  %v351_v20 = vld [vmem:[%s859_s12 + $0x28] sm:$0xff]  ;;  %v357_v22 = vld [vmem:[%s859_s12 + $0x58] sm:$0xff]  ;;  %v354_v23 = vld [vmem:[%s859_s12 + $0x40] sm:$0xff] }
  0x47   : > { %433 = vmatpush.msra.mxu0 %v362_v59  ;;  %486 = vmatpush.msra.mxu2 %v393_v61  ;;  %v355_v24 = vld [vmem:[%s859_s12 + $0x48] sm:$0xff]  ;;  %v343_v31 = vld [vmem:[#allocation2 + $0x10] sm:$0xff]  ;;  %v345_v49 = vld [vmem:[#allocation2 + $0x8] sm:$0xff] }
  0x48   : > { %459 = vmatpush.msra.mxu1 %v378_v60  ;;  %512 = vmatpush.msra.mxu3 %v409_v62  ;;  %v344_v40 = vld [vmem:[#allocation2] sm:$0xff] }
  0x49   : > { %434 = vmatpush.msra.mxu0 %v361_v63  ;;  %487 = vmatpush.msra.mxu2 %v392_v1 }
  0x4a   : > { %460 = vmatpush.msra.mxu1 %v377_v0  ;;  %513 = vmatpush.msra.mxu3 %v408_v2 }
  0x4b   : > { %435 = vmatpush.msra.mxu0 %v360_v3  ;;  %488 = vmatpush.msra.mxu2 %v391_v5 }
  0x4c   : > { %461 = vmatpush.msra.mxu1 %v376_v4  ;;  %514 = vmatpush.msra.mxu3 %v407_v6 }
  0x4d   : > { %436 = vmatpush.msra.mxu0 %v359_v7  ;;  %489 = vmatpush.msra.mxu2 %v390_v9 }
  0x4e   : > { %462 = vmatpush.msra.mxu1 %v375_v8  ;;  %515 = vmatpush.msra.mxu3 %v406_v10 }
  0x4f   : > { %490 = vmatmul.f32.vlgmr.msra.gmra.mxu2 %v348_v11  ;;  %516 = vmatmul.f32.vlgmr.msra.gmra.mxu3 %v349_v12 }
  0x50   : > { %437 = vmatpush.msra.mxu0 %v358_v13  ;;  %463 = vmatpush.msra.mxu1 %v374_v14 }
  0x51   : > { %438 = vmatmul.f32.vlgmr.msra.gmra.mxu0 %v346_v15  ;;  %464 = vmatmul.f32.vlgmr.msra.gmra.mxu1 %v347_v16 }
  0x57   : > { %493 = vmatmul.f32.gmra.mxu2 %v352_v17  ;;  %519 = vmatmul.f32.gmra.mxu3 %v353_v18 }
  0x59   : > { %441 = vmatmul.f32.gmra.mxu0 %v350_v19  ;;  %467 = vmatmul.f32.gmra.mxu1 %v351_v20 }
  0x5f   : > { %496 = vmatmul.f32.gmra.mxu2 %v356_v21  ;;  %522 = vmatmul.f32.gmra.mxu3 %v357_v22 }
  0x61   : > { %444 = vmatmul.f32.gmra.mxu0 %v354_v23  ;;  %470 = vmatmul.f32.gmra.mxu1 %v355_v24 }
  0xce   : > { %v439_v25 = vpop.f32.mrf.mxu0  ;;  %v465_v26 = vpop.f32.mrf.mxu1 }
  0xcf   : > { %v466_v27 = vadd.f32 %v465_v26, %v439_v25 }
  0xd2   : > { %v491_v28 = vpop.f32.mrf.mxu2  ;;  %v517_v29 = vpop.f32.mrf.mxu3 }
  0xd3   : > { %v492_v30 = vadd.f32 %v491_v28, %v466_v27 }
  0xd5   : > { %v518_v32 = vadd.f32 %v517_v29, %v492_v30 }
  0xd6   : > { %v442_v33 = vpop.f32.mrf.mxu0  ;;  %v468_v34 = vpop.f32.mrf.mxu1 }
  0xd7   : > { %v526_v35 = vadd.f32 %v518_v32, %v343_v31  ;;  %v469_v36 = vadd.f32 %v468_v34, %v442_v33 }
  0xd9   : > { %529 = vst [vmem:[#allocation2 + $0x10] sm:$0xff] %v526_v35 }
  0xda   : > { %v494_v37 = vpop.f32.mrf.mxu2  ;;  %v520_v38 = vpop.f32.mrf.mxu3 }
  0xdb   : > { %v495_v39 = vadd.f32 %v494_v37, %v469_v36 }
  0xdd   : > { %v521_v41 = vadd.f32 %v520_v38, %v495_v39 }
  0xde   : > { %v445_v42 = vpop.f32.mrf.mxu0  ;;  %v471_v43 = vpop.f32.mrf.mxu1 }
  0xdf   : > { %v527_v44 = vadd.f32 %v521_v41, %v344_v40  ;;  %v472_v45 = vadd.f32 %v471_v43, %v445_v42 }
  0xe1   : > { %530 = vst [vmem:[#allocation2] sm:$0xff] %v527_v44 }
  0xe2   : > { %v497_v46 = vpop.f32.mrf.mxu2  ;;  %v523_v47 = vpop.f32.mrf.mxu3 }
  0xe3   : > { %v498_v48 = vadd.f32 %v497_v46, %v472_v45 }
  0xe5   : > { %v524_v50 = vadd.f32 %v523_v47, %v498_v48  ;;  %535 = sbr.rel (%p690_p11) target bundleno = 246 (0xf6), region = 67 }
  0xe7   : > { %v528_v51 = vadd.f32 %v524_v50, %v345_v49 }
  0xe9   : > { %531 = vst [vmem:[#allocation2 + $0x8] sm:$0xff] %v528_v51 }
  0xea   : > { %v536_v52 = vld [vmem:[#allocation2 + $0x10] sm:$0xff]  ;;  %v739_v53 = vld [vmem:[%s971_s2] ss:$0 sm:$0xff] }
  0xeb   : > { %v740_v54 = vld [vmem:[%s972_s3] ss:$0 sm:$0xff]  ;;  %v543_v56 = vmul.f32 %v739_v53, %v536_v52 }
  0xec   : > { %v537_v55 = vld [vmem:[#allocation2] sm:$0xff] }
  0xed   : > { %v544_v57 = vmul.f32 %v739_v53, %v537_v55  ;;  %v550_v60 = vadd.f32 %v740_v54, %v543_v56 }
  0xef   : > { %v551_v61 = vadd.f32 %v740_v54, %v544_v57  ;;  %553 = vst [vmem:[%s973_s4] sm:$0xff] %v550_v60 }
  0xf0   : > { %v538_v58 = vld [vmem:[#allocation2 + $0x8] sm:$0xff] }
  0xf1   : > { %v545_v59 = vmul.f32 %v739_v53, %v538_v58  ;;  %554 = vst [vmem:[%s973_s4 + $0x8] sm:$0xff] %v551_v61 }
  0xf3   : > { %v552_v62 = vadd.f32 %v740_v54, %v545_v59 }
  0xf5   : > { %555 = vst [vmem:[%s973_s4 + $0x10] sm:$0xff] %v552_v62 }
  0xf6 PF: > { %s14_s19 = sadd.s32 1, %s779_s19   ;;  %s974_s15 = smov %s767_s16 }
  0xf7   : > { %p11_p12 = scmp.ge.s32.totalorder %s14_s19, 10   ;;  %s975_s16 = smov %s842_s23 }
  0xf8   : > { %s976_s17 = smov %s775_s18  ;;  %s977_s18 = smov %s979_s20 }
  0xf9   :  { %13 = sbr.rel (!%p11_p12) target bundleno = 3 (0x3), region = 111 }

</bundles_post_ra>
